<compile_context>
chip_gen: v7x
topology: tpu7x:2x2x1
jax: 0.10.0
libtpu: 0.0.40
codegen_flags: <defaults>
</compile_context>

<pallas_src>
from functools import partial

import jax
import jax.numpy as jnp
from jax.experimental import pallas as pl
from jax.experimental.pallas import tpu as pltpu

PAD = -10000.0
BOS = -10001.0
EOS = -10002.0

LANE = 128     # lane width   -> hidden size padded to a multiple of this
SUBLANE = 8    # sublane count -> batch padded to a multiple of this


# --------------------------------------------------------------------------- #
# kernel
# --------------------------------------------------------------------------- #

def _rnn_wavefront(num_layers, num_steps, layer0_input,
                   wih_ref, whh_ref, bih_ref, bhh_ref, h_init, collect_top):
    """Fully-unrolled, wavefront-ordered L-layer tanh RNN (nn.RNN semantics).

    layer0_input(t) -> (Bp, Hp) input to layer 0 at timestep t (embedding + W_ih0
                       already folded in by the wrapper).
    h_init          -> list of L (Bp, Hp) initial hidden states.
    collect_top(t,h)-> called exactly once per timestep with the top layer's output.
    Returns the list of L final hidden states.
    """
    L, T = num_layers, num_steps
    h = list(h_init)
    prev = [None] * L                     # prev[l] = layer l output at its latest t
    for s in range(T + L - 1):
        # descending layer order: layer l must read prev[l-1] (timestep s-l) BEFORE
        # layer l-1 rebinds it to timestep s-l+1 in this same wave.
        for l in range(L - 1, -1, -1):
            t = s - l
            if 0 <= t < T:
                if l == 0:
                    x_t = layer0_input(t)
                else:
                    # off the critical chain: depends on the lower layer only
                    x_t = (jnp.dot(prev[l - 1], wih_ref[l],
                                   preferred_element_type=jnp.float32)
                           + bih_ref[l])
                h_new = jnp.tanh(
                    x_t
                    + jnp.dot(h[l], whh_ref[l], preferred_element_type=jnp.float32)
                    + bhh_ref[l])
                h[l] = h_new
                prev[l] = h_new
                if l == L - 1:
                    collect_top(t, h_new)
    return h


def _fused_forward_kernel(
        src_ref, dec_ref,
        enc_weff_ref, enc_beff_ref, enc_wih_ref, enc_whh_ref, enc_bih_ref, enc_bhh_ref,
        dec_weff_ref, dec_beff_ref, dec_wih_ref, dec_whh_ref, dec_bih_ref, dec_bhh_ref,
        head_w_ref, head_b_ref, len_w1_ref, len_b1_ref, len_w2_ref, len_b2_ref,
        pred_ref, len_ref):
    f32 = jnp.float32
    Bp, t_src = src_ref.shape
    n_steps = dec_ref.shape[1]
    num_layers = enc_whh_ref.shape[0]
    Hp = enc_whh_ref.shape[-1]

    # ----------------- encoder: scalar embedding + L-layer tanh RNN ----------------- #
    enc_weff = enc_weff_ref[...]          # (1, Hp)  Linear(1,H) folded with layer-0 W_ih
    enc_beff = enc_beff_ref[...]          # (1, Hp)  bias fold includes b_ih0
    pooled = jnp.zeros((Bp, Hp), f32)     # running sum of top-layer outputs (mean pool)

    def enc_x0(t):
        # scalar embedding: VPU broadcast mul-add, no K=1 MXU matmul
        return src_ref[:, t:t + 1] * enc_weff + enc_beff

    def enc_collect(t, h_top):
        nonlocal pooled
        pooled = pooled + h_top

    h0 = [jnp.zeros((Bp, Hp), f32) for _ in range(num_layers)]
    enc_final = _rnn_wavefront(num_layers, t_src, enc_x0,
                               enc_wih_ref, enc_whh_ref, enc_bih_ref, enc_bhh_ref,
                               h0, enc_collect)

    # --------- predict_length: mean over T -> Linear -> LeakyReLU -> Linear(H,1) ---------- #
    pooled = pooled * (1.0 / t_src)
    h1 = (jnp.dot(pooled, len_w1_ref[...], preferred_element_type=f32)
          + len_b1_ref[...])
    h1 = jnp.where(h1 >= 0.0, h1, 0.01 * h1)        # LeakyReLU(0.01); Dropout = identity
    len_ref[...] = (jnp.sum(h1 * len_w2_ref[...], axis=-1, keepdims=True)
                    + len_b2_ref[...])               # (Bp, 1)

    # -------------- decoder: teacher-forced embedding + RNN + output head ---------------- #
    dec_weff = dec_weff_ref[...]
    dec_beff = dec_beff_ref[...]
    head_w = head_w_ref[...]              # (1, Hp)  Linear(H,1) as a row -> lane reduce
    head_b = head_b_ref[...]              # (1, 1)

    eos_any = None
    pred_last = None

    def dec_x0(t):
        return dec_ref[:, t:t + 1] * dec_weff + dec_beff

    def dec_collect(t, h_top):
        nonlocal eos_any, pred_last
        p = jnp.sum(h_top * head_w, axis=-1, keepdims=True) + head_b       # (Bp, 1)
        is_eos = p == EOS
        eos_any = is_eos if eos_any is None else jnp.logical_or(eos_any, is_eos)
        if t + 1 < n_steps:
            pred_ref[:, t + 1:t + 2] = p      # lane-dense output: timesteps on lanes
        else:
            pred_last = p                     # last column gets the EOS fixup below

    _rnn_wavefront(num_layers, n_steps, dec_x0,
                   dec_wih_ref, dec_whh_ref, dec_bih_ref, dec_bhh_ref,
                   enc_final, dec_collect)

    pred_ref[:, 0:1] = jnp.full((Bp, 1), BOS, f32)               # predictions[:, 0] = BOS
    pred_ref[:, n_steps:n_steps + 1] = jnp.where(eos_any, pred_last, EOS)
    # ^ predictions[~finished, -1] = EOS (float-equality with EOS, as in the reference)


# --------------------------------------------------------------------------- #
# wrappers
# --------------------------------------------------------------------------- #

def _pad_last(x, hp):
    h = x.shape[-1]
    return jnp.pad(x, [(0, 0)] * (x.ndim - 1) + [(0, hp - h)])


def prepare_params(params, *, hidden_size):
    """Fold the Linear(1,H) embeddings into layer-0 and zero-pad H to the lane width.

    Zero padding is exact: padded hidden units see zero input, bias and recurrent
    weight, so tanh(0)=0 keeps them at zero forever and they contribute nothing to
    the real units or to the lane reductions.  (Folding is valid because embed_src/
    embed_tgt is a bare nn.Linear followed only by eval-mode Dropout.)
    """
    H = hidden_size
    Hp = ((H + LANE - 1) // LANE) * LANE
    hi = jax.lax.Precision.HIGHEST

    def fold(emb_w, emb_b, wih0, bih0):
        weff = jnp.dot(emb_w, wih0, precision=hi)               # (1, H)
        beff = jnp.dot(emb_b, wih0, precision=hi) + bih0        # (1, H)
        return _pad_last(weff, Hp), _pad_last(beff, Hp)

    def pad_hh(w):                                               # (L,H,H) -> (L,Hp,Hp)
        return jnp.pad(w, ((0, 0), (0, Hp - H), (0, Hp - H)))

    enc_weff, enc_beff = fold(params["emb_src_w"], params["emb_src_b"],
                              params["enc_wih"][0], params["enc_bih"][0])
    dec_weff, dec_beff = fold(params["emb_tgt_w"], params["emb_tgt_b"],
                              params["dec_wih"][0], params["dec_bih"][0])
    return {
        "enc_weff": enc_weff, "enc_beff": enc_beff,
        "enc_wih": pad_hh(params["enc_wih"]), "enc_whh": pad_hh(params["enc_whh"]),
        "enc_bih": _pad_last(params["enc_bih"], Hp),
        "enc_bhh": _pad_last(params["enc_bhh"], Hp),
        "dec_weff": dec_weff, "dec_beff": dec_beff,
        "dec_wih": pad_hh(params["dec_wih"]), "dec_whh": pad_hh(params["dec_whh"]),
        "dec_bih": _pad_last(params["dec_bih"], Hp),
        "dec_bhh": _pad_last(params["dec_bhh"], Hp),
        "head_w": _pad_last(params["head_w"], Hp), "head_b": params["head_b"],
        "len_w1": jnp.pad(params["len_w1"], ((0, Hp - H), (0, Hp - H))),
        "len_b1": _pad_last(params["len_b1"], Hp),
        "len_w2": _pad_last(params["len_w2"], Hp), "len_b2": params["len_b2"],
    }


def recurrent_approximator_forward(prepared, inputs, targets, *, max_length):
    """Mirrors RecurrentApproximator.forward (rnn cell, no attention, unidirectional,
    eval mode, teacher forcing always on).  One pallas_call for the whole pass."""
    B, T_src = inputs.shape
    T_tgt = targets.shape[1]
    n_steps = max_length - 1
    assert n_steps >= 1
    Bp = ((B + SUBLANE - 1) // SUBLANE) * SUBLANE

    inputs = inputs.astype(jnp.float32)
    targets = targets.astype(jnp.float32)

    # batch padded to the sublane count; padded rows are dummies stripped at the end
    src = jnp.pad(inputs, ((0, Bp - B), (0, 0)))                     # (Bp, T_src)

    # teacher-forced decoder inputs for steps i = 1 .. max_length-1:
    #   i=1 -> BOS ; i>=2 -> targets[:, i-1] if i-1 < T_tgt else PAD
    n_from_tgt = max(0, min(T_tgt - 1, n_steps - 1))
    pieces = [jnp.full((B, 1), BOS, jnp.float32)]
    if n_from_tgt > 0:
        pieces.append(targets[:, 1:1 + n_from_tgt])
    if n_steps - 1 - n_from_tgt > 0:
        pieces.append(jnp.full((B, n_steps - 1 - n_from_tgt), PAD, jnp.float32))
    dec_in = jnp.concatenate(pieces, axis=1)                         # (B, n_steps)
    dec_in = jnp.pad(dec_in, ((0, Bp - B), (0, 0)))                  # (Bp, n_steps)

    preds, lens = pl.pallas_call(
        _fused_forward_kernel,
        out_shape=(jax.ShapeDtypeStruct((Bp, max_length), jnp.float32),
                   jax.ShapeDtypeStruct((Bp, 1), jnp.float32)),
        compiler_params=pltpu.CompilerParams(vmem_limit_bytes=32 * 1024 * 1024),
    )(src, dec_in,
      prepared["enc_weff"], prepared["enc_beff"],
      prepared["enc_wih"], prepared["enc_whh"],
      prepared["enc_bih"], prepared["enc_bhh"],
      prepared["dec_weff"], prepared["dec_beff"],
      prepared["dec_wih"], prepared["dec_whh"],
      prepared["dec_bih"], prepared["dec_bhh"],
      prepared["head_w"], prepared["head_b"],
      prepared["len_w1"], prepared["len_b1"],
      prepared["len_w2"], prepared["len_b2"])

    return preds[:B], lens[:B, 0]


# --------------------------------------------------------------------------- #
# parameter init + pure-JAX reference (for self-check)
# --------------------------------------------------------------------------- #

def init_params(key, hidden_size, num_layers):
    H, L = hidden_size, num_layers
    keys = iter(jax.random.split(key, 24))

    def w(shape, scale=0.05):
        return scale * jax.random.normal(next(keys), shape, jnp.float32)

    def rnn_stack():
        # W_ih^T / W_hh^T stacked per layer so that x @ w == x @ W.T (PyTorch layout)
        return w((L, H, H)), w((L, H, H)), w((L, 1, H)), w((L, 1, H))

    enc_wih, enc_whh, enc_bih, enc_bhh = rnn_stack()
    dec_wih, dec_whh, dec_bih, dec_bhh = rnn_stack()
    return {
        "emb_src_w": w((1, H)), "emb_src_b": w((1, H)),    # nn.Linear(1, H)
        "emb_tgt_w": w((1, H)), "emb_tgt_b": w((1, H)),
        "enc_wih": enc_wih, "enc_whh": enc_whh, "enc_bih": enc_bih, "enc_bhh": enc_bhh,
        "dec_wih": dec_wih, "dec_whh": dec_whh, "dec_bih": dec_bih, "dec_bhh": dec_bhh,
        "head_w": w((1, H)), "head_b": w((1, 1)),          # nn.Linear(H, 1)
        "len_w1": w((H, H)), "len_b1": w((1, H)),          # LengthPredictionHead
        "len_w2": w((1, H)), "len_b2": w((1, 1)),
    }


def reference_forward(params, inputs, targets, *, hidden_size, num_layers, max_length):
    """Pure-JAX mirror of the PyTorch forward under the same (default) config."""
    H, L = hidden_size, num_layers
    B = inputs.shape[0]
    T_tgt = targets.shape[1]
    hi = jax.lax.Precision.HIGHEST

    def rnn(x, wih, whh, bih, bhh, h0):
        T = x.shape[1]
        outs, finals = x, []
        for l in range(L):
            h, ys = h0[l], []
            for t in range(T):
                h = jnp.tanh(jnp.dot(outs[:, t], wih[l], precision=hi) + bih[l]
                             + jnp.dot(h, whh[l], precision=hi) + bhh[l])
                ys.append(h)
            outs = jnp.stack(ys, axis=1)
            finals.append(h)
        return outs, finals

    x = inputs[:, :, None] * params["emb_src_w"] + params["emb_src_b"]
    enc_out, enc_hid = rnn(x, params["enc_wih"], params["enc_whh"],
                           params["enc_bih"], params["enc_bhh"],
                           [jnp.zeros((B, H), jnp.float32)] * L)
    pooled = enc_out.mean(axis=1)
    h1 = jnp.dot(pooled, params["len_w1"], precision=hi) + params["len_b1"]
    h1 = jnp.where(h1 >= 0.0, h1, 0.01 * h1)
    lengths = jnp.sum(h1 * params["len_w2"], axis=-1) + params["len_b2"][0, 0]

    n_steps = max_length - 1
    cols = []
    for j in range(n_steps):
        if j == 0:
            cols.append(jnp.full((B,), BOS, jnp.float32))
        elif j < T_tgt:
            cols.append(targets[:, j].astype(jnp.float32))
        else:
            cols.append(jnp.full((B,), PAD, jnp.float32))
    dec_in = jnp.stack(cols, axis=1)
    xd = dec_in[:, :, None] * params["emb_tgt_w"] + params["emb_tgt_b"]
    dec_out, _ = rnn(xd, params["dec_wih"], params["dec_whh"],
                     params["dec_bih"], params["dec_bhh"], enc_hid)
    body = jnp.sum(dec_out * params["head_w"], axis=-1) + params["head_b"][0, 0]
    finished = jnp.any(body == EOS, axis=1)
    body = body.at[:, -1].set(jnp.where(finished, body[:, -1], EOS))
    predictions = jnp.concatenate(
        [jnp.full((B, 1), BOS, jnp.float32), body], axis=1)
    return predictions, lengths


# --------------------------------------------------------------------------- #
# main
# --------------------------------------------------------------------------- #

if __name__ == "__main__":
    H, L, MAX_LEN = 64, 2, 12            # hidden_size / num_layers / max_length
    B, T_SRC, T_TGT = 2, 8, 8

    key = jax.random.PRNGKey(0)
    k_in, k_tgt, k_par = jax.random.split(key, 3)

    # sequences carry BOS ... values ... EOS (as the collate fn would produce)
    inner_src = jax.random.uniform(k_in, (B, T_SRC - 2), minval=-1.0, maxval=1.0)
    inputs = jnp.concatenate(
        [jnp.full((B, 1), BOS, jnp.float32), inner_src,
         jnp.full((B, 1), EOS, jnp.float32)], axis=1).astype(jnp.float32)

    inner_tgt = jax.random.uniform(k_tgt, (B, T_TGT - 2), minval=-1.0, maxval=1.0)
    targets = jnp.concatenate(
        [jnp.full((B, 1), BOS, jnp.float32), inner_tgt,
         jnp.full((B, 1), EOS, jnp.float32)], axis=1).astype(jnp.float32)

    params = init_params(k_par, H, L)
    prepared = prepare_params(params, hidden_size=H)     # fold + pad once, outside jit

    fwd = jax.jit(partial(recurrent_approximator_forward, max_length=MAX_LEN))
    predictions, lengths = fwd(prepared, inputs, targets)
    jax.block_until_ready((predictions, lengths))

    # ---- self-check against a pure-JAX reference of the same forward pass ----
    ref_preds, ref_lengths = reference_forward(
        params, inputs, targets, hidden_size=H, num_layers=L, max_length=MAX_LEN)

    assert predictions.shape == (B, MAX_LEN)
    assert lengths.shape == (B,)
    assert bool(jnp.all(jnp.isfinite(predictions))) and bool(jnp.all(jnp.isfinite(lengths)))
    assert float(jnp.max(jnp.abs(predictions - ref_preds))) < 2e-2
    assert float(jnp.max(jnp.abs(lengths - ref_lengths))) < 2e-2
    print("KERNEL_OK")
</pallas_src>

<mosaic_0001>
module attributes {stable_mosaic.version = 11 : i64} {
  func.func @_fused_forward_kernel(%arg0: memref<8x8xf32, #tpu.memory_space<vmem>>, %arg1: memref<8x11xf32, #tpu.memory_space<vmem>>, %arg2: memref<1x128xf32, #tpu.memory_space<vmem>>, %arg3: memref<1x128xf32, #tpu.memory_space<vmem>>, %arg4: memref<2x128x128xf32, #tpu.memory_space<vmem>>, %arg5: memref<2x128x128xf32, #tpu.memory_space<vmem>>, %arg6: memref<2x1x128xf32, #tpu.memory_space<vmem>>, %arg7: memref<2x1x128xf32, #tpu.memory_space<vmem>>, %arg8: memref<1x128xf32, #tpu.memory_space<vmem>>, %arg9: memref<1x128xf32, #tpu.memory_space<vmem>>, %arg10: memref<2x128x128xf32, #tpu.memory_space<vmem>>, %arg11: memref<2x128x128xf32, #tpu.memory_space<vmem>>, %arg12: memref<2x1x128xf32, #tpu.memory_space<vmem>>, %arg13: memref<2x1x128xf32, #tpu.memory_space<vmem>>, %arg14: memref<1x128xf32, #tpu.memory_space<vmem>>, %arg15: memref<1x1xf32, #tpu.memory_space<vmem>>, %arg16: memref<128x128xf32, #tpu.memory_space<vmem>>, %arg17: memref<1x128xf32, #tpu.memory_space<vmem>>, %arg18: memref<1x128xf32, #tpu.memory_space<vmem>>, %arg19: memref<1x1xf32, #tpu.memory_space<vmem>>, %arg20: memref<8x12xf32, #tpu.memory_space<vmem>>, %arg21: memref<8x1xf32, #tpu.memory_space<vmem>>) attributes {dimension_semantics = [], scalar_prefetch = 0 : i64, scratch_operands = 0 : i64, tpu.core_type = #tpu.core_type<tc>} {
    %c0 = arith.constant 0 : index
    %c0_0 = arith.constant 0 : index
    %0 = vector.load %arg2[%c0, %c0_0] : memref<1x128xf32, #tpu.memory_space<vmem>>, vector<1x128xf32>
    %c0_1 = arith.constant 0 : index
    %c0_2 = arith.constant 0 : index
    %1 = vector.load %arg3[%c0_1, %c0_2] : memref<1x128xf32, #tpu.memory_space<vmem>>, vector<1x128xf32>
    %cst = arith.constant 0.000000e+00 : f32
    %2 = vector.broadcast %cst : f32 to vector<8x128xf32>
    %cst_3 = arith.constant 0.000000e+00 : f32
    %3 = vector.broadcast %cst_3 : f32 to vector<8x128xf32>
    %cst_4 = arith.constant 0.000000e+00 : f32
    %4 = vector.broadcast %cst_4 : f32 to vector<8x128xf32>
    %c0_5 = arith.constant 0 : index
    %c0_6 = arith.constant 0 : index
    %5 = vector.load %arg0[%c0_5, %c0_6] : memref<8x8xf32, #tpu.memory_space<vmem>>, vector<8x1xf32>
    %6 = vector.broadcast %5 : vector<8x1xf32> to vector<8x128xf32>
    %7 = vector.broadcast %0 : vector<1x128xf32> to vector<8x128xf32>
    %8 = arith.mulf %6, %7 : vector<8x128xf32>
    %9 = vector.broadcast %1 : vector<1x128xf32> to vector<8x128xf32>
    %10 = arith.addf %8, %9 : vector<8x128xf32>
    %c0_7 = arith.constant 0 : index
    %c0_8 = arith.constant 0 : index
    %c0_9 = arith.constant 0 : index
    %11 = vector.load %arg5[%c0_7, %c0_8, %c0_9] : memref<2x128x128xf32, #tpu.memory_space<vmem>>, vector<1x128x128xf32>
    %12 = vector.shape_cast %11 : vector<1x128x128xf32> to vector<128x128xf32>
    %cst_10 = arith.constant dense<0.000000e+00> : vector<8x128xf32>
    %13 = tpu.matmul %3, %12, %cst_10 {dimension_numbers = #tpu.dot_dimension_numbers<[1], [0], [0], [1], [0, 0, 1, 1], [], []>} : vector<8x128xf32>, vector<128x128xf32>, vector<8x128xf32> -> vector<8x128xf32>
    %14 = arith.addf %10, %13 : vector<8x128xf32>
    %c0_11 = arith.constant 0 : index
    %c0_12 = arith.constant 0 : index
    %c0_13 = arith.constant 0 : index
    %15 = vector.load %arg7[%c0_11, %c0_12, %c0_13] : memref<2x1x128xf32, #tpu.memory_space<vmem>>, vector<1x1x128xf32>
    %16 = vector.shape_cast %15 : vector<1x1x128xf32> to vector<1x128xf32>
    %17 = vector.broadcast %16 : vector<1x128xf32> to vector<8x128xf32>
    %18 = arith.addf %14, %17 : vector<8x128xf32>
    %19 = math.tanh %18 : vector<8x128xf32>
    %c1 = arith.constant 1 : index
    %c0_14 = arith.constant 0 : index
    %c0_15 = arith.constant 0 : index
    %20 = vector.load %arg4[%c1, %c0_14, %c0_15] : memref<2x128x128xf32, #tpu.memory_space<vmem>>, vector<1x128x128xf32>
    %21 = vector.shape_cast %20 : vector<1x128x128xf32> to vector<128x128xf32>
    %cst_16 = arith.constant dense<0.000000e+00> : vector<8x128xf32>
    %22 = tpu.matmul %19, %21, %cst_16 {dimension_numbers = #tpu.dot_dimension_numbers<[1], [0], [0], [1], [0, 0, 1, 1], [], []>} : vector<8x128xf32>, vector<128x128xf32>, vector<8x128xf32> -> vector<8x128xf32>
    %c1_17 = arith.constant 1 : index
    %c0_18 = arith.constant 0 : index
    %c0_19 = arith.constant 0 : index
    %23 = vector.load %arg6[%c1_17, %c0_18, %c0_19] : memref<2x1x128xf32, #tpu.memory_space<vmem>>, vector<1x1x128xf32>
    %24 = vector.shape_cast %23 : vector<1x1x128xf32> to vector<1x128xf32>
    %25 = vector.broadcast %24 : vector<1x128xf32> to vector<8x128xf32>
    %26 = arith.addf %22, %25 : vector<8x128xf32>
    %c1_20 = arith.constant 1 : index
    %c0_21 = arith.constant 0 : index
    %c0_22 = arith.constant 0 : index
    %27 = vector.load %arg5[%c1_20, %c0_21, %c0_22] : memref<2x128x128xf32, #tpu.memory_space<vmem>>, vector<1x128x128xf32>
    %28 = vector.shape_cast %27 : vector<1x128x128xf32> to vector<128x128xf32>
    %cst_23 = arith.constant dense<0.000000e+00> : vector<8x128xf32>
    %29 = tpu.matmul %4, %28, %cst_23 {dimension_numbers = #tpu.dot_dimension_numbers<[1], [0], [0], [1], [0, 0, 1, 1], [], []>} : vector<8x128xf32>, vector<128x128xf32>, vector<8x128xf32> -> vector<8x128xf32>
    %30 = arith.addf %26, %29 : vector<8x128xf32>
    %c1_24 = arith.constant 1 : index
    %c0_25 = arith.constant 0 : index
    %c0_26 = arith.constant 0 : index
    %31 = vector.load %arg7[%c1_24, %c0_25, %c0_26] : memref<2x1x128xf32, #tpu.memory_space<vmem>>, vector<1x1x128xf32>
    %32 = vector.shape_cast %31 : vector<1x1x128xf32> to vector<1x128xf32>
    %33 = vector.broadcast %32 : vector<1x128xf32> to vector<8x128xf32>
    %34 = arith.addf %30, %33 : vector<8x128xf32>
    %35 = math.tanh %34 : vector<8x128xf32>
    %36 = arith.addf %2, %35 : vector<8x128xf32>
    %c0_27 = arith.constant 0 : index
    %c1_28 = arith.constant 1 : index
    %37 = vector.load %arg0[%c0_27, %c1_28] : memref<8x8xf32, #tpu.memory_space<vmem>>, vector<8x1xf32>
    %38 = vector.broadcast %37 : vector<8x1xf32> to vector<8x128xf32>
    %39 = vector.broadcast %0 : vector<1x128xf32> to vector<8x128xf32>
    %40 = arith.mulf %38, %39 : vector<8x128xf32>
    %41 = vector.broadcast %1 : vector<1x128xf32> to vector<8x128xf32>
    %42 = arith.addf %40, %41 : vector<8x128xf32>
    %c0_29 = arith.constant 0 : index
    %c0_30 = arith.constant 0 : index
    %c0_31 = arith.constant 0 : index
    %43 = vector.load %arg5[%c0_29, %c0_30, %c0_31] : memref<2x128x128xf32, #tpu.memory_space<vmem>>, vector<1x128x128xf32>
    %44 = vector.shape_cast %43 : vector<1x128x128xf32> to vector<128x128xf32>
    %cst_32 = arith.constant dense<0.000000e+00> : vector<8x128xf32>
    %45 = tpu.matmul %19, %44, %cst_32 {dimension_numbers = #tpu.dot_dimension_numbers<[1], [0], [0], [1], [0, 0, 1, 1], [], []>} : vector<8x128xf32>, vector<128x128xf32>, vector<8x128xf32> -> vector<8x128xf32>
    %46 = arith.addf %42, %45 : vector<8x128xf32>
    %c0_33 = arith.constant 0 : index
    %c0_34 = arith.constant 0 : index
    %c0_35 = arith.constant 0 : index
    %47 = vector.load %arg7[%c0_33, %c0_34, %c0_35] : memref<2x1x128xf32, #tpu.memory_space<vmem>>, vector<1x1x128xf32>
    %48 = vector.shape_cast %47 : vector<1x1x128xf32> to vector<1x128xf32>
    %49 = vector.broadcast %48 : vector<1x128xf32> to vector<8x128xf32>
    %50 = arith.addf %46, %49 : vector<8x128xf32>
    %51 = math.tanh %50 : vector<8x128xf32>
    %c1_36 = arith.constant 1 : index
    %c0_37 = arith.constant 0 : index
    %c0_38 = arith.constant 0 : index
    %52 = vector.load %arg4[%c1_36, %c0_37, %c0_38] : memref<2x128x128xf32, #tpu.memory_space<vmem>>, vector<1x128x128xf32>
    %53 = vector.shape_cast %52 : vector<1x128x128xf32> to vector<128x128xf32>
    %cst_39 = arith.constant dense<0.000000e+00> : vector<8x128xf32>
    %54 = tpu.matmul %51, %53, %cst_39 {dimension_numbers = #tpu.dot_dimension_numbers<[1], [0], [0], [1], [0, 0, 1, 1], [], []>} : vector<8x128xf32>, vector<128x128xf32>, vector<8x128xf32> -> vector<8x128xf32>
    %c1_40 = arith.constant 1 : index
    %c0_41 = arith.constant 0 : index
    %c0_42 = arith.constant 0 : index
    %55 = vector.load %arg6[%c1_40, %c0_41, %c0_42] : memref<2x1x128xf32, #tpu.memory_space<vmem>>, vector<1x1x128xf32>
    %56 = vector.shape_cast %55 : vector<1x1x128xf32> to vector<1x128xf32>
    %57 = vector.broadcast %56 : vector<1x128xf32> to vector<8x128xf32>
    %58 = arith.addf %54, %57 : vector<8x128xf32>
    %c1_43 = arith.constant 1 : index
    %c0_44 = arith.constant 0 : index
    %c0_45 = arith.constant 0 : index
    %59 = vector.load %arg5[%c1_43, %c0_44, %c0_45] : memref<2x128x128xf32, #tpu.memory_space<vmem>>, vector<1x128x128xf32>
    %60 = vector.shape_cast %59 : vector<1x128x128xf32> to vector<128x128xf32>
    %cst_46 = arith.constant dense<0.000000e+00> : vector<8x128xf32>
    %61 = tpu.matmul %35, %60, %cst_46 {dimension_numbers = #tpu.dot_dimension_numbers<[1], [0], [0], [1], [0, 0, 1, 1], [], []>} : vector<8x128xf32>, vector<128x128xf32>, vector<8x128xf32> -> vector<8x128xf32>
    %62 = arith.addf %58, %61 : vector<8x128xf32>
    %c1_47 = arith.constant 1 : index
    %c0_48 = arith.constant 0 : index
    %c0_49 = arith.constant 0 : index
    %63 = vector.load %arg7[%c1_47, %c0_48, %c0_49] : memref<2x1x128xf32, #tpu.memory_space<vmem>>, vector<1x1x128xf32>
    %64 = vector.shape_cast %63 : vector<1x1x128xf32> to vector<1x128xf32>
    %65 = vector.broadcast %64 : vector<1x128xf32> to vector<8x128xf32>
    %66 = arith.addf %62, %65 : vector<8x128xf32>
    %67 = math.tanh %66 : vector<8x128xf32>
    %68 = arith.addf %36, %67 : vector<8x128xf32>
    %c0_50 = arith.constant 0 : index
    %c2 = arith.constant 2 : index
    %69 = vector.load %arg0[%c0_50, %c2] : memref<8x8xf32, #tpu.memory_space<vmem>>, vector<8x1xf32>
    %70 = vector.broadcast %69 : vector<8x1xf32> to vector<8x128xf32>
    %71 = vector.broadcast %0 : vector<1x128xf32> to vector<8x128xf32>
    %72 = arith.mulf %70, %71 : vector<8x128xf32>
    %73 = vector.broadcast %1 : vector<1x128xf32> to vector<8x128xf32>
    %74 = arith.addf %72, %73 : vector<8x128xf32>
    %c0_51 = arith.constant 0 : index
    %c0_52 = arith.constant 0 : index
    %c0_53 = arith.constant 0 : index
    %75 = vector.load %arg5[%c0_51, %c0_52, %c0_53] : memref<2x128x128xf32, #tpu.memory_space<vmem>>, vector<1x128x128xf32>
    %76 = vector.shape_cast %75 : vector<1x128x128xf32> to vector<128x128xf32>
    %cst_54 = arith.constant dense<0.000000e+00> : vector<8x128xf32>
    %77 = tpu.matmul %51, %76, %cst_54 {dimension_numbers = #tpu.dot_dimension_numbers<[1], [0], [0], [1], [0, 0, 1, 1], [], []>} : vector<8x128xf32>, vector<128x128xf32>, vector<8x128xf32> -> vector<8x128xf32>
    %78 = arith.addf %74, %77 : vector<8x128xf32>
    %c0_55 = arith.constant 0 : index
    %c0_56 = arith.constant 0 : index
    %c0_57 = arith.constant 0 : index
    %79 = vector.load %arg7[%c0_55, %c0_56, %c0_57] : memref<2x1x128xf32, #tpu.memory_space<vmem>>, vector<1x1x128xf32>
    %80 = vector.shape_cast %79 : vector<1x1x128xf32> to vector<1x128xf32>
    %81 = vector.broadcast %80 : vector<1x128xf32> to vector<8x128xf32>
    %82 = arith.addf %78, %81 : vector<8x128xf32>
    %83 = math.tanh %82 : vector<8x128xf32>
    %c1_58 = arith.constant 1 : index
    %c0_59 = arith.constant 0 : index
    %c0_60 = arith.constant 0 : index
    %84 = vector.load %arg4[%c1_58, %c0_59, %c0_60] : memref<2x128x128xf32, #tpu.memory_space<vmem>>, vector<1x128x128xf32>
    %85 = vector.shape_cast %84 : vector<1x128x128xf32> to vector<128x128xf32>
    %cst_61 = arith.constant dense<0.000000e+00> : vector<8x128xf32>
    %86 = tpu.matmul %83, %85, %cst_61 {dimension_numbers = #tpu.dot_dimension_numbers<[1], [0], [0], [1], [0, 0, 1, 1], [], []>} : vector<8x128xf32>, vector<128x128xf32>, vector<8x128xf32> -> vector<8x128xf32>
    %c1_62 = arith.constant 1 : index
    %c0_63 = arith.constant 0 : index
    %c0_64 = arith.constant 0 : index
    %87 = vector.load %arg6[%c1_62, %c0_63, %c0_64] : memref<2x1x128xf32, #tpu.memory_space<vmem>>, vector<1x1x128xf32>
    %88 = vector.shape_cast %87 : vector<1x1x128xf32> to vector<1x128xf32>
    %89 = vector.broadcast %88 : vector<1x128xf32> to vector<8x128xf32>
    %90 = arith.addf %86, %89 : vector<8x128xf32>
    %c1_65 = arith.constant 1 : index
    %c0_66 = arith.constant 0 : index
    %c0_67 = arith.constant 0 : index
    %91 = vector.load %arg5[%c1_65, %c0_66, %c0_67] : memref<2x128x128xf32, #tpu.memory_space<vmem>>, vector<1x128x128xf32>
    %92 = vector.shape_cast %91 : vector<1x128x128xf32> to vector<128x128xf32>
    %cst_68 = arith.constant dense<0.000000e+00> : vector<8x128xf32>
    %93 = tpu.matmul %67, %92, %cst_68 {dimension_numbers = #tpu.dot_dimension_numbers<[1], [0], [0], [1], [0, 0, 1, 1], [], []>} : vector<8x128xf32>, vector<128x128xf32>, vector<8x128xf32> -> vector<8x128xf32>
    %94 = arith.addf %90, %93 : vector<8x128xf32>
    %c1_69 = arith.constant 1 : index
    %c0_70 = arith.constant 0 : index
    %c0_71 = arith.constant 0 : index
    %95 = vector.load %arg7[%c1_69, %c0_70, %c0_71] : memref<2x1x128xf32, #tpu.memory_space<vmem>>, vector<1x1x128xf32>
    %96 = vector.shape_cast %95 : vector<1x1x128xf32> to vector<1x128xf32>
    %97 = vector.broadcast %96 : vector<1x128xf32> to vector<8x128xf32>
    %98 = arith.addf %94, %97 : vector<8x128xf32>
    %99 = math.tanh %98 : vector<8x128xf32>
    %100 = arith.addf %68, %99 : vector<8x128xf32>
    %c0_72 = arith.constant 0 : index
    %c3 = arith.constant 3 : index
    %101 = vector.load %arg0[%c0_72, %c3] : memref<8x8xf32, #tpu.memory_space<vmem>>, vector<8x1xf32>
    %102 = vector.broadcast %101 : vector<8x1xf32> to vector<8x128xf32>
    %103 = vector.broadcast %0 : vector<1x128xf32> to vector<8x128xf32>
    %104 = arith.mulf %102, %103 : vector<8x128xf32>
    %105 = vector.broadcast %1 : vector<1x128xf32> to vector<8x128xf32>
    %106 = arith.addf %104, %105 : vector<8x128xf32>
    %c0_73 = arith.constant 0 : index
    %c0_74 = arith.constant 0 : index
    %c0_75 = arith.constant 0 : index
    %107 = vector.load %arg5[%c0_73, %c0_74, %c0_75] : memref<2x128x128xf32, #tpu.memory_space<vmem>>, vector<1x128x128xf32>
    %108 = vector.shape_cast %107 : vector<1x128x128xf32> to vector<128x128xf32>
    %cst_76 = arith.constant dense<0.000000e+00> : vector<8x128xf32>
    %109 = tpu.matmul %83, %108, %cst_76 {dimension_numbers = #tpu.dot_dimension_numbers<[1], [0], [0], [1], [0, 0, 1, 1], [], []>} : vector<8x128xf32>, vector<128x128xf32>, vector<8x128xf32> -> vector<8x128xf32>
    %110 = arith.addf %106, %109 : vector<8x128xf32>
    %c0_77 = arith.constant 0 : index
    %c0_78 = arith.constant 0 : index
    %c0_79 = arith.constant 0 : index
    %111 = vector.load %arg7[%c0_77, %c0_78, %c0_79] : memref<2x1x128xf32, #tpu.memory_space<vmem>>, vector<1x1x128xf32>
    %112 = vector.shape_cast %111 : vector<1x1x128xf32> to vector<1x128xf32>
    %113 = vector.broadcast %112 : vector<1x128xf32> to vector<8x128xf32>
    %114 = arith.addf %110, %113 : vector<8x128xf32>
    %115 = math.tanh %114 : vector<8x128xf32>
    %c1_80 = arith.constant 1 : index
    %c0_81 = arith.constant 0 : index
    %c0_82 = arith.constant 0 : index
    %116 = vector.load %arg4[%c1_80, %c0_81, %c0_82] : memref<2x128x128xf32, #tpu.memory_space<vmem>>, vector<1x128x128xf32>
    %117 = vector.shape_cast %116 : vector<1x128x128xf32> to vector<128x128xf32>
    %cst_83 = arith.constant dense<0.000000e+00> : vector<8x128xf32>
    %118 = tpu.matmul %115, %117, %cst_83 {dimension_numbers = #tpu.dot_dimension_numbers<[1], [0], [0], [1], [0, 0, 1, 1], [], []>} : vector<8x128xf32>, vector<128x128xf32>, vector<8x128xf32> -> vector<8x128xf32>
    %c1_84 = arith.constant 1 : index
    %c0_85 = arith.constant 0 : index
    %c0_86 = arith.constant 0 : index
    %119 = vector.load %arg6[%c1_84, %c0_85, %c0_86] : memref<2x1x128xf32, #tpu.memory_space<vmem>>, vector<1x1x128xf32>
    %120 = vector.shape_cast %119 : vector<1x1x128xf32> to vector<1x128xf32>
    %121 = vector.broadcast %120 : vector<1x128xf32> to vector<8x128xf32>
    %122 = arith.addf %118, %121 : vector<8x128xf32>
    %c1_87 = arith.constant 1 : index
    %c0_88 = arith.constant 0 : index
    %c0_89 = arith.constant 0 : index
    %123 = vector.load %arg5[%c1_87, %c0_88, %c0_89] : memref<2x128x128xf32, #tpu.memory_space<vmem>>, vector<1x128x128xf32>
    %124 = vector.shape_cast %123 : vector<1x128x128xf32> to vector<128x128xf32>
    %cst_90 = arith.constant dense<0.000000e+00> : vector<8x128xf32>
    %125 = tpu.matmul %99, %124, %cst_90 {dimension_numbers = #tpu.dot_dimension_numbers<[1], [0], [0], [1], [0, 0, 1, 1], [], []>} : vector<8x128xf32>, vector<128x128xf32>, vector<8x128xf32> -> vector<8x128xf32>
    %126 = arith.addf %122, %125 : vector<8x128xf32>
    %c1_91 = arith.constant 1 : index
    %c0_92 = arith.constant 0 : index
    %c0_93 = arith.constant 0 : index
    %127 = vector.load %arg7[%c1_91, %c0_92, %c0_93] : memref<2x1x128xf32, #tpu.memory_space<vmem>>, vector<1x1x128xf32>
    %128 = vector.shape_cast %127 : vector<1x1x128xf32> to vector<1x128xf32>
    %129 = vector.broadcast %128 : vector<1x128xf32> to vector<8x128xf32>
    %130 = arith.addf %126, %129 : vector<8x128xf32>
    %131 = math.tanh %130 : vector<8x128xf32>
    %132 = arith.addf %100, %131 : vector<8x128xf32>
    %c0_94 = arith.constant 0 : index
    %c4 = arith.constant 4 : index
    %133 = vector.load %arg0[%c0_94, %c4] : memref<8x8xf32, #tpu.memory_space<vmem>>, vector<8x1xf32>
    %134 = vector.broadcast %133 : vector<8x1xf32> to vector<8x128xf32>
    %135 = vector.broadcast %0 : vector<1x128xf32> to vector<8x128xf32>
    %136 = arith.mulf %134, %135 : vector<8x128xf32>
    %137 = vector.broadcast %1 : vector<1x128xf32> to vector<8x128xf32>
    %138 = arith.addf %136, %137 : vector<8x128xf32>
    %c0_95 = arith.constant 0 : index
    %c0_96 = arith.constant 0 : index
    %c0_97 = arith.constant 0 : index
    %139 = vector.load %arg5[%c0_95, %c0_96, %c0_97] : memref<2x128x128xf32, #tpu.memory_space<vmem>>, vector<1x128x128xf32>
    %140 = vector.shape_cast %139 : vector<1x128x128xf32> to vector<128x128xf32>
    %cst_98 = arith.constant dense<0.000000e+00> : vector<8x128xf32>
    %141 = tpu.matmul %115, %140, %cst_98 {dimension_numbers = #tpu.dot_dimension_numbers<[1], [0], [0], [1], [0, 0, 1, 1], [], []>} : vector<8x128xf32>, vector<128x128xf32>, vector<8x128xf32> -> vector<8x128xf32>
    %142 = arith.addf %138, %141 : vector<8x128xf32>
    %c0_99 = arith.constant 0 : index
    %c0_100 = arith.constant 0 : index
    %c0_101 = arith.constant 0 : index
    %143 = vector.load %arg7[%c0_99, %c0_100, %c0_101] : memref<2x1x128xf32, #tpu.memory_space<vmem>>, vector<1x1x128xf32>
    %144 = vector.shape_cast %143 : vector<1x1x128xf32> to vector<1x128xf32>
    %145 = vector.broadcast %144 : vector<1x128xf32> to vector<8x128xf32>
    %146 = arith.addf %142, %145 : vector<8x128xf32>
    %147 = math.tanh %146 : vector<8x128xf32>
    %c1_102 = arith.constant 1 : index
    %c0_103 = arith.constant 0 : index
    %c0_104 = arith.constant 0 : index
    %148 = vector.load %arg4[%c1_102, %c0_103, %c0_104] : memref<2x128x128xf32, #tpu.memory_space<vmem>>, vector<1x128x128xf32>
    %149 = vector.shape_cast %148 : vector<1x128x128xf32> to vector<128x128xf32>
    %cst_105 = arith.constant dense<0.000000e+00> : vector<8x128xf32>
    %150 = tpu.matmul %147, %149, %cst_105 {dimension_numbers = #tpu.dot_dimension_numbers<[1], [0], [0], [1], [0, 0, 1, 1], [], []>} : vector<8x128xf32>, vector<128x128xf32>, vector<8x128xf32> -> vector<8x128xf32>
    %c1_106 = arith.constant 1 : index
    %c0_107 = arith.constant 0 : index
    %c0_108 = arith.constant 0 : index
    %151 = vector.load %arg6[%c1_106, %c0_107, %c0_108] : memref<2x1x128xf32, #tpu.memory_space<vmem>>, vector<1x1x128xf32>
    %152 = vector.shape_cast %151 : vector<1x1x128xf32> to vector<1x128xf32>
    %153 = vector.broadcast %152 : vector<1x128xf32> to vector<8x128xf32>
    %154 = arith.addf %150, %153 : vector<8x128xf32>
    %c1_109 = arith.constant 1 : index
    %c0_110 = arith.constant 0 : index
    %c0_111 = arith.constant 0 : index
    %155 = vector.load %arg5[%c1_109, %c0_110, %c0_111] : memref<2x128x128xf32, #tpu.memory_space<vmem>>, vector<1x128x128xf32>
    %156 = vector.shape_cast %155 : vector<1x128x128xf32> to vector<128x128xf32>
    %cst_112 = arith.constant dense<0.000000e+00> : vector<8x128xf32>
    %157 = tpu.matmul %131, %156, %cst_112 {dimension_numbers = #tpu.dot_dimension_numbers<[1], [0], [0], [1], [0, 0, 1, 1], [], []>} : vector<8x128xf32>, vector<128x128xf32>, vector<8x128xf32> -> vector<8x128xf32>
    %158 = arith.addf %154, %157 : vector<8x128xf32>
    %c1_113 = arith.constant 1 : index
    %c0_114 = arith.constant 0 : index
    %c0_115 = arith.constant 0 : index
    %159 = vector.load %arg7[%c1_113, %c0_114, %c0_115] : memref<2x1x128xf32, #tpu.memory_space<vmem>>, vector<1x1x128xf32>
    %160 = vector.shape_cast %159 : vector<1x1x128xf32> to vector<1x128xf32>
    %161 = vector.broadcast %160 : vector<1x128xf32> to vector<8x128xf32>
    %162 = arith.addf %158, %161 : vector<8x128xf32>
    %163 = math.tanh %162 : vector<8x128xf32>
    %164 = arith.addf %132, %163 : vector<8x128xf32>
    %c0_116 = arith.constant 0 : index
    %c5 = arith.constant 5 : index
    %165 = vector.load %arg0[%c0_116, %c5] : memref<8x8xf32, #tpu.memory_space<vmem>>, vector<8x1xf32>
    %166 = vector.broadcast %165 : vector<8x1xf32> to vector<8x128xf32>
    %167 = vector.broadcast %0 : vector<1x128xf32> to vector<8x128xf32>
    %168 = arith.mulf %166, %167 : vector<8x128xf32>
    %169 = vector.broadcast %1 : vector<1x128xf32> to vector<8x128xf32>
    %170 = arith.addf %168, %169 : vector<8x128xf32>
    %c0_117 = arith.constant 0 : index
    %c0_118 = arith.constant 0 : index
    %c0_119 = arith.constant 0 : index
    %171 = vector.load %arg5[%c0_117, %c0_118, %c0_119] : memref<2x128x128xf32, #tpu.memory_space<vmem>>, vector<1x128x128xf32>
    %172 = vector.shape_cast %171 : vector<1x128x128xf32> to vector<128x128xf32>
    %cst_120 = arith.constant dense<0.000000e+00> : vector<8x128xf32>
    %173 = tpu.matmul %147, %172, %cst_120 {dimension_numbers = #tpu.dot_dimension_numbers<[1], [0], [0], [1], [0, 0, 1, 1], [], []>} : vector<8x128xf32>, vector<128x128xf32>, vector<8x128xf32> -> vector<8x128xf32>
    %174 = arith.addf %170, %173 : vector<8x128xf32>
    %c0_121 = arith.constant 0 : index
    %c0_122 = arith.constant 0 : index
    %c0_123 = arith.constant 0 : index
    %175 = vector.load %arg7[%c0_121, %c0_122, %c0_123] : memref<2x1x128xf32, #tpu.memory_space<vmem>>, vector<1x1x128xf32>
    %176 = vector.shape_cast %175 : vector<1x1x128xf32> to vector<1x128xf32>
    %177 = vector.broadcast %176 : vector<1x128xf32> to vector<8x128xf32>
    %178 = arith.addf %174, %177 : vector<8x128xf32>
    %179 = math.tanh %178 : vector<8x128xf32>
    %c1_124 = arith.constant 1 : index
    %c0_125 = arith.constant 0 : index
    %c0_126 = arith.constant 0 : index
    %180 = vector.load %arg4[%c1_124, %c0_125, %c0_126] : memref<2x128x128xf32, #tpu.memory_space<vmem>>, vector<1x128x128xf32>
    %181 = vector.shape_cast %180 : vector<1x128x128xf32> to vector<128x128xf32>
    %cst_127 = arith.constant dense<0.000000e+00> : vector<8x128xf32>
    %182 = tpu.matmul %179, %181, %cst_127 {dimension_numbers = #tpu.dot_dimension_numbers<[1], [0], [0], [1], [0, 0, 1, 1], [], []>} : vector<8x128xf32>, vector<128x128xf32>, vector<8x128xf32> -> vector<8x128xf32>
    %c1_128 = arith.constant 1 : index
    %c0_129 = arith.constant 0 : index
    %c0_130 = arith.constant 0 : index
    %183 = vector.load %arg6[%c1_128, %c0_129, %c0_130] : memref<2x1x128xf32, #tpu.memory_space<vmem>>, vector<1x1x128xf32>
    %184 = vector.shape_cast %183 : vector<1x1x128xf32> to vector<1x128xf32>
    %185 = vector.broadcast %184 : vector<1x128xf32> to vector<8x128xf32>
    %186 = arith.addf %182, %185 : vector<8x128xf32>
    %c1_131 = arith.constant 1 : index
    %c0_132 = arith.constant 0 : index
    %c0_133 = arith.constant 0 : index
    %187 = vector.load %arg5[%c1_131, %c0_132, %c0_133] : memref<2x128x128xf32, #tpu.memory_space<vmem>>, vector<1x128x128xf32>
    %188 = vector.shape_cast %187 : vector<1x128x128xf32> to vector<128x128xf32>
    %cst_134 = arith.constant dense<0.000000e+00> : vector<8x128xf32>
    %189 = tpu.matmul %163, %188, %cst_134 {dimension_numbers = #tpu.dot_dimension_numbers<[1], [0], [0], [1], [0, 0, 1, 1], [], []>} : vector<8x128xf32>, vector<128x128xf32>, vector<8x128xf32> -> vector<8x128xf32>
    %190 = arith.addf %186, %189 : vector<8x128xf32>
    %c1_135 = arith.constant 1 : index
    %c0_136 = arith.constant 0 : index
    %c0_137 = arith.constant 0 : index
    %191 = vector.load %arg7[%c1_135, %c0_136, %c0_137] : memref<2x1x128xf32, #tpu.memory_space<vmem>>, vector<1x1x128xf32>
    %192 = vector.shape_cast %191 : vector<1x1x128xf32> to vector<1x128xf32>
    %193 = vector.broadcast %192 : vector<1x128xf32> to vector<8x128xf32>
    %194 = arith.addf %190, %193 : vector<8x128xf32>
    %195 = math.tanh %194 : vector<8x128xf32>
    %196 = arith.addf %164, %195 : vector<8x128xf32>
    %c0_138 = arith.constant 0 : index
    %c6 = arith.constant 6 : index
    %197 = vector.load %arg0[%c0_138, %c6] : memref<8x8xf32, #tpu.memory_space<vmem>>, vector<8x1xf32>
    %198 = vector.broadcast %197 : vector<8x1xf32> to vector<8x128xf32>
    %199 = vector.broadcast %0 : vector<1x128xf32> to vector<8x128xf32>
    %200 = arith.mulf %198, %199 : vector<8x128xf32>
    %201 = vector.broadcast %1 : vector<1x128xf32> to vector<8x128xf32>
    %202 = arith.addf %200, %201 : vector<8x128xf32>
    %c0_139 = arith.constant 0 : index
    %c0_140 = arith.constant 0 : index
    %c0_141 = arith.constant 0 : index
    %203 = vector.load %arg5[%c0_139, %c0_140, %c0_141] : memref<2x128x128xf32, #tpu.memory_space<vmem>>, vector<1x128x128xf32>
    %204 = vector.shape_cast %203 : vector<1x128x128xf32> to vector<128x128xf32>
    %cst_142 = arith.constant dense<0.000000e+00> : vector<8x128xf32>
    %205 = tpu.matmul %179, %204, %cst_142 {dimension_numbers = #tpu.dot_dimension_numbers<[1], [0], [0], [1], [0, 0, 1, 1], [], []>} : vector<8x128xf32>, vector<128x128xf32>, vector<8x128xf32> -> vector<8x128xf32>
    %206 = arith.addf %202, %205 : vector<8x128xf32>
    %c0_143 = arith.constant 0 : index
    %c0_144 = arith.constant 0 : index
    %c0_145 = arith.constant 0 : index
    %207 = vector.load %arg7[%c0_143, %c0_144, %c0_145] : memref<2x1x128xf32, #tpu.memory_space<vmem>>, vector<1x1x128xf32>
    %208 = vector.shape_cast %207 : vector<1x1x128xf32> to vector<1x128xf32>
    %209 = vector.broadcast %208 : vector<1x128xf32> to vector<8x128xf32>
    %210 = arith.addf %206, %209 : vector<8x128xf32>
    %211 = math.tanh %210 : vector<8x128xf32>
    %c1_146 = arith.constant 1 : index
    %c0_147 = arith.constant 0 : index
    %c0_148 = arith.constant 0 : index
    %212 = vector.load %arg4[%c1_146, %c0_147, %c0_148] : memref<2x128x128xf32, #tpu.memory_space<vmem>>, vector<1x128x128xf32>
    %213 = vector.shape_cast %212 : vector<1x128x128xf32> to vector<128x128xf32>
    %cst_149 = arith.constant dense<0.000000e+00> : vector<8x128xf32>
    %214 = tpu.matmul %211, %213, %cst_149 {dimension_numbers = #tpu.dot_dimension_numbers<[1], [0], [0], [1], [0, 0, 1, 1], [], []>} : vector<8x128xf32>, vector<128x128xf32>, vector<8x128xf32> -> vector<8x128xf32>
    %c1_150 = arith.constant 1 : index
    %c0_151 = arith.constant 0 : index
    %c0_152 = arith.constant 0 : index
    %215 = vector.load %arg6[%c1_150, %c0_151, %c0_152] : memref<2x1x128xf32, #tpu.memory_space<vmem>>, vector<1x1x128xf32>
    %216 = vector.shape_cast %215 : vector<1x1x128xf32> to vector<1x128xf32>
    %217 = vector.broadcast %216 : vector<1x128xf32> to vector<8x128xf32>
    %218 = arith.addf %214, %217 : vector<8x128xf32>
    %c1_153 = arith.constant 1 : index
    %c0_154 = arith.constant 0 : index
    %c0_155 = arith.constant 0 : index
    %219 = vector.load %arg5[%c1_153, %c0_154, %c0_155] : memref<2x128x128xf32, #tpu.memory_space<vmem>>, vector<1x128x128xf32>
    %220 = vector.shape_cast %219 : vector<1x128x128xf32> to vector<128x128xf32>
    %cst_156 = arith.constant dense<0.000000e+00> : vector<8x128xf32>
    %221 = tpu.matmul %195, %220, %cst_156 {dimension_numbers = #tpu.dot_dimension_numbers<[1], [0], [0], [1], [0, 0, 1, 1], [], []>} : vector<8x128xf32>, vector<128x128xf32>, vector<8x128xf32> -> vector<8x128xf32>
    %222 = arith.addf %218, %221 : vector<8x128xf32>
    %c1_157 = arith.constant 1 : index
    %c0_158 = arith.constant 0 : index
    %c0_159 = arith.constant 0 : index
    %223 = vector.load %arg7[%c1_157, %c0_158, %c0_159] : memref<2x1x128xf32, #tpu.memory_space<vmem>>, vector<1x1x128xf32>
    %224 = vector.shape_cast %223 : vector<1x1x128xf32> to vector<1x128xf32>
    %225 = vector.broadcast %224 : vector<1x128xf32> to vector<8x128xf32>
    %226 = arith.addf %222, %225 : vector<8x128xf32>
    %227 = math.tanh %226 : vector<8x128xf32>
    %228 = arith.addf %196, %227 : vector<8x128xf32>
    %c0_160 = arith.constant 0 : index
    %c7 = arith.constant 7 : index
    %229 = vector.load %arg0[%c0_160, %c7] : memref<8x8xf32, #tpu.memory_space<vmem>>, vector<8x1xf32>
    %230 = vector.broadcast %229 : vector<8x1xf32> to vector<8x128xf32>
    %231 = vector.broadcast %0 : vector<1x128xf32> to vector<8x128xf32>
    %232 = arith.mulf %230, %231 : vector<8x128xf32>
    %233 = vector.broadcast %1 : vector<1x128xf32> to vector<8x128xf32>
    %234 = arith.addf %232, %233 : vector<8x128xf32>
    %c0_161 = arith.constant 0 : index
    %c0_162 = arith.constant 0 : index
    %c0_163 = arith.constant 0 : index
    %235 = vector.load %arg5[%c0_161, %c0_162, %c0_163] : memref<2x128x128xf32, #tpu.memory_space<vmem>>, vector<1x128x128xf32>
    %236 = vector.shape_cast %235 : vector<1x128x128xf32> to vector<128x128xf32>
    %cst_164 = arith.constant dense<0.000000e+00> : vector<8x128xf32>
    %237 = tpu.matmul %211, %236, %cst_164 {dimension_numbers = #tpu.dot_dimension_numbers<[1], [0], [0], [1], [0, 0, 1, 1], [], []>} : vector<8x128xf32>, vector<128x128xf32>, vector<8x128xf32> -> vector<8x128xf32>
    %238 = arith.addf %234, %237 : vector<8x128xf32>
    %c0_165 = arith.constant 0 : index
    %c0_166 = arith.constant 0 : index
    %c0_167 = arith.constant 0 : index
    %239 = vector.load %arg7[%c0_165, %c0_166, %c0_167] : memref<2x1x128xf32, #tpu.memory_space<vmem>>, vector<1x1x128xf32>
    %240 = vector.shape_cast %239 : vector<1x1x128xf32> to vector<1x128xf32>
    %241 = vector.broadcast %240 : vector<1x128xf32> to vector<8x128xf32>
    %242 = arith.addf %238, %241 : vector<8x128xf32>
    %243 = math.tanh %242 : vector<8x128xf32>
    %c1_168 = arith.constant 1 : index
    %c0_169 = arith.constant 0 : index
    %c0_170 = arith.constant 0 : index
    %244 = vector.load %arg4[%c1_168, %c0_169, %c0_170] : memref<2x128x128xf32, #tpu.memory_space<vmem>>, vector<1x128x128xf32>
    %245 = vector.shape_cast %244 : vector<1x128x128xf32> to vector<128x128xf32>
    %cst_171 = arith.constant dense<0.000000e+00> : vector<8x128xf32>
    %246 = tpu.matmul %243, %245, %cst_171 {dimension_numbers = #tpu.dot_dimension_numbers<[1], [0], [0], [1], [0, 0, 1, 1], [], []>} : vector<8x128xf32>, vector<128x128xf32>, vector<8x128xf32> -> vector<8x128xf32>
    %c1_172 = arith.constant 1 : index
    %c0_173 = arith.constant 0 : index
    %c0_174 = arith.constant 0 : index
    %247 = vector.load %arg6[%c1_172, %c0_173, %c0_174] : memref<2x1x128xf32, #tpu.memory_space<vmem>>, vector<1x1x128xf32>
    %248 = vector.shape_cast %247 : vector<1x1x128xf32> to vector<1x128xf32>
    %249 = vector.broadcast %248 : vector<1x128xf32> to vector<8x128xf32>
    %250 = arith.addf %246, %249 : vector<8x128xf32>
    %c1_175 = arith.constant 1 : index
    %c0_176 = arith.constant 0 : index
    %c0_177 = arith.constant 0 : index
    %251 = vector.load %arg5[%c1_175, %c0_176, %c0_177] : memref<2x128x128xf32, #tpu.memory_space<vmem>>, vector<1x128x128xf32>
    %252 = vector.shape_cast %251 : vector<1x128x128xf32> to vector<128x128xf32>
    %cst_178 = arith.constant dense<0.000000e+00> : vector<8x128xf32>
    %253 = tpu.matmul %227, %252, %cst_178 {dimension_numbers = #tpu.dot_dimension_numbers<[1], [0], [0], [1], [0, 0, 1, 1], [], []>} : vector<8x128xf32>, vector<128x128xf32>, vector<8x128xf32> -> vector<8x128xf32>
    %254 = arith.addf %250, %253 : vector<8x128xf32>
    %c1_179 = arith.constant 1 : index
    %c0_180 = arith.constant 0 : index
    %c0_181 = arith.constant 0 : index
    %255 = vector.load %arg7[%c1_179, %c0_180, %c0_181] : memref<2x1x128xf32, #tpu.memory_space<vmem>>, vector<1x1x128xf32>
    %256 = vector.shape_cast %255 : vector<1x1x128xf32> to vector<1x128xf32>
    %257 = vector.broadcast %256 : vector<1x128xf32> to vector<8x128xf32>
    %258 = arith.addf %254, %257 : vector<8x128xf32>
    %259 = math.tanh %258 : vector<8x128xf32>
    %260 = arith.addf %228, %259 : vector<8x128xf32>
    %cst_182 = arith.constant 1.250000e-01 : f32
    %261 = vector.broadcast %cst_182 : f32 to vector<8x128xf32>
    %262 = arith.mulf %260, %261 : vector<8x128xf32>
    %c0_183 = arith.constant 0 : index
    %c0_184 = arith.constant 0 : index
    %263 = vector.load %arg16[%c0_183, %c0_184] : memref<128x128xf32, #tpu.memory_space<vmem>>, vector<128x128xf32>
    %cst_185 = arith.constant dense<0.000000e+00> : vector<8x128xf32>
    %264 = tpu.matmul %262, %263, %cst_185 {dimension_numbers = #tpu.dot_dimension_numbers<[1], [0], [0], [1], [0, 0, 1, 1], [], []>} : vector<8x128xf32>, vector<128x128xf32>, vector<8x128xf32> -> vector<8x128xf32>
    %c0_186 = arith.constant 0 : index
    %c0_187 = arith.constant 0 : index
    %265 = vector.load %arg17[%c0_186, %c0_187] : memref<1x128xf32, #tpu.memory_space<vmem>>, vector<1x128xf32>
    %266 = vector.broadcast %265 : vector<1x128xf32> to vector<8x128xf32>
    %267 = arith.addf %264, %266 : vector<8x128xf32>
    %cst_188 = arith.constant 0.000000e+00 : f32
    %268 = vector.broadcast %cst_188 : f32 to vector<8x128xf32>
    %269 = arith.cmpf oge, %267, %268 : vector<8x128xf32>
    %cst_189 = arith.constant 0.00999999977 : f32
    %270 = vector.broadcast %cst_189 : f32 to vector<8x128xf32>
    %271 = arith.mulf %270, %267 : vector<8x128xf32>
    %272 = arith.select %269, %267, %271 : vector<8x128xi1>, vector<8x128xf32>
    %c0_190 = arith.constant 0 : index
    %c0_191 = arith.constant 0 : index
    %273 = vector.load %arg18[%c0_190, %c0_191] : memref<1x128xf32, #tpu.memory_space<vmem>>, vector<1x128xf32>
    %274 = vector.broadcast %273 : vector<1x128xf32> to vector<8x128xf32>
    %275 = arith.mulf %272, %274 : vector<8x128xf32>
    %cst_192 = arith.constant dense<0.000000e+00> : vector<8xf32>
    %276 = vector.multi_reduction <add>, %275, %cst_192 [1] : vector<8x128xf32> to vector<8xf32>
    %277 = vector.shape_cast %276 : vector<8xf32> to vector<8x1xf32>
    %c0_193 = arith.constant 0 : index
    %c0_194 = arith.constant 0 : index
    %278 = vector.load %arg19[%c0_193, %c0_194] : memref<1x1xf32, #tpu.memory_space<vmem>>, vector<1x1xf32>
    %279 = vector.broadcast %278 : vector<1x1xf32> to vector<8x1xf32>
    %280 = arith.addf %277, %279 : vector<8x1xf32>
    %c0_195 = arith.constant 0 : index
    %c0_196 = arith.constant 0 : index
    %281 = vector.load %arg21[%c0_195, %c0_196] : memref<8x1xf32, #tpu.memory_space<vmem>>, vector<8x1xf32>
    tpu.vector_store %arg21[%c0_195, %c0_196], %280 {strides = array<i32>} : memref<8x1xf32, #tpu.memory_space<vmem>>, vector<8x1xf32>,
    %c0_197 = arith.constant 0 : index
    %c0_198 = arith.constant 0 : index
    %282 = vector.load %arg8[%c0_197, %c0_198] : memref<1x128xf32, #tpu.memory_space<vmem>>, vector<1x128xf32>
    %c0_199 = arith.constant 0 : index
    %c0_200 = arith.constant 0 : index
    %283 = vector.load %arg9[%c0_199, %c0_200] : memref<1x128xf32, #tpu.memory_space<vmem>>, vector<1x128xf32>
    %c0_201 = arith.constant 0 : index
    %c0_202 = arith.constant 0 : index
    %284 = vector.load %arg14[%c0_201, %c0_202] : memref<1x128xf32, #tpu.memory_space<vmem>>, vector<1x128xf32>
    %c0_203 = arith.constant 0 : index
    %c0_204 = arith.constant 0 : index
    %285 = vector.load %arg15[%c0_203, %c0_204] : memref<1x1xf32, #tpu.memory_space<vmem>>, vector<1x1xf32>
    %c0_205 = arith.constant 0 : index
    %c0_206 = arith.constant 0 : index
    %286 = vector.load %arg1[%c0_205, %c0_206] : memref<8x11xf32, #tpu.memory_space<vmem>>, vector<8x1xf32>
    %287 = vector.broadcast %286 : vector<8x1xf32> to vector<8x128xf32>
    %288 = vector.broadcast %282 : vector<1x128xf32> to vector<8x128xf32>
    %289 = arith.mulf %287, %288 : vector<8x128xf32>
    %290 = vector.broadcast %283 : vector<1x128xf32> to vector<8x128xf32>
    %291 = arith.addf %289, %290 : vector<8x128xf32>
    %c0_207 = arith.constant 0 : index
    %c0_208 = arith.constant 0 : index
    %c0_209 = arith.constant 0 : index
    %292 = vector.load %arg11[%c0_207, %c0_208, %c0_209] : memref<2x128x128xf32, #tpu.memory_space<vmem>>, vector<1x128x128xf32>
    %293 = vector.shape_cast %292 : vector<1x128x128xf32> to vector<128x128xf32>
    %cst_210 = arith.constant dense<0.000000e+00> : vector<8x128xf32>
    %294 = tpu.matmul %243, %293, %cst_210 {dimension_numbers = #tpu.dot_dimension_numbers<[1], [0], [0], [1], [0, 0, 1, 1], [], []>} : vector<8x128xf32>, vector<128x128xf32>, vector<8x128xf32> -> vector<8x128xf32>
    %295 = arith.addf %291, %294 : vector<8x128xf32>
    %c0_211 = arith.constant 0 : index
    %c0_212 = arith.constant 0 : index
    %c0_213 = arith.constant 0 : index
    %296 = vector.load %arg13[%c0_211, %c0_212, %c0_213] : memref<2x1x128xf32, #tpu.memory_space<vmem>>, vector<1x1x128xf32>
    %297 = vector.shape_cast %296 : vector<1x1x128xf32> to vector<1x128xf32>
    %298 = vector.broadcast %297 : vector<1x128xf32> to vector<8x128xf32>
    %299 = arith.addf %295, %298 : vector<8x128xf32>
    %300 = math.tanh %299 : vector<8x128xf32>
    %c1_214 = arith.constant 1 : index
    %c0_215 = arith.constant 0 : index
    %c0_216 = arith.constant 0 : index
    %301 = vector.load %arg10[%c1_214, %c0_215, %c0_216] : memref<2x128x128xf32, #tpu.memory_space<vmem>>, vector<1x128x128xf32>
    %302 = vector.shape_cast %301 : vector<1x128x128xf32> to vector<128x128xf32>
    %cst_217 = arith.constant dense<0.000000e+00> : vector<8x128xf32>
    %303 = tpu.matmul %300, %302, %cst_217 {dimension_numbers = #tpu.dot_dimension_numbers<[1], [0], [0], [1], [0, 0, 1, 1], [], []>} : vector<8x128xf32>, vector<128x128xf32>, vector<8x128xf32> -> vector<8x128xf32>
    %c1_218 = arith.constant 1 : index
    %c0_219 = arith.constant 0 : index
    %c0_220 = arith.constant 0 : index
    %304 = vector.load %arg12[%c1_218, %c0_219, %c0_220] : memref<2x1x128xf32, #tpu.memory_space<vmem>>, vector<1x1x128xf32>
    %305 = vector.shape_cast %304 : vector<1x1x128xf32> to vector<1x128xf32>
    %306 = vector.broadcast %305 : vector<1x128xf32> to vector<8x128xf32>
    %307 = arith.addf %303, %306 : vector<8x128xf32>
    %c1_221 = arith.constant 1 : index
    %c0_222 = arith.constant 0 : index
    %c0_223 = arith.constant 0 : index
    %308 = vector.load %arg11[%c1_221, %c0_222, %c0_223] : memref<2x128x128xf32, #tpu.memory_space<vmem>>, vector<1x128x128xf32>
    %309 = vector.shape_cast %308 : vector<1x128x128xf32> to vector<128x128xf32>
    %cst_224 = arith.constant dense<0.000000e+00> : vector<8x128xf32>
    %310 = tpu.matmul %259, %309, %cst_224 {dimension_numbers = #tpu.dot_dimension_numbers<[1], [0], [0], [1], [0, 0, 1, 1], [], []>} : vector<8x128xf32>, vector<128x128xf32>, vector<8x128xf32> -> vector<8x128xf32>
    %311 = arith.addf %307, %310 : vector<8x128xf32>
    %c1_225 = arith.constant 1 : index
    %c0_226 = arith.constant 0 : index
    %c0_227 = arith.constant 0 : index
    %312 = vector.load %arg13[%c1_225, %c0_226, %c0_227] : memref<2x1x128xf32, #tpu.memory_space<vmem>>, vector<1x1x128xf32>
    %313 = vector.shape_cast %312 : vector<1x1x128xf32> to vector<1x128xf32>
    %314 = vector.broadcast %313 : vector<1x128xf32> to vector<8x128xf32>
    %315 = arith.addf %311, %314 : vector<8x128xf32>
    %316 = math.tanh %315 : vector<8x128xf32>
    %317 = vector.broadcast %284 : vector<1x128xf32> to vector<8x128xf32>
    %318 = arith.mulf %316, %317 : vector<8x128xf32>
    %cst_228 = arith.constant dense<0.000000e+00> : vector<8xf32>
    %319 = vector.multi_reduction <add>, %318, %cst_228 [1] : vector<8x128xf32> to vector<8xf32>
    %320 = vector.shape_cast %319 : vector<8xf32> to vector<8x1xf32>
    %321 = vector.broadcast %285 : vector<1x1xf32> to vector<8x1xf32>
    %322 = arith.addf %320, %321 : vector<8x1xf32>
    %cst_229 = arith.constant -1.000200e+04 : f32
    %323 = vector.broadcast %cst_229 : f32 to vector<8x1xf32>
    %324 = arith.cmpf oeq, %322, %323 : vector<8x1xf32>
    %c0_230 = arith.constant 0 : index
    %c1_231 = arith.constant 1 : index
    %325 = vector.load %arg20[%c0_230, %c1_231] : memref<8x12xf32, #tpu.memory_space<vmem>>, vector<8x1xf32>
    tpu.vector_store %arg20[%c0_230, %c1_231], %322 {strides = array<i32>} : memref<8x12xf32, #tpu.memory_space<vmem>>, vector<8x1xf32>,
    %c0_232 = arith.constant 0 : index
    %c1_233 = arith.constant 1 : index
    %326 = vector.load %arg1[%c0_232, %c1_233] : memref<8x11xf32, #tpu.memory_space<vmem>>, vector<8x1xf32>
    %327 = vector.broadcast %326 : vector<8x1xf32> to vector<8x128xf32>
    %328 = vector.broadcast %282 : vector<1x128xf32> to vector<8x128xf32>
    %329 = arith.mulf %327, %328 : vector<8x128xf32>
    %330 = vector.broadcast %283 : vector<1x128xf32> to vector<8x128xf32>
    %331 = arith.addf %329, %330 : vector<8x128xf32>
    %c0_234 = arith.constant 0 : index
    %c0_235 = arith.constant 0 : index
    %c0_236 = arith.constant 0 : index
    %332 = vector.load %arg11[%c0_234, %c0_235, %c0_236] : memref<2x128x128xf32, #tpu.memory_space<vmem>>, vector<1x128x128xf32>
    %333 = vector.shape_cast %332 : vector<1x128x128xf32> to vector<128x128xf32>
    %cst_237 = arith.constant dense<0.000000e+00> : vector<8x128xf32>
    %334 = tpu.matmul %300, %333, %cst_237 {dimension_numbers = #tpu.dot_dimension_numbers<[1], [0], [0], [1], [0, 0, 1, 1], [], []>} : vector<8x128xf32>, vector<128x128xf32>, vector<8x128xf32> -> vector<8x128xf32>
    %335 = arith.addf %331, %334 : vector<8x128xf32>
    %c0_238 = arith.constant 0 : index
    %c0_239 = arith.constant 0 : index
    %c0_240 = arith.constant 0 : index
    %336 = vector.load %arg13[%c0_238, %c0_239, %c0_240] : memref<2x1x128xf32, #tpu.memory_space<vmem>>, vector<1x1x128xf32>
    %337 = vector.shape_cast %336 : vector<1x1x128xf32> to vector<1x128xf32>
    %338 = vector.broadcast %337 : vector<1x128xf32> to vector<8x128xf32>
    %339 = arith.addf %335, %338 : vector<8x128xf32>
    %340 = math.tanh %339 : vector<8x128xf32>
    %c1_241 = arith.constant 1 : index
    %c0_242 = arith.constant 0 : index
    %c0_243 = arith.constant 0 : index
    %341 = vector.load %arg10[%c1_241, %c0_242, %c0_243] : memref<2x128x128xf32, #tpu.memory_space<vmem>>, vector<1x128x128xf32>
    %342 = vector.shape_cast %341 : vector<1x128x128xf32> to vector<128x128xf32>
    %cst_244 = arith.constant dense<0.000000e+00> : vector<8x128xf32>
    %343 = tpu.matmul %340, %342, %cst_244 {dimension_numbers = #tpu.dot_dimension_numbers<[1], [0], [0], [1], [0, 0, 1, 1], [], []>} : vector<8x128xf32>, vector<128x128xf32>, vector<8x128xf32> -> vector<8x128xf32>
    %c1_245 = arith.constant 1 : index
    %c0_246 = arith.constant 0 : index
    %c0_247 = arith.constant 0 : index
    %344 = vector.load %arg12[%c1_245, %c0_246, %c0_247] : memref<2x1x128xf32, #tpu.memory_space<vmem>>, vector<1x1x128xf32>
    %345 = vector.shape_cast %344 : vector<1x1x128xf32> to vector<1x128xf32>
    %346 = vector.broadcast %345 : vector<1x128xf32> to vector<8x128xf32>
    %347 = arith.addf %343, %346 : vector<8x128xf32>
    %c1_248 = arith.constant 1 : index
    %c0_249 = arith.constant 0 : index
    %c0_250 = arith.constant 0 : index
    %348 = vector.load %arg11[%c1_248, %c0_249, %c0_250] : memref<2x128x128xf32, #tpu.memory_space<vmem>>, vector<1x128x128xf32>
    %349 = vector.shape_cast %348 : vector<1x128x128xf32> to vector<128x128xf32>
    %cst_251 = arith.constant dense<0.000000e+00> : vector<8x128xf32>
    %350 = tpu.matmul %316, %349, %cst_251 {dimension_numbers = #tpu.dot_dimension_numbers<[1], [0], [0], [1], [0, 0, 1, 1], [], []>} : vector<8x128xf32>, vector<128x128xf32>, vector<8x128xf32> -> vector<8x128xf32>
    %351 = arith.addf %347, %350 : vector<8x128xf32>
    %c1_252 = arith.constant 1 : index
    %c0_253 = arith.constant 0 : index
    %c0_254 = arith.constant 0 : index
    %352 = vector.load %arg13[%c1_252, %c0_253, %c0_254] : memref<2x1x128xf32, #tpu.memory_space<vmem>>, vector<1x1x128xf32>
    %353 = vector.shape_cast %352 : vector<1x1x128xf32> to vector<1x128xf32>
    %354 = vector.broadcast %353 : vector<1x128xf32> to vector<8x128xf32>
    %355 = arith.addf %351, %354 : vector<8x128xf32>
    %356 = math.tanh %355 : vector<8x128xf32>
    %357 = vector.broadcast %284 : vector<1x128xf32> to vector<8x128xf32>
    %358 = arith.mulf %356, %357 : vector<8x128xf32>
    %cst_255 = arith.constant dense<0.000000e+00> : vector<8xf32>
    %359 = vector.multi_reduction <add>, %358, %cst_255 [1] : vector<8x128xf32> to vector<8xf32>
    %360 = vector.shape_cast %359 : vector<8xf32> to vector<8x1xf32>
    %361 = vector.broadcast %285 : vector<1x1xf32> to vector<8x1xf32>
    %362 = arith.addf %360, %361 : vector<8x1xf32>
    %cst_256 = arith.constant -1.000200e+04 : f32
    %363 = vector.broadcast %cst_256 : f32 to vector<8x1xf32>
    %364 = arith.cmpf oeq, %362, %363 : vector<8x1xf32>
    %365 = arith.ori %324, %364 : vector<8x1xi1>
    %c0_257 = arith.constant 0 : index
    %c2_258 = arith.constant 2 : index
    %366 = vector.load %arg20[%c0_257, %c2_258] : memref<8x12xf32, #tpu.memory_space<vmem>>, vector<8x1xf32>
    tpu.vector_store %arg20[%c0_257, %c2_258], %362 {strides = array<i32>} : memref<8x12xf32, #tpu.memory_space<vmem>>, vector<8x1xf32>,
    %c0_259 = arith.constant 0 : index
    %c2_260 = arith.constant 2 : index
    %367 = vector.load %arg1[%c0_259, %c2_260] : memref<8x11xf32, #tpu.memory_space<vmem>>, vector<8x1xf32>
    %368 = vector.broadcast %367 : vector<8x1xf32> to vector<8x128xf32>
    %369 = vector.broadcast %282 : vector<1x128xf32> to vector<8x128xf32>
    %370 = arith.mulf %368, %369 : vector<8x128xf32>
    %371 = vector.broadcast %283 : vector<1x128xf32> to vector<8x128xf32>
    %372 = arith.addf %370, %371 : vector<8x128xf32>
    %c0_261 = arith.constant 0 : index
    %c0_262 = arith.constant 0 : index
    %c0_263 = arith.constant 0 : index
    %373 = vector.load %arg11[%c0_261, %c0_262, %c0_263] : memref<2x128x128xf32, #tpu.memory_space<vmem>>, vector<1x128x128xf32>
    %374 = vector.shape_cast %373 : vector<1x128x128xf32> to vector<128x128xf32>
    %cst_264 = arith.constant dense<0.000000e+00> : vector<8x128xf32>
    %375 = tpu.matmul %340, %374, %cst_264 {dimension_numbers = #tpu.dot_dimension_numbers<[1], [0], [0], [1], [0, 0, 1, 1], [], []>} : vector<8x128xf32>, vector<128x128xf32>, vector<8x128xf32> -> vector<8x128xf32>
    %376 = arith.addf %372, %375 : vector<8x128xf32>
    %c0_265 = arith.constant 0 : index
    %c0_266 = arith.constant 0 : index
    %c0_267 = arith.constant 0 : index
    %377 = vector.load %arg13[%c0_265, %c0_266, %c0_267] : memref<2x1x128xf32, #tpu.memory_space<vmem>>, vector<1x1x128xf32>
    %378 = vector.shape_cast %377 : vector<1x1x128xf32> to vector<1x128xf32>
    %379 = vector.broadcast %378 : vector<1x128xf32> to vector<8x128xf32>
    %380 = arith.addf %376, %379 : vector<8x128xf32>
    %381 = math.tanh %380 : vector<8x128xf32>
    %c1_268 = arith.constant 1 : index
    %c0_269 = arith.constant 0 : index
    %c0_270 = arith.constant 0 : index
    %382 = vector.load %arg10[%c1_268, %c0_269, %c0_270] : memref<2x128x128xf32, #tpu.memory_space<vmem>>, vector<1x128x128xf32>
    %383 = vector.shape_cast %382 : vector<1x128x128xf32> to vector<128x128xf32>
    %cst_271 = arith.constant dense<0.000000e+00> : vector<8x128xf32>
    %384 = tpu.matmul %381, %383, %cst_271 {dimension_numbers = #tpu.dot_dimension_numbers<[1], [0], [0], [1], [0, 0, 1, 1], [], []>} : vector<8x128xf32>, vector<128x128xf32>, vector<8x128xf32> -> vector<8x128xf32>
    %c1_272 = arith.constant 1 : index
    %c0_273 = arith.constant 0 : index
    %c0_274 = arith.constant 0 : index
    %385 = vector.load %arg12[%c1_272, %c0_273, %c0_274] : memref<2x1x128xf32, #tpu.memory_space<vmem>>, vector<1x1x128xf32>
    %386 = vector.shape_cast %385 : vector<1x1x128xf32> to vector<1x128xf32>
    %387 = vector.broadcast %386 : vector<1x128xf32> to vector<8x128xf32>
    %388 = arith.addf %384, %387 : vector<8x128xf32>
    %c1_275 = arith.constant 1 : index
    %c0_276 = arith.constant 0 : index
    %c0_277 = arith.constant 0 : index
    %389 = vector.load %arg11[%c1_275, %c0_276, %c0_277] : memref<2x128x128xf32, #tpu.memory_space<vmem>>, vector<1x128x128xf32>
    %390 = vector.shape_cast %389 : vector<1x128x128xf32> to vector<128x128xf32>
    %cst_278 = arith.constant dense<0.000000e+00> : vector<8x128xf32>
    %391 = tpu.matmul %356, %390, %cst_278 {dimension_numbers = #tpu.dot_dimension_numbers<[1], [0], [0], [1], [0, 0, 1, 1], [], []>} : vector<8x128xf32>, vector<128x128xf32>, vector<8x128xf32> -> vector<8x128xf32>
    %392 = arith.addf %388, %391 : vector<8x128xf32>
    %c1_279 = arith.constant 1 : index
    %c0_280 = arith.constant 0 : index
    %c0_281 = arith.constant 0 : index
    %393 = vector.load %arg13[%c1_279, %c0_280, %c0_281] : memref<2x1x128xf32, #tpu.memory_space<vmem>>, vector<1x1x128xf32>
    %394 = vector.shape_cast %393 : vector<1x1x128xf32> to vector<1x128xf32>
    %395 = vector.broadcast %394 : vector<1x128xf32> to vector<8x128xf32>
    %396 = arith.addf %392, %395 : vector<8x128xf32>
    %397 = math.tanh %396 : vector<8x128xf32>
    %398 = vector.broadcast %284 : vector<1x128xf32> to vector<8x128xf32>
    %399 = arith.mulf %397, %398 : vector<8x128xf32>
    %cst_282 = arith.constant dense<0.000000e+00> : vector<8xf32>
    %400 = vector.multi_reduction <add>, %399, %cst_282 [1] : vector<8x128xf32> to vector<8xf32>
    %401 = vector.shape_cast %400 : vector<8xf32> to vector<8x1xf32>
    %402 = vector.broadcast %285 : vector<1x1xf32> to vector<8x1xf32>
    %403 = arith.addf %401, %402 : vector<8x1xf32>
    %cst_283 = arith.constant -1.000200e+04 : f32
    %404 = vector.broadcast %cst_283 : f32 to vector<8x1xf32>
    %405 = arith.cmpf oeq, %403, %404 : vector<8x1xf32>
    %406 = arith.ori %365, %405 : vector<8x1xi1>
    %c0_284 = arith.constant 0 : index
    %c3_285 = arith.constant 3 : index
    %407 = vector.load %arg20[%c0_284, %c3_285] : memref<8x12xf32, #tpu.memory_space<vmem>>, vector<8x1xf32>
    tpu.vector_store %arg20[%c0_284, %c3_285], %403 {strides = array<i32>} : memref<8x12xf32, #tpu.memory_space<vmem>>, vector<8x1xf32>,
    %c0_286 = arith.constant 0 : index
    %c3_287 = arith.constant 3 : index
    %408 = vector.load %arg1[%c0_286, %c3_287] : memref<8x11xf32, #tpu.memory_space<vmem>>, vector<8x1xf32>
    %409 = vector.broadcast %408 : vector<8x1xf32> to vector<8x128xf32>
    %410 = vector.broadcast %282 : vector<1x128xf32> to vector<8x128xf32>
    %411 = arith.mulf %409, %410 : vector<8x128xf32>
    %412 = vector.broadcast %283 : vector<1x128xf32> to vector<8x128xf32>
    %413 = arith.addf %411, %412 : vector<8x128xf32>
    %c0_288 = arith.constant 0 : index
    %c0_289 = arith.constant 0 : index
    %c0_290 = arith.constant 0 : index
    %414 = vector.load %arg11[%c0_288, %c0_289, %c0_290] : memref<2x128x128xf32, #tpu.memory_space<vmem>>, vector<1x128x128xf32>
    %415 = vector.shape_cast %414 : vector<1x128x128xf32> to vector<128x128xf32>
    %cst_291 = arith.constant dense<0.000000e+00> : vector<8x128xf32>
    %416 = tpu.matmul %381, %415, %cst_291 {dimension_numbers = #tpu.dot_dimension_numbers<[1], [0], [0], [1], [0, 0, 1, 1], [], []>} : vector<8x128xf32>, vector<128x128xf32>, vector<8x128xf32> -> vector<8x128xf32>
    %417 = arith.addf %413, %416 : vector<8x128xf32>
    %c0_292 = arith.constant 0 : index
    %c0_293 = arith.constant 0 : index
    %c0_294 = arith.constant 0 : index
    %418 = vector.load %arg13[%c0_292, %c0_293, %c0_294] : memref<2x1x128xf32, #tpu.memory_space<vmem>>, vector<1x1x128xf32>
    %419 = vector.shape_cast %418 : vector<1x1x128xf32> to vector<1x128xf32>
    %420 = vector.broadcast %419 : vector<1x128xf32> to vector<8x128xf32>
    %421 = arith.addf %417, %420 : vector<8x128xf32>
    %422 = math.tanh %421 : vector<8x128xf32>
    %c1_295 = arith.constant 1 : index
    %c0_296 = arith.constant 0 : index
    %c0_297 = arith.constant 0 : index
    %423 = vector.load %arg10[%c1_295, %c0_296, %c0_297] : memref<2x128x128xf32, #tpu.memory_space<vmem>>, vector<1x128x128xf32>
    %424 = vector.shape_cast %423 : vector<1x128x128xf32> to vector<128x128xf32>
    %cst_298 = arith.constant dense<0.000000e+00> : vector<8x128xf32>
    %425 = tpu.matmul %422, %424, %cst_298 {dimension_numbers = #tpu.dot_dimension_numbers<[1], [0], [0], [1], [0, 0, 1, 1], [], []>} : vector<8x128xf32>, vector<128x128xf32>, vector<8x128xf32> -> vector<8x128xf32>
    %c1_299 = arith.constant 1 : index
    %c0_300 = arith.constant 0 : index
    %c0_301 = arith.constant 0 : index
    %426 = vector.load %arg12[%c1_299, %c0_300, %c0_301] : memref<2x1x128xf32, #tpu.memory_space<vmem>>, vector<1x1x128xf32>
    %427 = vector.shape_cast %426 : vector<1x1x128xf32> to vector<1x128xf32>
    %428 = vector.broadcast %427 : vector<1x128xf32> to vector<8x128xf32>
    %429 = arith.addf %425, %428 : vector<8x128xf32>
    %c1_302 = arith.constant 1 : index
    %c0_303 = arith.constant 0 : index
    %c0_304 = arith.constant 0 : index
    %430 = vector.load %arg11[%c1_302, %c0_303, %c0_304] : memref<2x128x128xf32, #tpu.memory_space<vmem>>, vector<1x128x128xf32>
    %431 = vector.shape_cast %430 : vector<1x128x128xf32> to vector<128x128xf32>
    %cst_305 = arith.constant dense<0.000000e+00> : vector<8x128xf32>
    %432 = tpu.matmul %397, %431, %cst_305 {dimension_numbers = #tpu.dot_dimension_numbers<[1], [0], [0], [1], [0, 0, 1, 1], [], []>} : vector<8x128xf32>, vector<128x128xf32>, vector<8x128xf32> -> vector<8x128xf32>
    %433 = arith.addf %429, %432 : vector<8x128xf32>
    %c1_306 = arith.constant 1 : index
    %c0_307 = arith.constant 0 : index
    %c0_308 = arith.constant 0 : index
    %434 = vector.load %arg13[%c1_306, %c0_307, %c0_308] : memref<2x1x128xf32, #tpu.memory_space<vmem>>, vector<1x1x128xf32>
    %435 = vector.shape_cast %434 : vector<1x1x128xf32> to vector<1x128xf32>
    %436 = vector.broadcast %435 : vector<1x128xf32> to vector<8x128xf32>
    %437 = arith.addf %433, %436 : vector<8x128xf32>
    %438 = math.tanh %437 : vector<8x128xf32>
    %439 = vector.broadcast %284 : vector<1x128xf32> to vector<8x128xf32>
    %440 = arith.mulf %438, %439 : vector<8x128xf32>
    %cst_309 = arith.constant dense<0.000000e+00> : vector<8xf32>
    %441 = vector.multi_reduction <add>, %440, %cst_309 [1] : vector<8x128xf32> to vector<8xf32>
    %442 = vector.shape_cast %441 : vector<8xf32> to vector<8x1xf32>
    %443 = vector.broadcast %285 : vector<1x1xf32> to vector<8x1xf32>
    %444 = arith.addf %442, %443 : vector<8x1xf32>
    %cst_310 = arith.constant -1.000200e+04 : f32
    %445 = vector.broadcast %cst_310 : f32 to vector<8x1xf32>
    %446 = arith.cmpf oeq, %444, %445 : vector<8x1xf32>
    %447 = arith.ori %406, %446 : vector<8x1xi1>
    %c0_311 = arith.constant 0 : index
    %c4_312 = arith.constant 4 : index
    %448 = vector.load %arg20[%c0_311, %c4_312] : memref<8x12xf32, #tpu.memory_space<vmem>>, vector<8x1xf32>
    tpu.vector_store %arg20[%c0_311, %c4_312], %444 {strides = array<i32>} : memref<8x12xf32, #tpu.memory_space<vmem>>, vector<8x1xf32>,
    %c0_313 = arith.constant 0 : index
    %c4_314 = arith.constant 4 : index
    %449 = vector.load %arg1[%c0_313, %c4_314] : memref<8x11xf32, #tpu.memory_space<vmem>>, vector<8x1xf32>
    %450 = vector.broadcast %449 : vector<8x1xf32> to vector<8x128xf32>
    %451 = vector.broadcast %282 : vector<1x128xf32> to vector<8x128xf32>
    %452 = arith.mulf %450, %451 : vector<8x128xf32>
    %453 = vector.broadcast %283 : vector<1x128xf32> to vector<8x128xf32>
    %454 = arith.addf %452, %453 : vector<8x128xf32>
    %c0_315 = arith.constant 0 : index
    %c0_316 = arith.constant 0 : index
    %c0_317 = arith.constant 0 : index
    %455 = vector.load %arg11[%c0_315, %c0_316, %c0_317] : memref<2x128x128xf32, #tpu.memory_space<vmem>>, vector<1x128x128xf32>
    %456 = vector.shape_cast %455 : vector<1x128x128xf32> to vector<128x128xf32>
    %cst_318 = arith.constant dense<0.000000e+00> : vector<8x128xf32>
    %457 = tpu.matmul %422, %456, %cst_318 {dimension_numbers = #tpu.dot_dimension_numbers<[1], [0], [0], [1], [0, 0, 1, 1], [], []>} : vector<8x128xf32>, vector<128x128xf32>, vector<8x128xf32> -> vector<8x128xf32>
    %458 = arith.addf %454, %457 : vector<8x128xf32>
    %c0_319 = arith.constant 0 : index
    %c0_320 = arith.constant 0 : index
    %c0_321 = arith.constant 0 : index
    %459 = vector.load %arg13[%c0_319, %c0_320, %c0_321] : memref<2x1x128xf32, #tpu.memory_space<vmem>>, vector<1x1x128xf32>
    %460 = vector.shape_cast %459 : vector<1x1x128xf32> to vector<1x128xf32>
    %461 = vector.broadcast %460 : vector<1x128xf32> to vector<8x128xf32>
    %462 = arith.addf %458, %461 : vector<8x128xf32>
    %463 = math.tanh %462 : vector<8x128xf32>
    %c1_322 = arith.constant 1 : index
    %c0_323 = arith.constant 0 : index
    %c0_324 = arith.constant 0 : index
    %464 = vector.load %arg10[%c1_322, %c0_323, %c0_324] : memref<2x128x128xf32, #tpu.memory_space<vmem>>, vector<1x128x128xf32>
    %465 = vector.shape_cast %464 : vector<1x128x128xf32> to vector<128x128xf32>
    %cst_325 = arith.constant dense<0.000000e+00> : vector<8x128xf32>
    %466 = tpu.matmul %463, %465, %cst_325 {dimension_numbers = #tpu.dot_dimension_numbers<[1], [0], [0], [1], [0, 0, 1, 1], [], []>} : vector<8x128xf32>, vector<128x128xf32>, vector<8x128xf32> -> vector<8x128xf32>
    %c1_326 = arith.constant 1 : index
    %c0_327 = arith.constant 0 : index
    %c0_328 = arith.constant 0 : index
    %467 = vector.load %arg12[%c1_326, %c0_327, %c0_328] : memref<2x1x128xf32, #tpu.memory_space<vmem>>, vector<1x1x128xf32>
    %468 = vector.shape_cast %467 : vector<1x1x128xf32> to vector<1x128xf32>
    %469 = vector.broadcast %468 : vector<1x128xf32> to vector<8x128xf32>
    %470 = arith.addf %466, %469 : vector<8x128xf32>
    %c1_329 = arith.constant 1 : index
    %c0_330 = arith.constant 0 : index
    %c0_331 = arith.constant 0 : index
    %471 = vector.load %arg11[%c1_329, %c0_330, %c0_331] : memref<2x128x128xf32, #tpu.memory_space<vmem>>, vector<1x128x128xf32>
    %472 = vector.shape_cast %471 : vector<1x128x128xf32> to vector<128x128xf32>
    %cst_332 = arith.constant dense<0.000000e+00> : vector<8x128xf32>
    %473 = tpu.matmul %438, %472, %cst_332 {dimension_numbers = #tpu.dot_dimension_numbers<[1], [0], [0], [1], [0, 0, 1, 1], [], []>} : vector<8x128xf32>, vector<128x128xf32>, vector<8x128xf32> -> vector<8x128xf32>
    %474 = arith.addf %470, %473 : vector<8x128xf32>
    %c1_333 = arith.constant 1 : index
    %c0_334 = arith.constant 0 : index
    %c0_335 = arith.constant 0 : index
    %475 = vector.load %arg13[%c1_333, %c0_334, %c0_335] : memref<2x1x128xf32, #tpu.memory_space<vmem>>, vector<1x1x128xf32>
    %476 = vector.shape_cast %475 : vector<1x1x128xf32> to vector<1x128xf32>
    %477 = vector.broadcast %476 : vector<1x128xf32> to vector<8x128xf32>
    %478 = arith.addf %474, %477 : vector<8x128xf32>
    %479 = math.tanh %478 : vector<8x128xf32>
    %480 = vector.broadcast %284 : vector<1x128xf32> to vector<8x128xf32>
    %481 = arith.mulf %479, %480 : vector<8x128xf32>
    %cst_336 = arith.constant dense<0.000000e+00> : vector<8xf32>
    %482 = vector.multi_reduction <add>, %481, %cst_336 [1] : vector<8x128xf32> to vector<8xf32>
    %483 = vector.shape_cast %482 : vector<8xf32> to vector<8x1xf32>
    %484 = vector.broadcast %285 : vector<1x1xf32> to vector<8x1xf32>
    %485 = arith.addf %483, %484 : vector<8x1xf32>
    %cst_337 = arith.constant -1.000200e+04 : f32
    %486 = vector.broadcast %cst_337 : f32 to vector<8x1xf32>
    %487 = arith.cmpf oeq, %485, %486 : vector<8x1xf32>
    %488 = arith.ori %447, %487 : vector<8x1xi1>
    %c0_338 = arith.constant 0 : index
    %c5_339 = arith.constant 5 : index
    %489 = vector.load %arg20[%c0_338, %c5_339] : memref<8x12xf32, #tpu.memory_space<vmem>>, vector<8x1xf32>
    tpu.vector_store %arg20[%c0_338, %c5_339], %485 {strides = array<i32>} : memref<8x12xf32, #tpu.memory_space<vmem>>, vector<8x1xf32>,
    %c0_340 = arith.constant 0 : index
    %c5_341 = arith.constant 5 : index
    %490 = vector.load %arg1[%c0_340, %c5_341] : memref<8x11xf32, #tpu.memory_space<vmem>>, vector<8x1xf32>
    %491 = vector.broadcast %490 : vector<8x1xf32> to vector<8x128xf32>
    %492 = vector.broadcast %282 : vector<1x128xf32> to vector<8x128xf32>
    %493 = arith.mulf %491, %492 : vector<8x128xf32>
    %494 = vector.broadcast %283 : vector<1x128xf32> to vector<8x128xf32>
    %495 = arith.addf %493, %494 : vector<8x128xf32>
    %c0_342 = arith.constant 0 : index
    %c0_343 = arith.constant 0 : index
    %c0_344 = arith.constant 0 : index
    %496 = vector.load %arg11[%c0_342, %c0_343, %c0_344] : memref<2x128x128xf32, #tpu.memory_space<vmem>>, vector<1x128x128xf32>
    %497 = vector.shape_cast %496 : vector<1x128x128xf32> to vector<128x128xf32>
    %cst_345 = arith.constant dense<0.000000e+00> : vector<8x128xf32>
    %498 = tpu.matmul %463, %497, %cst_345 {dimension_numbers = #tpu.dot_dimension_numbers<[1], [0], [0], [1], [0, 0, 1, 1], [], []>} : vector<8x128xf32>, vector<128x128xf32>, vector<8x128xf32> -> vector<8x128xf32>
    %499 = arith.addf %495, %498 : vector<8x128xf32>
    %c0_346 = arith.constant 0 : index
    %c0_347 = arith.constant 0 : index
    %c0_348 = arith.constant 0 : index
    %500 = vector.load %arg13[%c0_346, %c0_347, %c0_348] : memref<2x1x128xf32, #tpu.memory_space<vmem>>, vector<1x1x128xf32>
    %501 = vector.shape_cast %500 : vector<1x1x128xf32> to vector<1x128xf32>
    %502 = vector.broadcast %501 : vector<1x128xf32> to vector<8x128xf32>
    %503 = arith.addf %499, %502 : vector<8x128xf32>
    %504 = math.tanh %503 : vector<8x128xf32>
    %c1_349 = arith.constant 1 : index
    %c0_350 = arith.constant 0 : index
    %c0_351 = arith.constant 0 : index
    %505 = vector.load %arg10[%c1_349, %c0_350, %c0_351] : memref<2x128x128xf32, #tpu.memory_space<vmem>>, vector<1x128x128xf32>
    %506 = vector.shape_cast %505 : vector<1x128x128xf32> to vector<128x128xf32>
    %cst_352 = arith.constant dense<0.000000e+00> : vector<8x128xf32>
    %507 = tpu.matmul %504, %506, %cst_352 {dimension_numbers = #tpu.dot_dimension_numbers<[1], [0], [0], [1], [0, 0, 1, 1], [], []>} : vector<8x128xf32>, vector<128x128xf32>, vector<8x128xf32> -> vector<8x128xf32>
    %c1_353 = arith.constant 1 : index
    %c0_354 = arith.constant 0 : index
    %c0_355 = arith.constant 0 : index
    %508 = vector.load %arg12[%c1_353, %c0_354, %c0_355] : memref<2x1x128xf32, #tpu.memory_space<vmem>>, vector<1x1x128xf32>
    %509 = vector.shape_cast %508 : vector<1x1x128xf32> to vector<1x128xf32>
    %510 = vector.broadcast %509 : vector<1x128xf32> to vector<8x128xf32>
    %511 = arith.addf %507, %510 : vector<8x128xf32>
    %c1_356 = arith.constant 1 : index
    %c0_357 = arith.constant 0 : index
    %c0_358 = arith.constant 0 : index
    %512 = vector.load %arg11[%c1_356, %c0_357, %c0_358] : memref<2x128x128xf32, #tpu.memory_space<vmem>>, vector<1x128x128xf32>
    %513 = vector.shape_cast %512 : vector<1x128x128xf32> to vector<128x128xf32>
    %cst_359 = arith.constant dense<0.000000e+00> : vector<8x128xf32>
    %514 = tpu.matmul %479, %513, %cst_359 {dimension_numbers = #tpu.dot_dimension_numbers<[1], [0], [0], [1], [0, 0, 1, 1], [], []>} : vector<8x128xf32>, vector<128x128xf32>, vector<8x128xf32> -> vector<8x128xf32>
    %515 = arith.addf %511, %514 : vector<8x128xf32>
    %c1_360 = arith.constant 1 : index
    %c0_361 = arith.constant 0 : index
    %c0_362 = arith.constant 0 : index
    %516 = vector.load %arg13[%c1_360, %c0_361, %c0_362] : memref<2x1x128xf32, #tpu.memory_space<vmem>>, vector<1x1x128xf32>
    %517 = vector.shape_cast %516 : vector<1x1x128xf32> to vector<1x128xf32>
    %518 = vector.broadcast %517 : vector<1x128xf32> to vector<8x128xf32>
    %519 = arith.addf %515, %518 : vector<8x128xf32>
    %520 = math.tanh %519 : vector<8x128xf32>
    %521 = vector.broadcast %284 : vector<1x128xf32> to vector<8x128xf32>
    %522 = arith.mulf %520, %521 : vector<8x128xf32>
    %cst_363 = arith.constant dense<0.000000e+00> : vector<8xf32>
    %523 = vector.multi_reduction <add>, %522, %cst_363 [1] : vector<8x128xf32> to vector<8xf32>
    %524 = vector.shape_cast %523 : vector<8xf32> to vector<8x1xf32>
    %525 = vector.broadcast %285 : vector<1x1xf32> to vector<8x1xf32>
    %526 = arith.addf %524, %525 : vector<8x1xf32>
    %cst_364 = arith.constant -1.000200e+04 : f32
    %527 = vector.broadcast %cst_364 : f32 to vector<8x1xf32>
    %528 = arith.cmpf oeq, %526, %527 : vector<8x1xf32>
    %529 = arith.ori %488, %528 : vector<8x1xi1>
    %c0_365 = arith.constant 0 : index
    %c6_366 = arith.constant 6 : index
    %530 = vector.load %arg20[%c0_365, %c6_366] : memref<8x12xf32, #tpu.memory_space<vmem>>, vector<8x1xf32>
    tpu.vector_store %arg20[%c0_365, %c6_366], %526 {strides = array<i32>} : memref<8x12xf32, #tpu.memory_space<vmem>>, vector<8x1xf32>,
    %c0_367 = arith.constant 0 : index
    %c6_368 = arith.constant 6 : index
    %531 = vector.load %arg1[%c0_367, %c6_368] : memref<8x11xf32, #tpu.memory_space<vmem>>, vector<8x1xf32>
    %532 = vector.broadcast %531 : vector<8x1xf32> to vector<8x128xf32>
    %533 = vector.broadcast %282 : vector<1x128xf32> to vector<8x128xf32>
    %534 = arith.mulf %532, %533 : vector<8x128xf32>
    %535 = vector.broadcast %283 : vector<1x128xf32> to vector<8x128xf32>
    %536 = arith.addf %534, %535 : vector<8x128xf32>
    %c0_369 = arith.constant 0 : index
    %c0_370 = arith.constant 0 : index
    %c0_371 = arith.constant 0 : index
    %537 = vector.load %arg11[%c0_369, %c0_370, %c0_371] : memref<2x128x128xf32, #tpu.memory_space<vmem>>, vector<1x128x128xf32>
    %538 = vector.shape_cast %537 : vector<1x128x128xf32> to vector<128x128xf32>
    %cst_372 = arith.constant dense<0.000000e+00> : vector<8x128xf32>
    %539 = tpu.matmul %504, %538, %cst_372 {dimension_numbers = #tpu.dot_dimension_numbers<[1], [0], [0], [1], [0, 0, 1, 1], [], []>} : vector<8x128xf32>, vector<128x128xf32>, vector<8x128xf32> -> vector<8x128xf32>
    %540 = arith.addf %536, %539 : vector<8x128xf32>
    %c0_373 = arith.constant 0 : index
    %c0_374 = arith.constant 0 : index
    %c0_375 = arith.constant 0 : index
    %541 = vector.load %arg13[%c0_373, %c0_374, %c0_375] : memref<2x1x128xf32, #tpu.memory_space<vmem>>, vector<1x1x128xf32>
    %542 = vector.shape_cast %541 : vector<1x1x128xf32> to vector<1x128xf32>
    %543 = vector.broadcast %542 : vector<1x128xf32> to vector<8x128xf32>
    %544 = arith.addf %540, %543 : vector<8x128xf32>
    %545 = math.tanh %544 : vector<8x128xf32>
    %c1_376 = arith.constant 1 : index
    %c0_377 = arith.constant 0 : index
    %c0_378 = arith.constant 0 : index
    %546 = vector.load %arg10[%c1_376, %c0_377, %c0_378] : memref<2x128x128xf32, #tpu.memory_space<vmem>>, vector<1x128x128xf32>
    %547 = vector.shape_cast %546 : vector<1x128x128xf32> to vector<128x128xf32>
    %cst_379 = arith.constant dense<0.000000e+00> : vector<8x128xf32>
    %548 = tpu.matmul %545, %547, %cst_379 {dimension_numbers = #tpu.dot_dimension_numbers<[1], [0], [0], [1], [0, 0, 1, 1], [], []>} : vector<8x128xf32>, vector<128x128xf32>, vector<8x128xf32> -> vector<8x128xf32>
    %c1_380 = arith.constant 1 : index
    %c0_381 = arith.constant 0 : index
    %c0_382 = arith.constant 0 : index
    %549 = vector.load %arg12[%c1_380, %c0_381, %c0_382] : memref<2x1x128xf32, #tpu.memory_space<vmem>>, vector<1x1x128xf32>
    %550 = vector.shape_cast %549 : vector<1x1x128xf32> to vector<1x128xf32>
    %551 = vector.broadcast %550 : vector<1x128xf32> to vector<8x128xf32>
    %552 = arith.addf %548, %551 : vector<8x128xf32>
    %c1_383 = arith.constant 1 : index
    %c0_384 = arith.constant 0 : index
    %c0_385 = arith.constant 0 : index
    %553 = vector.load %arg11[%c1_383, %c0_384, %c0_385] : memref<2x128x128xf32, #tpu.memory_space<vmem>>, vector<1x128x128xf32>
    %554 = vector.shape_cast %553 : vector<1x128x128xf32> to vector<128x128xf32>
    %cst_386 = arith.constant dense<0.000000e+00> : vector<8x128xf32>
    %555 = tpu.matmul %520, %554, %cst_386 {dimension_numbers = #tpu.dot_dimension_numbers<[1], [0], [0], [1], [0, 0, 1, 1], [], []>} : vector<8x128xf32>, vector<128x128xf32>, vector<8x128xf32> -> vector<8x128xf32>
    %556 = arith.addf %552, %555 : vector<8x128xf32>
    %c1_387 = arith.constant 1 : index
    %c0_388 = arith.constant 0 : index
    %c0_389 = arith.constant 0 : index
    %557 = vector.load %arg13[%c1_387, %c0_388, %c0_389] : memref<2x1x128xf32, #tpu.memory_space<vmem>>, vector<1x1x128xf32>
    %558 = vector.shape_cast %557 : vector<1x1x128xf32> to vector<1x128xf32>
    %559 = vector.broadcast %558 : vector<1x128xf32> to vector<8x128xf32>
    %560 = arith.addf %556, %559 : vector<8x128xf32>
    %561 = math.tanh %560 : vector<8x128xf32>
    %562 = vector.broadcast %284 : vector<1x128xf32> to vector<8x128xf32>
    %563 = arith.mulf %561, %562 : vector<8x128xf32>
    %cst_390 = arith.constant dense<0.000000e+00> : vector<8xf32>
    %564 = vector.multi_reduction <add>, %563, %cst_390 [1] : vector<8x128xf32> to vector<8xf32>
    %565 = vector.shape_cast %564 : vector<8xf32> to vector<8x1xf32>
    %566 = vector.broadcast %285 : vector<1x1xf32> to vector<8x1xf32>
    %567 = arith.addf %565, %566 : vector<8x1xf32>
    %cst_391 = arith.constant -1.000200e+04 : f32
    %568 = vector.broadcast %cst_391 : f32 to vector<8x1xf32>
    %569 = arith.cmpf oeq, %567, %568 : vector<8x1xf32>
    %570 = arith.ori %529, %569 : vector<8x1xi1>
    %c0_392 = arith.constant 0 : index
    %c7_393 = arith.constant 7 : index
    %571 = vector.load %arg20[%c0_392, %c7_393] : memref<8x12xf32, #tpu.memory_space<vmem>>, vector<8x1xf32>
    tpu.vector_store %arg20[%c0_392, %c7_393], %567 {strides = array<i32>} : memref<8x12xf32, #tpu.memory_space<vmem>>, vector<8x1xf32>,
    %c0_394 = arith.constant 0 : index
    %c7_395 = arith.constant 7 : index
    %572 = vector.load %arg1[%c0_394, %c7_395] : memref<8x11xf32, #tpu.memory_space<vmem>>, vector<8x1xf32>
    %573 = vector.broadcast %572 : vector<8x1xf32> to vector<8x128xf32>
    %574 = vector.broadcast %282 : vector<1x128xf32> to vector<8x128xf32>
    %575 = arith.mulf %573, %574 : vector<8x128xf32>
    %576 = vector.broadcast %283 : vector<1x128xf32> to vector<8x128xf32>
    %577 = arith.addf %575, %576 : vector<8x128xf32>
    %c0_396 = arith.constant 0 : index
    %c0_397 = arith.constant 0 : index
    %c0_398 = arith.constant 0 : index
    %578 = vector.load %arg11[%c0_396, %c0_397, %c0_398] : memref<2x128x128xf32, #tpu.memory_space<vmem>>, vector<1x128x128xf32>
    %579 = vector.shape_cast %578 : vector<1x128x128xf32> to vector<128x128xf32>
    %cst_399 = arith.constant dense<0.000000e+00> : vector<8x128xf32>
    %580 = tpu.matmul %545, %579, %cst_399 {dimension_numbers = #tpu.dot_dimension_numbers<[1], [0], [0], [1], [0, 0, 1, 1], [], []>} : vector<8x128xf32>, vector<128x128xf32>, vector<8x128xf32> -> vector<8x128xf32>
    %581 = arith.addf %577, %580 : vector<8x128xf32>
    %c0_400 = arith.constant 0 : index
    %c0_401 = arith.constant 0 : index
    %c0_402 = arith.constant 0 : index
    %582 = vector.load %arg13[%c0_400, %c0_401, %c0_402] : memref<2x1x128xf32, #tpu.memory_space<vmem>>, vector<1x1x128xf32>
    %583 = vector.shape_cast %582 : vector<1x1x128xf32> to vector<1x128xf32>
    %584 = vector.broadcast %583 : vector<1x128xf32> to vector<8x128xf32>
    %585 = arith.addf %581, %584 : vector<8x128xf32>
    %586 = math.tanh %585 : vector<8x128xf32>
    %c1_403 = arith.constant 1 : index
    %c0_404 = arith.constant 0 : index
    %c0_405 = arith.constant 0 : index
    %587 = vector.load %arg10[%c1_403, %c0_404, %c0_405] : memref<2x128x128xf32, #tpu.memory_space<vmem>>, vector<1x128x128xf32>
    %588 = vector.shape_cast %587 : vector<1x128x128xf32> to vector<128x128xf32>
    %cst_406 = arith.constant dense<0.000000e+00> : vector<8x128xf32>
    %589 = tpu.matmul %586, %588, %cst_406 {dimension_numbers = #tpu.dot_dimension_numbers<[1], [0], [0], [1], [0, 0, 1, 1], [], []>} : vector<8x128xf32>, vector<128x128xf32>, vector<8x128xf32> -> vector<8x128xf32>
    %c1_407 = arith.constant 1 : index
    %c0_408 = arith.constant 0 : index
    %c0_409 = arith.constant 0 : index
    %590 = vector.load %arg12[%c1_407, %c0_408, %c0_409] : memref<2x1x128xf32, #tpu.memory_space<vmem>>, vector<1x1x128xf32>
    %591 = vector.shape_cast %590 : vector<1x1x128xf32> to vector<1x128xf32>
    %592 = vector.broadcast %591 : vector<1x128xf32> to vector<8x128xf32>
    %593 = arith.addf %589, %592 : vector<8x128xf32>
    %c1_410 = arith.constant 1 : index
    %c0_411 = arith.constant 0 : index
    %c0_412 = arith.constant 0 : index
    %594 = vector.load %arg11[%c1_410, %c0_411, %c0_412] : memref<2x128x128xf32, #tpu.memory_space<vmem>>, vector<1x128x128xf32>
    %595 = vector.shape_cast %594 : vector<1x128x128xf32> to vector<128x128xf32>
    %cst_413 = arith.constant dense<0.000000e+00> : vector<8x128xf32>
    %596 = tpu.matmul %561, %595, %cst_413 {dimension_numbers = #tpu.dot_dimension_numbers<[1], [0], [0], [1], [0, 0, 1, 1], [], []>} : vector<8x128xf32>, vector<128x128xf32>, vector<8x128xf32> -> vector<8x128xf32>
    %597 = arith.addf %593, %596 : vector<8x128xf32>
    %c1_414 = arith.constant 1 : index
    %c0_415 = arith.constant 0 : index
    %c0_416 = arith.constant 0 : index
    %598 = vector.load %arg13[%c1_414, %c0_415, %c0_416] : memref<2x1x128xf32, #tpu.memory_space<vmem>>, vector<1x1x128xf32>
    %599 = vector.shape_cast %598 : vector<1x1x128xf32> to vector<1x128xf32>
    %600 = vector.broadcast %599 : vector<1x128xf32> to vector<8x128xf32>
    %601 = arith.addf %597, %600 : vector<8x128xf32>
    %602 = math.tanh %601 : vector<8x128xf32>
    %603 = vector.broadcast %284 : vector<1x128xf32> to vector<8x128xf32>
    %604 = arith.mulf %602, %603 : vector<8x128xf32>
    %cst_417 = arith.constant dense<0.000000e+00> : vector<8xf32>
    %605 = vector.multi_reduction <add>, %604, %cst_417 [1] : vector<8x128xf32> to vector<8xf32>
    %606 = vector.shape_cast %605 : vector<8xf32> to vector<8x1xf32>
    %607 = vector.broadcast %285 : vector<1x1xf32> to vector<8x1xf32>
    %608 = arith.addf %606, %607 : vector<8x1xf32>
    %cst_418 = arith.constant -1.000200e+04 : f32
    %609 = vector.broadcast %cst_418 : f32 to vector<8x1xf32>
    %610 = arith.cmpf oeq, %608, %609 : vector<8x1xf32>
    %611 = arith.ori %570, %610 : vector<8x1xi1>
    %c0_419 = arith.constant 0 : index
    %c8 = arith.constant 8 : index
    %612 = vector.load %arg20[%c0_419, %c8] : memref<8x12xf32, #tpu.memory_space<vmem>>, vector<8x1xf32>
    tpu.vector_store %arg20[%c0_419, %c8], %608 {strides = array<i32>} : memref<8x12xf32, #tpu.memory_space<vmem>>, vector<8x1xf32>,
    %c0_420 = arith.constant 0 : index
    %c8_421 = arith.constant 8 : index
    %613 = vector.load %arg1[%c0_420, %c8_421] : memref<8x11xf32, #tpu.memory_space<vmem>>, vector<8x1xf32>
    %614 = vector.broadcast %613 : vector<8x1xf32> to vector<8x128xf32>
    %615 = vector.broadcast %282 : vector<1x128xf32> to vector<8x128xf32>
    %616 = arith.mulf %614, %615 : vector<8x128xf32>
    %617 = vector.broadcast %283 : vector<1x128xf32> to vector<8x128xf32>
    %618 = arith.addf %616, %617 : vector<8x128xf32>
    %c0_422 = arith.constant 0 : index
    %c0_423 = arith.constant 0 : index
    %c0_424 = arith.constant 0 : index
    %619 = vector.load %arg11[%c0_422, %c0_423, %c0_424] : memref<2x128x128xf32, #tpu.memory_space<vmem>>, vector<1x128x128xf32>
    %620 = vector.shape_cast %619 : vector<1x128x128xf32> to vector<128x128xf32>
    %cst_425 = arith.constant dense<0.000000e+00> : vector<8x128xf32>
    %621 = tpu.matmul %586, %620, %cst_425 {dimension_numbers = #tpu.dot_dimension_numbers<[1], [0], [0], [1], [0, 0, 1, 1], [], []>} : vector<8x128xf32>, vector<128x128xf32>, vector<8x128xf32> -> vector<8x128xf32>
    %622 = arith.addf %618, %621 : vector<8x128xf32>
    %c0_426 = arith.constant 0 : index
    %c0_427 = arith.constant 0 : index
    %c0_428 = arith.constant 0 : index
    %623 = vector.load %arg13[%c0_426, %c0_427, %c0_428] : memref<2x1x128xf32, #tpu.memory_space<vmem>>, vector<1x1x128xf32>
    %624 = vector.shape_cast %623 : vector<1x1x128xf32> to vector<1x128xf32>
    %625 = vector.broadcast %624 : vector<1x128xf32> to vector<8x128xf32>
    %626 = arith.addf %622, %625 : vector<8x128xf32>
    %627 = math.tanh %626 : vector<8x128xf32>
    %c1_429 = arith.constant 1 : index
    %c0_430 = arith.constant 0 : index
    %c0_431 = arith.constant 0 : index
    %628 = vector.load %arg10[%c1_429, %c0_430, %c0_431] : memref<2x128x128xf32, #tpu.memory_space<vmem>>, vector<1x128x128xf32>
    %629 = vector.shape_cast %628 : vector<1x128x128xf32> to vector<128x128xf32>
    %cst_432 = arith.constant dense<0.000000e+00> : vector<8x128xf32>
    %630 = tpu.matmul %627, %629, %cst_432 {dimension_numbers = #tpu.dot_dimension_numbers<[1], [0], [0], [1], [0, 0, 1, 1], [], []>} : vector<8x128xf32>, vector<128x128xf32>, vector<8x128xf32> -> vector<8x128xf32>
    %c1_433 = arith.constant 1 : index
    %c0_434 = arith.constant 0 : index
    %c0_435 = arith.constant 0 : index
    %631 = vector.load %arg12[%c1_433, %c0_434, %c0_435] : memref<2x1x128xf32, #tpu.memory_space<vmem>>, vector<1x1x128xf32>
    %632 = vector.shape_cast %631 : vector<1x1x128xf32> to vector<1x128xf32>
    %633 = vector.broadcast %632 : vector<1x128xf32> to vector<8x128xf32>
    %634 = arith.addf %630, %633 : vector<8x128xf32>
    %c1_436 = arith.constant 1 : index
    %c0_437 = arith.constant 0 : index
    %c0_438 = arith.constant 0 : index
    %635 = vector.load %arg11[%c1_436, %c0_437, %c0_438] : memref<2x128x128xf32, #tpu.memory_space<vmem>>, vector<1x128x128xf32>
    %636 = vector.shape_cast %635 : vector<1x128x128xf32> to vector<128x128xf32>
    %cst_439 = arith.constant dense<0.000000e+00> : vector<8x128xf32>
    %637 = tpu.matmul %602, %636, %cst_439 {dimension_numbers = #tpu.dot_dimension_numbers<[1], [0], [0], [1], [0, 0, 1, 1], [], []>} : vector<8x128xf32>, vector<128x128xf32>, vector<8x128xf32> -> vector<8x128xf32>
    %638 = arith.addf %634, %637 : vector<8x128xf32>
    %c1_440 = arith.constant 1 : index
    %c0_441 = arith.constant 0 : index
    %c0_442 = arith.constant 0 : index
    %639 = vector.load %arg13[%c1_440, %c0_441, %c0_442] : memref<2x1x128xf32, #tpu.memory_space<vmem>>, vector<1x1x128xf32>
    %640 = vector.shape_cast %639 : vector<1x1x128xf32> to vector<1x128xf32>
    %641 = vector.broadcast %640 : vector<1x128xf32> to vector<8x128xf32>
    %642 = arith.addf %638, %641 : vector<8x128xf32>
    %643 = math.tanh %642 : vector<8x128xf32>
    %644 = vector.broadcast %284 : vector<1x128xf32> to vector<8x128xf32>
    %645 = arith.mulf %643, %644 : vector<8x128xf32>
    %cst_443 = arith.constant dense<0.000000e+00> : vector<8xf32>
    %646 = vector.multi_reduction <add>, %645, %cst_443 [1] : vector<8x128xf32> to vector<8xf32>
    %647 = vector.shape_cast %646 : vector<8xf32> to vector<8x1xf32>
    %648 = vector.broadcast %285 : vector<1x1xf32> to vector<8x1xf32>
    %649 = arith.addf %647, %648 : vector<8x1xf32>
    %cst_444 = arith.constant -1.000200e+04 : f32
    %650 = vector.broadcast %cst_444 : f32 to vector<8x1xf32>
    %651 = arith.cmpf oeq, %649, %650 : vector<8x1xf32>
    %652 = arith.ori %611, %651 : vector<8x1xi1>
    %c0_445 = arith.constant 0 : index
    %c9 = arith.constant 9 : index
    %653 = vector.load %arg20[%c0_445, %c9] : memref<8x12xf32, #tpu.memory_space<vmem>>, vector<8x1xf32>
    tpu.vector_store %arg20[%c0_445, %c9], %649 {strides = array<i32>} : memref<8x12xf32, #tpu.memory_space<vmem>>, vector<8x1xf32>,
    %c0_446 = arith.constant 0 : index
    %c9_447 = arith.constant 9 : index
    %654 = vector.load %arg1[%c0_446, %c9_447] : memref<8x11xf32, #tpu.memory_space<vmem>>, vector<8x1xf32>
    %655 = vector.broadcast %654 : vector<8x1xf32> to vector<8x128xf32>
    %656 = vector.broadcast %282 : vector<1x128xf32> to vector<8x128xf32>
    %657 = arith.mulf %655, %656 : vector<8x128xf32>
    %658 = vector.broadcast %283 : vector<1x128xf32> to vector<8x128xf32>
    %659 = arith.addf %657, %658 : vector<8x128xf32>
    %c0_448 = arith.constant 0 : index
    %c0_449 = arith.constant 0 : index
    %c0_450 = arith.constant 0 : index
    %660 = vector.load %arg11[%c0_448, %c0_449, %c0_450] : memref<2x128x128xf32, #tpu.memory_space<vmem>>, vector<1x128x128xf32>
    %661 = vector.shape_cast %660 : vector<1x128x128xf32> to vector<128x128xf32>
    %cst_451 = arith.constant dense<0.000000e+00> : vector<8x128xf32>
    %662 = tpu.matmul %627, %661, %cst_451 {dimension_numbers = #tpu.dot_dimension_numbers<[1], [0], [0], [1], [0, 0, 1, 1], [], []>} : vector<8x128xf32>, vector<128x128xf32>, vector<8x128xf32> -> vector<8x128xf32>
    %663 = arith.addf %659, %662 : vector<8x128xf32>
    %c0_452 = arith.constant 0 : index
    %c0_453 = arith.constant 0 : index
    %c0_454 = arith.constant 0 : index
    %664 = vector.load %arg13[%c0_452, %c0_453, %c0_454] : memref<2x1x128xf32, #tpu.memory_space<vmem>>, vector<1x1x128xf32>
    %665 = vector.shape_cast %664 : vector<1x1x128xf32> to vector<1x128xf32>
    %666 = vector.broadcast %665 : vector<1x128xf32> to vector<8x128xf32>
    %667 = arith.addf %663, %666 : vector<8x128xf32>
    %668 = math.tanh %667 : vector<8x128xf32>
    %c1_455 = arith.constant 1 : index
    %c0_456 = arith.constant 0 : index
    %c0_457 = arith.constant 0 : index
    %669 = vector.load %arg10[%c1_455, %c0_456, %c0_457] : memref<2x128x128xf32, #tpu.memory_space<vmem>>, vector<1x128x128xf32>
    %670 = vector.shape_cast %669 : vector<1x128x128xf32> to vector<128x128xf32>
    %cst_458 = arith.constant dense<0.000000e+00> : vector<8x128xf32>
    %671 = tpu.matmul %668, %670, %cst_458 {dimension_numbers = #tpu.dot_dimension_numbers<[1], [0], [0], [1], [0, 0, 1, 1], [], []>} : vector<8x128xf32>, vector<128x128xf32>, vector<8x128xf32> -> vector<8x128xf32>
    %c1_459 = arith.constant 1 : index
    %c0_460 = arith.constant 0 : index
    %c0_461 = arith.constant 0 : index
    %672 = vector.load %arg12[%c1_459, %c0_460, %c0_461] : memref<2x1x128xf32, #tpu.memory_space<vmem>>, vector<1x1x128xf32>
    %673 = vector.shape_cast %672 : vector<1x1x128xf32> to vector<1x128xf32>
    %674 = vector.broadcast %673 : vector<1x128xf32> to vector<8x128xf32>
    %675 = arith.addf %671, %674 : vector<8x128xf32>
    %c1_462 = arith.constant 1 : index
    %c0_463 = arith.constant 0 : index
    %c0_464 = arith.constant 0 : index
    %676 = vector.load %arg11[%c1_462, %c0_463, %c0_464] : memref<2x128x128xf32, #tpu.memory_space<vmem>>, vector<1x128x128xf32>
    %677 = vector.shape_cast %676 : vector<1x128x128xf32> to vector<128x128xf32>
    %cst_465 = arith.constant dense<0.000000e+00> : vector<8x128xf32>
    %678 = tpu.matmul %643, %677, %cst_465 {dimension_numbers = #tpu.dot_dimension_numbers<[1], [0], [0], [1], [0, 0, 1, 1], [], []>} : vector<8x128xf32>, vector<128x128xf32>, vector<8x128xf32> -> vector<8x128xf32>
    %679 = arith.addf %675, %678 : vector<8x128xf32>
    %c1_466 = arith.constant 1 : index
    %c0_467 = arith.constant 0 : index
    %c0_468 = arith.constant 0 : index
    %680 = vector.load %arg13[%c1_466, %c0_467, %c0_468] : memref<2x1x128xf32, #tpu.memory_space<vmem>>, vector<1x1x128xf32>
    %681 = vector.shape_cast %680 : vector<1x1x128xf32> to vector<1x128xf32>
    %682 = vector.broadcast %681 : vector<1x128xf32> to vector<8x128xf32>
    %683 = arith.addf %679, %682 : vector<8x128xf32>
    %684 = math.tanh %683 : vector<8x128xf32>
    %685 = vector.broadcast %284 : vector<1x128xf32> to vector<8x128xf32>
    %686 = arith.mulf %684, %685 : vector<8x128xf32>
    %cst_469 = arith.constant dense<0.000000e+00> : vector<8xf32>
    %687 = vector.multi_reduction <add>, %686, %cst_469 [1] : vector<8x128xf32> to vector<8xf32>
    %688 = vector.shape_cast %687 : vector<8xf32> to vector<8x1xf32>
    %689 = vector.broadcast %285 : vector<1x1xf32> to vector<8x1xf32>
    %690 = arith.addf %688, %689 : vector<8x1xf32>
    %cst_470 = arith.constant -1.000200e+04 : f32
    %691 = vector.broadcast %cst_470 : f32 to vector<8x1xf32>
    %692 = arith.cmpf oeq, %690, %691 : vector<8x1xf32>
    %693 = arith.ori %652, %692 : vector<8x1xi1>
    %c0_471 = arith.constant 0 : index
    %c10 = arith.constant 10 : index
    %694 = vector.load %arg20[%c0_471, %c10] : memref<8x12xf32, #tpu.memory_space<vmem>>, vector<8x1xf32>
    tpu.vector_store %arg20[%c0_471, %c10], %690 {strides = array<i32>} : memref<8x12xf32, #tpu.memory_space<vmem>>, vector<8x1xf32>,
    %c0_472 = arith.constant 0 : index
    %c10_473 = arith.constant 10 : index
    %695 = vector.load %arg1[%c0_472, %c10_473] : memref<8x11xf32, #tpu.memory_space<vmem>>, vector<8x1xf32>
    %696 = vector.broadcast %695 : vector<8x1xf32> to vector<8x128xf32>
    %697 = vector.broadcast %282 : vector<1x128xf32> to vector<8x128xf32>
    %698 = arith.mulf %696, %697 : vector<8x128xf32>
    %699 = vector.broadcast %283 : vector<1x128xf32> to vector<8x128xf32>
    %700 = arith.addf %698, %699 : vector<8x128xf32>
    %c0_474 = arith.constant 0 : index
    %c0_475 = arith.constant 0 : index
    %c0_476 = arith.constant 0 : index
    %701 = vector.load %arg11[%c0_474, %c0_475, %c0_476] : memref<2x128x128xf32, #tpu.memory_space<vmem>>, vector<1x128x128xf32>
    %702 = vector.shape_cast %701 : vector<1x128x128xf32> to vector<128x128xf32>
    %cst_477 = arith.constant dense<0.000000e+00> : vector<8x128xf32>
    %703 = tpu.matmul %668, %702, %cst_477 {dimension_numbers = #tpu.dot_dimension_numbers<[1], [0], [0], [1], [0, 0, 1, 1], [], []>} : vector<8x128xf32>, vector<128x128xf32>, vector<8x128xf32> -> vector<8x128xf32>
    %704 = arith.addf %700, %703 : vector<8x128xf32>
    %c0_478 = arith.constant 0 : index
    %c0_479 = arith.constant 0 : index
    %c0_480 = arith.constant 0 : index
    %705 = vector.load %arg13[%c0_478, %c0_479, %c0_480] : memref<2x1x128xf32, #tpu.memory_space<vmem>>, vector<1x1x128xf32>
    %706 = vector.shape_cast %705 : vector<1x1x128xf32> to vector<1x128xf32>
    %707 = vector.broadcast %706 : vector<1x128xf32> to vector<8x128xf32>
    %708 = arith.addf %704, %707 : vector<8x128xf32>
    %709 = math.tanh %708 : vector<8x128xf32>
    %c1_481 = arith.constant 1 : index
    %c0_482 = arith.constant 0 : index
    %c0_483 = arith.constant 0 : index
    %710 = vector.load %arg10[%c1_481, %c0_482, %c0_483] : memref<2x128x128xf32, #tpu.memory_space<vmem>>, vector<1x128x128xf32>
    %711 = vector.shape_cast %710 : vector<1x128x128xf32> to vector<128x128xf32>
    %cst_484 = arith.constant dense<0.000000e+00> : vector<8x128xf32>
    %712 = tpu.matmul %709, %711, %cst_484 {dimension_numbers = #tpu.dot_dimension_numbers<[1], [0], [0], [1], [0, 0, 1, 1], [], []>} : vector<8x128xf32>, vector<128x128xf32>, vector<8x128xf32> -> vector<8x128xf32>
    %c1_485 = arith.constant 1 : index
    %c0_486 = arith.constant 0 : index
    %c0_487 = arith.constant 0 : index
    %713 = vector.load %arg12[%c1_485, %c0_486, %c0_487] : memref<2x1x128xf32, #tpu.memory_space<vmem>>, vector<1x1x128xf32>
    %714 = vector.shape_cast %713 : vector<1x1x128xf32> to vector<1x128xf32>
    %715 = vector.broadcast %714 : vector<1x128xf32> to vector<8x128xf32>
    %716 = arith.addf %712, %715 : vector<8x128xf32>
    %c1_488 = arith.constant 1 : index
    %c0_489 = arith.constant 0 : index
    %c0_490 = arith.constant 0 : index
    %717 = vector.load %arg11[%c1_488, %c0_489, %c0_490] : memref<2x128x128xf32, #tpu.memory_space<vmem>>, vector<1x128x128xf32>
    %718 = vector.shape_cast %717 : vector<1x128x128xf32> to vector<128x128xf32>
    %cst_491 = arith.constant dense<0.000000e+00> : vector<8x128xf32>
    %719 = tpu.matmul %684, %718, %cst_491 {dimension_numbers = #tpu.dot_dimension_numbers<[1], [0], [0], [1], [0, 0, 1, 1], [], []>} : vector<8x128xf32>, vector<128x128xf32>, vector<8x128xf32> -> vector<8x128xf32>
    %720 = arith.addf %716, %719 : vector<8x128xf32>
    %c1_492 = arith.constant 1 : index
    %c0_493 = arith.constant 0 : index
    %c0_494 = arith.constant 0 : index
    %721 = vector.load %arg13[%c1_492, %c0_493, %c0_494] : memref<2x1x128xf32, #tpu.memory_space<vmem>>, vector<1x1x128xf32>
    %722 = vector.shape_cast %721 : vector<1x1x128xf32> to vector<1x128xf32>
    %723 = vector.broadcast %722 : vector<1x128xf32> to vector<8x128xf32>
    %724 = arith.addf %720, %723 : vector<8x128xf32>
    %725 = math.tanh %724 : vector<8x128xf32>
    %726 = vector.broadcast %284 : vector<1x128xf32> to vector<8x128xf32>
    %727 = arith.mulf %725, %726 : vector<8x128xf32>
    %cst_495 = arith.constant dense<0.000000e+00> : vector<8xf32>
    %728 = vector.multi_reduction <add>, %727, %cst_495 [1] : vector<8x128xf32> to vector<8xf32>
    %729 = vector.shape_cast %728 : vector<8xf32> to vector<8x1xf32>
    %730 = vector.broadcast %285 : vector<1x1xf32> to vector<8x1xf32>
    %731 = arith.addf %729, %730 : vector<8x1xf32>
    %cst_496 = arith.constant -1.000200e+04 : f32
    %732 = vector.broadcast %cst_496 : f32 to vector<8x1xf32>
    %733 = arith.cmpf oeq, %731, %732 : vector<8x1xf32>
    %734 = arith.ori %693, %733 : vector<8x1xi1>
    %cst_497 = arith.constant -1.000100e+04 : f32
    %735 = vector.broadcast %cst_497 : f32 to vector<8x1xf32>
    %c0_498 = arith.constant 0 : index
    %c0_499 = arith.constant 0 : index
    %736 = vector.load %arg20[%c0_498, %c0_499] : memref<8x12xf32, #tpu.memory_space<vmem>>, vector<8x1xf32>
    tpu.vector_store %arg20[%c0_498, %c0_499], %735 {strides = array<i32>} : memref<8x12xf32, #tpu.memory_space<vmem>>, vector<8x1xf32>,
    %cst_500 = arith.constant -1.000200e+04 : f32
    %737 = vector.broadcast %cst_500 : f32 to vector<8x1xf32>
    %738 = arith.select %734, %731, %737 : vector<8x1xi1>, vector<8x1xf32>
    %c0_501 = arith.constant 0 : index
    %c11 = arith.constant 11 : index
    %739 = vector.load %arg20[%c0_501, %c11] : memref<8x12xf32, #tpu.memory_space<vmem>>, vector<8x1xf32>
    tpu.vector_store %arg20[%c0_501, %c11], %738 {strides = array<i32>} : memref<8x12xf32, #tpu.memory_space<vmem>>, vector<8x1xf32>,
    return
  }
}

</mosaic_0001>

<bundles_post_ra>
// kernel: recurrent_approximator_forward.1
= control target key start
LH: loop header
LB: loop body
LE: loop exit
PB: predicated region body
PF: predicated region fallthrough
CT: control target
= control target key end

     0   :  { %s12141_s0 = inlined_call_operand.vmem [shape: f32[8,8], index: 0, kind: input, shape index: {}]   ;;  %s12142_s1 = inlined_call_operand.vmem [shape: f32[8,11], index: 1, kind: input, shape index: {}]   ;;  %s12143_s2 = inlined_call_operand.vmem [shape: f32[1,128], index: 2, kind: input, shape index: {}]   ;;  %s12144_s3 = inlined_call_operand.vmem [shape: f32[1,128], index: 3, kind: input, shape index: {}]   ;;  %s12145_s4 = inlined_call_operand.hbm [shape: f32[2,128,128], index: 4, kind: input, shape index: {}]   ;;  %s12146_s5 = inlined_call_operand.hbm [shape: f32[2,128,128], index: 5, kind: input, shape index: {}]   ;;  %s12147_s6 = inlined_call_operand.vmem [shape: f32[2,1,128], index: 6, kind: input, shape index: {}]   ;;  %s12148_s7 = inlined_call_operand.vmem [shape: f32[2,1,128], index: 7, kind: input, shape index: {}]   ;;  %s12149_s8 = inlined_call_operand.vmem [shape: f32[1,128], index: 8, kind: input, shape index: {}]   ;;  %s12150_s9 = inlined_call_operand.vmem [shape: f32[1,128], index: 9, kind: input, shape index: {}]   ;;  %s12151_s10 = inlined_call_operand.hbm [shape: f32[2,128,128], index: 10, kind: input, shape index: {}]   ;;  %s12152_s11 = inlined_call_operand.hbm [shape: f32[2,128,128], index: 11, kind: input, shape index: {}]   ;;  %s12153_s12 = inlined_call_operand.vmem [shape: f32[2,1,128], index: 12, kind: input, shape index: {}]   ;;  %s12154_s13 = inlined_call_operand.vmem [shape: f32[2,1,128], index: 13, kind: input, shape index: {}]   ;;  %s12155_s14 = inlined_call_operand.vmem [shape: f32[1,128], index: 14, kind: input, shape index: {}]   ;;  %s12156_s15 = inlined_call_operand.<no memory space> [shape: f32[1,1], index: 15, kind: input, shape index: {}]   ;;  %s12157_s16 = inlined_call_operand.hbm [shape: f32[128,128], index: 16, kind: input, shape index: {}]   ;;  %s12158_s17 = inlined_call_operand.vmem [shape: f32[1,128], index: 17, kind: input, shape index: {}]   ;;  %s12159_s18 = inlined_call_operand.vmem [shape: f32[1,128], index: 18, kind: input, shape index: {}]   ;;  %s12160_s20 = inlined_call_operand.vmem [shape: f32[8,12], index: 20, kind: output, shape index: {0}]   ;;  %s12161_s21 = inlined_call_operand.vmem [shape: f32[8,1], index: 21, kind: output, shape index: {1}]   ;;  %s12162_s19 = inlined_call_operand.<no memory space> [shape: f32[1,1], index: 19, kind: input, shape index: {}]  }
   0x1   :  { %12168 = sst [smem:[#allocation15_spill]] %s12141_s0  ;;  %v27_v0 = vstv %s12156_s15  ;;  %v29_v1 = vstv %s12162_s19 }
   0x2   :  { %12169 = sst [smem:[#allocation16_spill]] %s12142_s1  ;;  %28 = vst [vmem:[#allocation2] sm:$0x1] %v27_v0  ;;  %30 = vst [vmem:[#allocation3] sm:$0x1] %v29_v1 }
   0x3   :  { %12170 = sst [smem:[#allocation17_spill]] %s12143_s2 }
   0x4   :  { %12171 = sst [smem:[#allocation18_spill]] %s12144_s3 }
   0x5   :  { %12172 = sst [smem:[#allocation19_spill]] %s12145_s4 }
   0x6   :  { %12173 = sst [smem:[#allocation20_spill]] %s12146_s5 }
   0x7   :  { %31 = vsyncpa [#allocation5], 0 }
   0x8   :  { %32 = vsyncpa [#allocation7], 0 }
   0x9   :  { %33 = vsyncpa [#allocation10], 0  ;;  %s10259_s3 = smov [#allocation6]   ;;  %s10260_s29 = smov [#allocation9]  }
   0xa   :  { %s59_s28 = sshll.u32 %s10259_s3, 4  ;;  %s91_s0 = sshll.u32 %s10260_s29, 4  ;;  %s60_s28 = int_to_ptr.vmem [resolvable:$true] %s59_s28  ;;  %s10407_s0 = int_to_ptr.vmem [resolvable:$true] %s91_s0 }
   0xb   :  { %s12174_s5 = sld [smem:[#allocation20_spill]] }
  0x11   :  { %s10143_s15 = scalar_lea.hbm %s12174_s5, 4096 }
  0x12   :  { %p10144_p0 = scmp.ne.s32.totalorder %s12174_s5, %s10143_s15  ;;  %p10147_p1 = scmp.lt.u32.totalorder %s10143_s15, %s12174_s5 }
  0x14   :  { %p10149_p2 = pnand %p10147_p1, %p10144_p0 }
  0x16   :  { %10152 = shalt.err (!%p10149_p2)
}
  0x17   :  { %s10153_s24 = scalar_lea.vmem %s60_s28, 4096  ;;  %p10158_p4 = scmp.lt.s32.totalorder %s60_s28, %s60_s28 }
  0x18   :  { %p10154_p3 = scmp.ne.s32.totalorder %s60_s28, %s10153_s24  ;;  %p10159_p5 = scmp.lt.s32.totalorder %s10153_s24, %s10153_s24 }
  0x1a   :  { %p10160_p6 = por %p10159_p5, %p10158_p4 }
  0x1c   :  { %p10161_p7 = pnand %p10160_p6, %p10154_p3 }
  0x1e   :  { %10164 = shalt.err (!%p10161_p7)
}
  0x1f   :  { %s10261_s2 = smov 128   ;;  %s10262_s25 = smov 8  }
  0x20   :  { %65 = dma.hbm_to_vmem [thread:$0]  %s12174_s5, 4096, %s60_s28, [#allocation7], %s10261_s2, %s10261_s2, %s10262_s25  }
  0x21   :  { %s10165_s4 = scalar_lea.hbm %s12152_s11, 4096 }
  0x22   :  { %p10166_p8 = scmp.ne.s32.totalorder %s12152_s11, %s10165_s4  ;;  %p10169_p9 = scmp.lt.u32.totalorder %s10165_s4, %s12152_s11 }
  0x24   :  { %p10171_p10 = pnand %p10169_p9, %p10166_p8 }
  0x26   :  { %10174 = shalt.err (!%p10171_p10)
}
  0x27   :  { %s10175_s19 = scalar_lea.vmem %s10407_s0, 4096  ;;  %p10180_p12 = scmp.lt.s32.totalorder %s10407_s0, %s10407_s0 }
  0x28   :  { %p10176_p11 = scmp.ne.s32.totalorder %s10407_s0, %s10175_s19  ;;  %p10181_p13 = scmp.lt.s32.totalorder %s10175_s19, %s10175_s19 }
  0x2a   :  { %p10182_p0 = por %p10181_p13, %p10180_p12 }
  0x2c   :  { %p10183_p1 = pnand %p10182_p0, %p10176_p11 }
  0x2e   :  { %10186 = shalt.err (!%p10183_p1)
}
  0x2f   :  { %97 = dma.hbm_to_vmem [thread:$0]  %s12152_s11, 4096, %s10407_s0, [#allocation10], %s10261_s2, %s10261_s2, %s10262_s25  }
  0x30   :  { %s10263_s1 = smov [#allocation4]   ;;  %s10264_s26 = smov [#allocation8]  }
  0x31   :  { %s47_s24 = sshll.u32 %s10263_s1, 4  ;;  %s79_s27 = sshll.u32 %s10264_s26, 4  ;;  %s48_s24 = int_to_ptr.vmem [resolvable:$true] %s47_s24  ;;  %s10444_s27 = int_to_ptr.vmem [resolvable:$true] %s79_s27 }
  0x32   :  { %s12175_s4 = sld [smem:[#allocation19_spill]] }
  0x38   :  { %s10187_s30 = scalar_lea.hbm %s12175_s4, 4096 }
  0x39   :  { %p10188_p2 = scmp.ne.s32.totalorder %s12175_s4, %s10187_s30  ;;  %p10191_p3 = scmp.lt.u32.totalorder %s10187_s30, %s12175_s4 }
  0x3b   :  { %p10193_p4 = pnand %p10191_p3, %p10188_p2 }
  0x3d   :  { %10196 = shalt.err (!%p10193_p4)
}
  0x3e   :  { %s10197_s11 = scalar_lea.vmem %s48_s24, 4096  ;;  %p10202_p6 = scmp.lt.s32.totalorder %s48_s24, %s48_s24 }
  0x3f   :  { %p10198_p5 = scmp.ne.s32.totalorder %s48_s24, %s10197_s11  ;;  %p10203_p7 = scmp.lt.s32.totalorder %s10197_s11, %s10197_s11 }
  0x41   :  { %p10204_p8 = por %p10203_p7, %p10202_p6 }
  0x43   :  { %p10205_p9 = pnand %p10204_p8, %p10198_p5 }
  0x45   :  { %10208 = shalt.err (!%p10205_p9)
}
  0x46   :  { %53 = dma.hbm_to_vmem [thread:$0]  %s12175_s4, 4096, %s48_s24, [#allocation5], %s10261_s2, %s10261_s2, %s10262_s25  }
  0x47   :  { %s10209_s26 = scalar_lea.hbm %s12151_s10, 4096 }
  0x48   :  { %p10210_p10 = scmp.ne.s32.totalorder %s12151_s10, %s10209_s26  ;;  %p10213_p11 = scmp.lt.u32.totalorder %s10209_s26, %s12151_s10 }
  0x4a   :  { %p10215_p12 = pnand %p10213_p11, %p10210_p10 }
  0x4c   :  { %10218 = shalt.err (!%p10215_p12)
}
  0x4d   :  { %s10219_s22 = scalar_lea.vmem %s10444_s27, 4096  ;;  %p10224_p0 = scmp.lt.s32.totalorder %s10444_s27, %s10444_s27 }
  0x4e   :  { %p10220_p13 = scmp.ne.s32.totalorder %s10444_s27, %s10219_s22  ;;  %p10225_p1 = scmp.lt.s32.totalorder %s10219_s22, %s10219_s22 }
  0x50   :  { %p10226_p2 = por %p10225_p1, %p10224_p0 }
  0x52   :  { %p10227_p3 = pnand %p10226_p2, %p10220_p13 }
  0x54   :  { %10230 = shalt.err (!%p10227_p3)
}
  0x55   :  { %85 = dma.hbm_to_vmem [thread:$0]  %s12151_s10, 4096, %s10444_s27, [#allocation7], %s10261_s2, %s10261_s2, %s10262_s25  }
  0x56   :  { %s10265_s23 = smov [#allocation11]   ;;  %s10231_s28 = scalar_lea.hbm %s12157_s16, 2048 }
  0x57   :  { %s111_s19 = sshll.u32 %s10265_s23, 4  ;;  %p10232_p4 = scmp.ne.s32.totalorder %s12157_s16, %s10231_s28  ;;  %s112_s19 = int_to_ptr.vmem [resolvable:$true] %s111_s19 }
  0x58   :  { %p10235_p5 = scmp.lt.u32.totalorder %s10231_s28, %s12157_s16 }
  0x5a   :  { %p10237_p6 = pnand %p10235_p5, %p10232_p4 }
  0x5c   :  { %10240 = shalt.err (!%p10237_p6)
}
  0x5d   :  { %s10241_s29 = scalar_lea.vmem %s112_s19, 2048  ;;  %p10246_p8 = scmp.lt.s32.totalorder %s112_s19, %s112_s19 }
  0x5e   :  { %p10242_p7 = scmp.ne.s32.totalorder %s112_s19, %s10241_s29  ;;  %p10247_p9 = scmp.lt.s32.totalorder %s10241_s29, %s10241_s29 }
  0x60   :  { %p10248_p10 = por %p10247_p9, %p10246_p8 }
  0x62   :  { %p10249_p11 = pnand %p10248_p10, %p10242_p7 }
  0x64   :  { %10252 = shalt.err (!%p10249_p11)
}
  0x65   :  { %117 = dma.hbm_to_vmem [thread:$0]  %s12157_s16, 2048, %s112_s19, [#allocation10], %s10261_s2, %s10261_s2, %s10262_s25  }
  0x66   :  { %10253 = dma.done.wait [#allocation5], 4096  }
  0x67   :  { %10254 = vsyncadd [#allocation5], 4294963200 }
  0x68   :  { %10255 = dma.done.wait [#allocation7], 8192  }
  0x69   :  { %10256 = vsyncadd [#allocation7], 4294959104 }
  0x6a   :  { %10257 = dma.done.wait [#allocation10], 6144  }
  0x6b   :  { %10258 = vsyncadd [#allocation10], 4294961152  ;;  %v10266_v2 = vmov 0.0|0.0   ;;  %vm10267_vm0 = vmmov 0   ;;  %v10268_v3 = vmov 0.0   ;;  %v10269_v4 = vmov 0  }
  0x6c   :  { %8613 = vmatprep.subr.bf16.mxu0 %v10266_v2  ;;  %6615 = vmatprep.mubr.msk.f32.mxu0 %vm10267_vm0, %v10268_v3  ;;  %v161_v5 = vld [vmem:[#allocation6] sm:$0xff]  ;;  %v162_v6 = vld [vmem:[#allocation6 + $0x8] sm:$0xff]  ;;  %v163_v7 = vld [vmem:[#allocation6 + $0x10] sm:$0xff]  ;;  %s12176_s30 = sld [smem:[#allocation15_spill]]  ;;  %s12177_s24 = sld [smem:[#allocation17_spill]]  ;;  %vm2127_vm2 = vcmask 7168  }
  0x6d   :  { %10037 = vset.pattern.permute.xlu0 %v10269_v4  ;;  %8637 = vmatprep.subr.bf16.mxu1 %v10266_v2  ;;  %v10503_v8 = vpack.c.bf16 %v162_v6, %v161_v5  ;;  %v164_v9 = vld [vmem:[#allocation6 + $0x18] sm:$0xff]  ;;  %v165_v11 = vld [vmem:[#allocation6 + $0x20] sm:$0xff]  ;;  %v166_v12 = vld [vmem:[#allocation6 + $0x28] sm:$0xff]  ;;  %s12178_s19 = sld [smem:[#allocation18_spill]]  ;;  %s12179_s16 = sld [smem:[#allocation16_spill]]  ;;  %vm2463_vm3 = vcmask 15368  }
  0x6e   :  { %6650 = vmatprep.mubr.msk.f32.mxu1 %vm10267_vm0, %v10268_v3  ;;  %v10506_v10 = vpack.c.bf16 %v164_v9, %v163_v7  ;;  %v258_v14 = vld [vmem:[#allocation4 + $0x80] sm:$0xff]  ;;  %v259_v15 = vld [vmem:[#allocation4 + $0x88] sm:$0xff]  ;;  %v10516_v16 = vpack.c.bf16 %v166_v12, %v165_v11  ;;  %v260_v18 = vld [vmem:[#allocation4 + $0x90] sm:$0xff]  ;;  %s10280_s4 = smov 1   ;;  %vm2768_vm7 = vcmask 23568   ;;  %s10282_s28 = smov 3  }
  0x6f   :  { %8615 = vmatpush3.bf16.msra.mxu0 %v10503_v8  ;;  %v10518_v17 = vpack.c.bf16 %v259_v15, %v258_v14  ;;  %v261_v19 = vld [vmem:[#allocation4 + $0x98] sm:$0xff]  ;;  %v167_v20 = vld [vmem:[#allocation6 + $0x30] sm:$0xff]  ;;  %v262_v23 = vld [vmem:[#allocation4 + $0xa0] sm:$0xff]  ;;  %vm3073_vm10 = vcmask 31768   ;;  %s10283_s26 = smov 4   ;;  %vm3378_vm13 = vcmask 39968  }
  0x70   :  { %8616 = vmatprep.subr.bf16.mxu0 %v10266_v2  ;;  %v168_v21 = vld [vmem:[#allocation6 + $0x38] sm:$0xff]  ;;  %v10522_v22 = vpack.c.bf16 %v261_v19, %v260_v18  ;;  %v263_v24 = vld [vmem:[#allocation4 + $0xa8] sm:$0xff]  ;;  %v169_v26 = vld [vmem:[#allocation6 + $0x40] sm:$0xff]  ;;  %s10286_s0 = smov 7   ;;  %s10289_s29 = smov 11  }
  0x71   :  { %8639 = vmatpush3.bf16.msra.mxu1 %v10518_v17  ;;  %v10526_v25 = vpack.c.bf16 %v168_v21, %v167_v20  ;;  %v170_v27 = vld [vmem:[#allocation6 + $0x48] sm:$0xff]  ;;  %v10530_v28 = vpack.c.bf16 %v263_v24, %v262_v23  ;;  %v264_v29 = vld [vmem:[#allocation4 + $0xb0] sm:$0xff]  ;;  %v265_v30 = vld [vmem:[#allocation4 + $0xb8] sm:$0xff]  ;;  %v10270_v23 = vmov 1  }
  0x72   :  { %v10512_v13 = vld [vmem:[%s12176_s30] sm:$0xff]  ;;  %8640 = vmatprep.subr.bf16.mxu1 %v10266_v2  ;;  %v10534_v31 = vpack.c.bf16 %v170_v27, %v169_v26  ;;  %v171_v32 = vld [vmem:[#allocation6 + $0x50] sm:$0xff]  ;;  %v10538_v34 = vpack.c.bf16 %v265_v30, %v264_v29  ;;  %v174_v37 = vld [vmem:[#allocation6 + $0x68] sm:$0xff] }
  0x73   :  { %144 = vperm.xlu0 %10037, %v10512_v13   ;;  %8618 = vmatpush3.bf16.msra.mxu0 %v10506_v10  ;;  %v172_v33 = vld [vmem:[#allocation6 + $0x58] sm:$0xff]  ;;  %v173_v36 = vld [vmem:[#allocation6 + $0x60] sm:$0xff]  ;;  %v175_v39 = vld [vmem:[#allocation6 + $0x70] sm:$0xff] }
  0x74   :  { %8619 = vmatprep.subr.bf16.mxu0 %v10266_v2  ;;  %v10542_v35 = vpack.c.bf16 %v172_v33, %v171_v32  ;;  %v10548_v38 = vpack.c.bf16 %v174_v37, %v173_v36  ;;  %v176_v40 = vld [vmem:[#allocation6 + $0x78] sm:$0xff]  ;;  %v353_v42 = vld [vmem:[#allocation6 + $0x80] sm:$0xff]  ;;  %v354_v43 = vld [vmem:[#allocation6 + $0x88] sm:$0xff] }
  0x75   :  { %8642 = vmatpush3.bf16.msra.mxu1 %v10522_v22  ;;  %v10552_v41 = vpack.c.bf16 %v176_v40, %v175_v39  ;;  %v10556_v44 = vpack.c.bf16 %v354_v43, %v353_v42  ;;  %v355_v45 = vld [vmem:[#allocation6 + $0x90] sm:$0xff]  ;;  %v356_v46 = vld [vmem:[#allocation6 + $0x98] sm:$0xff]  ;;  %v357_v48 = vld [vmem:[#allocation6 + $0xa0] sm:$0xff] }
  0x76   :  { %8643 = vmatprep.subr.bf16.mxu1 %v10266_v2  ;;  %v10561_v47 = vpack.c.bf16 %v356_v46, %v355_v45  ;;  %v358_v49 = vld [vmem:[#allocation6 + $0xa8] sm:$0xff]  ;;  %v359_v51 = vld [vmem:[#allocation6 + $0xb0] sm:$0xff]  ;;  %v360_v52 = vld [vmem:[#allocation6 + $0xb8] sm:$0xff]  ;;  %v10271_v45 = vmov 2  }
  0x77   :  { %8621 = vmatpush3.bf16.msra.mxu0 %v10516_v16  ;;  %v10567_v50 = vpack.c.bf16 %v358_v49, %v357_v48  ;;  %v10571_v53 = vpack.c.bf16 %v360_v52, %v359_v51  ;;  %v266_v54 = vld [vmem:[#allocation4 + $0xc0] sm:$0xff]  ;;  %v267_v55 = vld [vmem:[#allocation4 + $0xc8] sm:$0xff]  ;;  %v268_v60 = vld [vmem:[#allocation4 + $0xd0] sm:$0xff]  ;;  %10038 = vset.pattern.permute.xlu0 %v10270_v23 }
  0x78   :  { %8622 = vmatprep.subr.bf16.mxu0 %v10266_v2  ;;  %v10576_v56 = vpack.c.bf16 %v267_v55, %v266_v54  ;;  %v361_v57 = vld [vmem:[#allocation6 + $0xc0] sm:$0xff]  ;;  %v362_v58 = vld [vmem:[#allocation6 + $0xc8] sm:$0xff]  ;;  %v269_v61 = vld [vmem:[#allocation4 + $0xd8] sm:$0xff]  ;;  %452 = vperm.xlu0 %10038, %v10512_v13  }
  0x79   :  { %8645 = vmatpush3.bf16.msra.mxu1 %v10530_v28  ;;  %v10580_v59 = vpack.c.bf16 %v362_v58, %v361_v57  ;;  %v10582_v62 = vpack.c.bf16 %v269_v61, %v268_v60  ;;  %v363_v63 = vld [vmem:[#allocation6 + $0xd0] sm:$0xff]  ;;  %v364_v0 = vld [vmem:[#allocation6 + $0xd8] sm:$0xff]  ;;  %v270_v5 = vld [vmem:[#allocation4 + $0xe0] sm:$0xff]  ;;  %10039 = vset.pattern.permute.xlu1 %v10271_v45 }
  0x7a   :  { %8646 = vmatprep.subr.bf16.mxu1 %v10266_v2  ;;  %v10588_v1 = vpack.c.bf16 %v364_v0, %v363_v63  ;;  %v271_v6 = vld [vmem:[#allocation4 + $0xe8] sm:$0xff]  ;;  %v365_v7 = vld [vmem:[#allocation6 + $0xe0] sm:$0xff]  ;;  %v272_v12 = vld [vmem:[#allocation4 + $0xf0] sm:$0xff]  ;;  %675 = vperm.xlu1 %10039, %v10512_v13  }
  0x7b   :  { %8624 = vmatpush3.bf16.msra.mxu0 %v10526_v25  ;;  %v10590_v9 = vpack.c.bf16 %v271_v6, %v270_v5  ;;  %v366_v11 = vld [vmem:[#allocation6 + $0xe8] sm:$0xff]  ;;  %v273_v14 = vld [vmem:[#allocation4 + $0xf8] sm:$0xff]  ;;  %v367_v19 = vld [vmem:[#allocation6 + $0xf0] sm:$0xff] }
  0x7c   :  { %8625 = vmatprep.subr.bf16.mxu0 %v10266_v2  ;;  %v10593_v15 = vpack.c.bf16 %v366_v11, %v365_v7  ;;  %v10597_v18 = vpack.c.bf16 %v273_v14, %v272_v12  ;;  %v368_v20 = vld [vmem:[#allocation6 + $0xf8] sm:$0xff]  ;;  %v10272_v11 = vmov 3  }
  0x7d   :  { %8648 = vmatpush3.bf16.msra.mxu1 %v10538_v34  ;;  %v10601_v21 = vpack.c.bf16 %v368_v20, %v367_v19  ;;  %v10632_v26 = vld [vmem:[%s12177_s24] ss:$0 sm:$0xff]  ;;  %v10688_v46 = vld [vmem:[%s12147_s6 + $0x1] ss:$0 sm:$0xff] }
  0x7e   :  { %8649 = vmatprep.subr.bf16.mxu1 %v10266_v2  ;;  %v10638_v29 = vld [vmem:[%s12178_s19] ss:$0 sm:$0xff]  ;;  %v10694_v52 = vld [vmem:[%s12148_s7 + $0x1] ss:$0 sm:$0xff]  ;;  %10040 = vset.pattern.permute.xlu1 %v10272_v11 }
  0x7f   :  { %8627 = vmatpush3.bf16.msra.mxu0 %v10534_v31  ;;  %v10644_v33 = vld [vmem:[%s12148_s7] ss:$0 sm:$0xff]  ;;  %898 = vperm.xlu1 %10040, %v10512_v13  }
  0x80   :  { %8628 = vmatprep.subr.bf16.mxu0 %v10266_v2 }
  0x81   :  { %8651 = vmatpush3.bf16.msra.mxu1 %v10576_v56 }
  0x82   :  { %8652 = vmatprep.subr.bf16.mxu1 %v10266_v2 }
  0x83   :  { %8630 = vmatpush3.bf16.msra.mxu0 %v10542_v35 }
  0x84   :  { %8631 = vmatprep.subr.bf16.mxu0 %v10266_v2 }
  0x85   :  { %8654 = vmatpush3.bf16.msra.mxu1 %v10582_v62 }
  0x86   :  { %8655 = vmatprep.subr.bf16.mxu1 %v10266_v2 }
  0x87   :  { %8633 = vmatpush3.bf16.msra.mxu0 %v10548_v38 }
  0x88   :  { %8634 = vmatprep.subr.bf16.mxu0 %v10266_v2 }
  0x89   :  { %8657 = vmatpush3.bf16.msra.mxu1 %v10590_v9 }
  0x8a   :  { %8658 = vmatprep.subr.bf16.mxu1 %v10266_v2 }
  0x8b   :  { %8636 = vmatpush3.bf16.msra.mxu0 %v10552_v41 }
  0x8c   :  { %8661 = vmatprep.subr.bf16.mxu0 %v10266_v2 }
  0x8d   :  { %8660 = vmatpush3.bf16.msra.mxu1 %v10597_v18 }
  0x8e   :  { %6616 = vmatmul.mubr.f32.vlgmr.msra.gmra.mrb[0].mxu0 %v10268_v3  ;;  %8685 = vmatprep.subr.bf16.mxu1 %v10266_v2 }
  0x8f   :  { %8663 = vmatpush3.bf16.msra.mxu0 %v10556_v44  ;;  %6685 = vmatprep.mubr.msk.f32.mxu0 %vm10267_vm0, %v10268_v3 }
  0x90   :  { %8664 = vmatprep.subr.bf16.mxu0 %v10266_v2 }
  0x93   :  { %8666 = vmatpush3.bf16.msra.mxu0 %v10561_v47 }
  0x94   :  { %8667 = vmatprep.subr.bf16.mxu0 %v10266_v2 }
  0x97   :  { %8669 = vmatpush3.bf16.msra.mxu0 %v10567_v50 }
  0x98   :  { %8670 = vmatprep.subr.bf16.mxu0 %v10266_v2 }
  0x9b   :  { %8672 = vmatpush3.bf16.msra.mxu0 %v10571_v53 }
  0x9c   :  { %8673 = vmatprep.subr.bf16.mxu0 %v10266_v2 }
  0x9f   :  { %8675 = vmatpush3.bf16.msra.mxu0 %v10580_v59 }
  0xa0   :  { %8676 = vmatprep.subr.bf16.mxu0 %v10266_v2 }
  0xa3   :  { %8678 = vmatpush3.bf16.msra.mxu0 %v10588_v1 }
  0xa4   :  { %8679 = vmatprep.subr.bf16.mxu0 %v10266_v2 }
  0xa7   :  { %8681 = vmatpush3.bf16.msra.mxu0 %v10593_v15 }
  0xa8   :  { %8682 = vmatprep.subr.bf16.mxu0 %v10266_v2 }
  0xab   :  { %8684 = vmatpush3.bf16.msra.mxu0 %v10601_v21 }
  0xac   :  { %8709 = vmatprep.subr.bf16.mxu0 %v10266_v2 }
  0xae   :  { %6686 = vmatmul.mubr.f32.vlgmr.msra.gmra.mrb[2].mxu0 %v10268_v3 }
  0xaf   :  { %8711 = vmatpush3.bf16.msra.mxu0 %v10518_v17  ;;  %6755 = vmatprep.mubr.msk.f32.mxu0 %vm10267_vm0, %v10268_v3 }
  0xb0   :  { %8712 = vmatprep.subr.bf16.mxu0 %v10266_v2 }
  0xb3   :  { %8714 = vmatpush3.bf16.msra.mxu0 %v10522_v22 }
  0xb4   :  { %8715 = vmatprep.subr.bf16.mxu0 %v10266_v2 }
  0xb7   :  { %8717 = vmatpush3.bf16.msra.mxu0 %v10530_v28 }
  0xb8   :  { %8718 = vmatprep.subr.bf16.mxu0 %v10266_v2 }
  0xbb   :  { %8720 = vmatpush3.bf16.msra.mxu0 %v10538_v34 }
  0xbc   :  { %8721 = vmatprep.subr.bf16.mxu0 %v10266_v2 }
  0xbf   :  { %8723 = vmatpush3.bf16.msra.mxu0 %v10576_v56 }
  0xc0   :  { %8724 = vmatprep.subr.bf16.mxu0 %v10266_v2 }
  0xc3   :  { %8726 = vmatpush3.bf16.msra.mxu0 %v10582_v62 }
  0xc4   :  { %8727 = vmatprep.subr.bf16.mxu0 %v10266_v2 }
  0xc7   :  { %8729 = vmatpush3.bf16.msra.mxu0 %v10590_v9 }
  0xc8   :  { %8730 = vmatprep.subr.bf16.mxu0 %v10266_v2 }
  0xcb   :  { %8732 = vmatpush3.bf16.msra.mxu0 %v10597_v18 }
  0xcc   :  { %8757 = vmatprep.subr.bf16.mxu0 %v10266_v2 }
  0xf2   :  { %v145_v24 = vpop.permute.xlu0 %144 }
  0xf3   :  { %v153_v27 = vmul.f32 %v10632_v26, %v145_v24 }
  0xf5   :  { %v160_v30 = vadd.f32 %v10638_v29, %v153_v27 }
  0xf7   :  { %v453_v58 = vpop.permute.xlu0 %452 }
  0xf8   :  { %v455_v60 = vmul.f32 %v10632_v26, %v453_v58 }
  0xfa   :  { %v456_v61 = vadd.f32 %v10638_v29, %v455_v60 }
 0x161   :  { %v243_v32 = vpop.f32.mrb[0].mxu0 }
 0x162   :  { %v247_v36 = vadd.f32 %v243_v32, %v160_v30  ;;  %v6617_v37 = vpop.f32.mrb[1].mxu0 }
 0x164   :  { %v255_v39 = vadd.f32 %v10644_v33, %v247_v36  ;;  %v676_v36 = vpop.permute.xlu1 %675 }
 0x165   :  { %v678_v37 = vmul.f32 %v10632_v26, %v676_v36 }
 0x166   :  { %10057 = vtanh.f32 %v255_v39 }
 0x167   :  { %v679_v39 = vadd.f32 %v10638_v29, %v678_v37 }
 0x170   :  { %v10058_v40 = vpop.eup %10057 }
 0x171   :  { %6651 = vmatmul.mubr.f32.vlgmr.msra.gmra.mrb[0].mxu1 %v10058_v40 }
 0x172   :  { %8687 = vmatpush3.bf16.msra.mxu1 %v10503_v8  ;;  %6720 = vmatprep.mubr.msk.f32.mxu1 %vm10267_vm0, %v10268_v3 }
 0x173   :  { %8688 = vmatprep.subr.bf16.mxu1 %v10266_v2 }
 0x176   :  { %8690 = vmatpush3.bf16.msra.mxu1 %v10506_v10 }
 0x177   :  { %8691 = vmatprep.subr.bf16.mxu1 %v10266_v2 }
 0x17a   :  { %8693 = vmatpush3.bf16.msra.mxu1 %v10516_v16 }
 0x17b   :  { %8694 = vmatprep.subr.bf16.mxu1 %v10266_v2 }
 0x17e   :  { %8696 = vmatpush3.bf16.msra.mxu1 %v10526_v25 }
 0x17f   :  { %8697 = vmatprep.subr.bf16.mxu1 %v10266_v2 }
 0x181   :  { %v435_v42 = vpop.f32.mrb[2].mxu0 }
 0x182   :  { %8699 = vmatpush3.bf16.msra.mxu1 %v10534_v31  ;;  %v6687_v43 = vpop.f32.mrb[3].mxu0 }
 0x183   :  { %8700 = vmatprep.subr.bf16.mxu1 %v10266_v2 }
 0x186   :  { %8702 = vmatpush3.bf16.msra.mxu1 %v10542_v35 }
 0x187   :  { %8703 = vmatprep.subr.bf16.mxu1 %v10266_v2 }
 0x18a   :  { %8705 = vmatpush3.bf16.msra.mxu1 %v10548_v38 }
 0x18b   :  { %8706 = vmatprep.subr.bf16.mxu1 %v10266_v2 }
 0x18e   :  { %8708 = vmatpush3.bf16.msra.mxu1 %v10552_v41 }
 0x18f   :  { %8733 = vmatprep.subr.bf16.mxu1 %v10266_v2 }
 0x191   :  { %6721 = vmatmul.mubr.f32.vlgmr.msra.gmra.mrb[2].mxu1 %v10058_v40 }
 0x192   :  { %8735 = vmatpush3.bf16.msra.mxu1 %v10556_v44  ;;  %6790 = vmatprep.mubr.msk.f32.mxu1 %vm10267_vm0, %v10268_v3 }
 0x193   :  { %8736 = vmatprep.subr.bf16.mxu1 %v10266_v2 }
 0x196   :  { %8738 = vmatpush3.bf16.msra.mxu1 %v10561_v47 }
 0x197   :  { %8739 = vmatprep.subr.bf16.mxu1 %v10266_v2 }
 0x19a   :  { %8741 = vmatpush3.bf16.msra.mxu1 %v10567_v50 }
 0x19b   :  { %8742 = vmatprep.subr.bf16.mxu1 %v10266_v2 }
 0x19e   :  { %8744 = vmatpush3.bf16.msra.mxu1 %v10571_v53 }
 0x19f   :  { %8745 = vmatprep.subr.bf16.mxu1 %v10266_v2 }
 0x1a2   :  { %8747 = vmatpush3.bf16.msra.mxu1 %v10580_v59 }
 0x1a3   :  { %8748 = vmatprep.subr.bf16.mxu1 %v10266_v2 }
 0x1a6   :  { %8750 = vmatpush3.bf16.msra.mxu1 %v10588_v1 }
 0x1a7   :  { %8751 = vmatprep.subr.bf16.mxu1 %v10266_v2 }
 0x1aa   :  { %8753 = vmatpush3.bf16.msra.mxu1 %v10593_v15 }
 0x1ab   :  { %8754 = vmatprep.subr.bf16.mxu1 %v10266_v2 }
 0x1ae   :  { %8756 = vmatpush3.bf16.msra.mxu1 %v10601_v21 }
 0x1af   :  { %8781 = vmatprep.subr.bf16.mxu1 %v10266_v2 }
 0x244   :  { %v348_v48 = vpop.f32.mrb[0].mxu1 }
 0x245   :  { %v349_v49 = vadd.f32 %v10688_v46, %v348_v48  ;;  %v6652_v51 = vpop.f32.mrb[1].mxu1 }
 0x246   :  { %v10273_v51 = vmov 4  }
 0x247   :  { %v439_v54 = vadd.f32 %v435_v42, %v349_v49  ;;  %10041 = vset.pattern.permute.xlu1 %v10273_v51 }
 0x248   :  { %1121 = vperm.xlu1 %10041, %v10512_v13  }
 0x249   :  { %v448_v55 = vadd.f32 %v10694_v52, %v439_v54 }
 0x24b   :  { %10059 = vtanh.f32 %v448_v55 }
 0x255   :  { %v10697_v57 = vpop.eup %10059 }
 0x256   :  { %6791 = vmatmul.mubr.f32.vlgmr.msra.gmra.mrb[4].mxu1 %v10697_v57 }
 0x257   :  { %8783 = vmatpush3.bf16.msra.mxu1 %v10518_v17  ;;  %6860 = vmatprep.mubr.msk.f32.mxu1 %vm10267_vm0, %v10268_v3 }
 0x258   :  { %8784 = vmatprep.subr.bf16.mxu1 %v10266_v2 }
 0x25b   :  { %8786 = vmatpush3.bf16.msra.mxu1 %v10522_v22 }
 0x25c   :  { %8787 = vmatprep.subr.bf16.mxu1 %v10266_v2 }
 0x25f   :  { %8789 = vmatpush3.bf16.msra.mxu1 %v10530_v28 }
 0x260   :  { %8790 = vmatprep.subr.bf16.mxu1 %v10266_v2 }
 0x263   :  { %8792 = vmatpush3.bf16.msra.mxu1 %v10538_v34 }
 0x264   :  { %v523_v63 = vpop.f32.mrb[2].mxu1  ;;  %8793 = vmatprep.subr.bf16.mxu1 %v10266_v2 }
 0x265   :  { %v527_v0 = vadd.f32 %v523_v63, %v456_v61  ;;  %v6722_v5 = vpop.f32.mrb[3].mxu1 }
 0x267   :  { %v528_v6 = vadd.f32 %v10644_v33, %v527_v0  ;;  %8795 = vmatpush3.bf16.msra.mxu1 %v10576_v56 }
 0x268   :  { %8796 = vmatprep.subr.bf16.mxu1 %v10266_v2 }
 0x269   :  { %10061 = vtanh.f32 %v528_v6 }
 0x26b   :  { %8798 = vmatpush3.bf16.msra.mxu1 %v10582_v62 }
 0x26c   :  { %8799 = vmatprep.subr.bf16.mxu1 %v10266_v2 }
 0x26f   :  { %8801 = vmatpush3.bf16.msra.mxu1 %v10590_v9 }
 0x270   :  { %8802 = vmatprep.subr.bf16.mxu1 %v10266_v2 }
 0x273   :  { %v10062_v7 = vpop.eup %10061  ;;  %8804 = vmatpush3.bf16.msra.mxu1 %v10597_v18 }
 0x274   :  { %6756 = vmatmul.mubr.f32.vlgmr.msra.gmra.mrb[4].mxu0 %v10062_v7  ;;  %8829 = vmatprep.subr.bf16.mxu1 %v10266_v2 }
 0x275   :  { %8759 = vmatpush3.bf16.msra.mxu0 %v10503_v8  ;;  %6825 = vmatprep.mubr.msk.f32.mxu0 %vm10267_vm0, %v10268_v3 }
 0x276   :  { %8760 = vmatprep.subr.bf16.mxu0 %v10266_v2 }
 0x279   :  { %8762 = vmatpush3.bf16.msra.mxu0 %v10506_v10 }
 0x27a   :  { %8763 = vmatprep.subr.bf16.mxu0 %v10266_v2 }
 0x27d   :  { %8765 = vmatpush3.bf16.msra.mxu0 %v10516_v16 }
 0x27e   :  { %8766 = vmatprep.subr.bf16.mxu0 %v10266_v2 }
 0x281   :  { %8768 = vmatpush3.bf16.msra.mxu0 %v10526_v25 }
 0x282   :  { %8769 = vmatprep.subr.bf16.mxu0 %v10266_v2 }
 0x285   :  { %8771 = vmatpush3.bf16.msra.mxu0 %v10534_v31 }
 0x286   :  { %8772 = vmatprep.subr.bf16.mxu0 %v10266_v2 }
 0x289   :  { %8774 = vmatpush3.bf16.msra.mxu0 %v10542_v35 }
 0x28a   :  { %8775 = vmatprep.subr.bf16.mxu0 %v10266_v2 }
 0x28d   :  { %8777 = vmatpush3.bf16.msra.mxu0 %v10548_v38 }
 0x28e   :  { %8778 = vmatprep.subr.bf16.mxu0 %v10266_v2 }
 0x291   :  { %8780 = vmatpush3.bf16.msra.mxu0 %v10552_v41 }
 0x292   :  { %8805 = vmatprep.subr.bf16.mxu0 %v10266_v2 }
 0x294   :  { %6826 = vmatmul.mubr.f32.vlgmr.msra.gmra.mrb[6].mxu0 %v10062_v7 }
 0x295   :  { %8807 = vmatpush3.bf16.msra.mxu0 %v10556_v44  ;;  %6895 = vmatprep.mubr.msk.f32.mxu0 %vm10267_vm0, %v10268_v3 }
 0x296   :  { %8808 = vmatprep.subr.bf16.mxu0 %v10266_v2 }
 0x299   :  { %8810 = vmatpush3.bf16.msra.mxu0 %v10561_v47 }
 0x29a   :  { %8811 = vmatprep.subr.bf16.mxu0 %v10266_v2 }
 0x29d   :  { %8813 = vmatpush3.bf16.msra.mxu0 %v10567_v50 }
 0x29e   :  { %8814 = vmatprep.subr.bf16.mxu0 %v10266_v2 }
 0x2a1   :  { %8816 = vmatpush3.bf16.msra.mxu0 %v10571_v53 }
 0x2a2   :  { %8817 = vmatprep.subr.bf16.mxu0 %v10266_v2 }
 0x2a5   :  { %8819 = vmatpush3.bf16.msra.mxu0 %v10580_v59 }
 0x2a6   :  { %8820 = vmatprep.subr.bf16.mxu0 %v10266_v2 }
 0x2a9   :  { %8822 = vmatpush3.bf16.msra.mxu0 %v10588_v1 }
 0x2aa   :  { %8823 = vmatprep.subr.bf16.mxu0 %v10266_v2 }
 0x2ad   :  { %8825 = vmatpush3.bf16.msra.mxu0 %v10593_v15 }
 0x2ae   :  { %8826 = vmatprep.subr.bf16.mxu0 %v10266_v2 }
 0x2b1   :  { %8828 = vmatpush3.bf16.msra.mxu0 %v10601_v21 }
 0x2b2   :  { %8853 = vmatprep.subr.bf16.mxu0 %v10266_v2 }
 0x329   :  { %v666_v12 = vpop.f32.mrb[4].mxu1 }
 0x32a   :  { %v6792_v14 = vpop.f32.mrb[5].mxu1 }
 0x347   :  { %v596_v19 = vpop.f32.mrb[4].mxu0 }
 0x348   :  { %v597_v20 = vadd.f32 %v10688_v46, %v596_v19  ;;  %v6757_v24 = vpop.f32.mrb[5].mxu0 }
 0x34a   :  { %v670_v27 = vadd.f32 %v666_v12, %v597_v20  ;;  %v899_v12 = vpop.permute.xlu1 %898 }
 0x34b   :  { %v901_v14 = vmul.f32 %v10632_v26, %v899_v12 }
 0x34c   :  { %v671_v30 = vadd.f32 %v10694_v52, %v670_v27 }
 0x34e   :  { %10063 = vtanh.f32 %v671_v30 }
 0x358   :  { %v10761_v32 = vpop.eup %10063 }
 0x359   :  { %6896 = vmatmul.mubr.f32.vlgmr.msra.gmra.mrb[8].mxu0 %v10761_v32  ;;  %v673_v5 = vadd.f32 %v10761_v32, %v10697_v57  ;;  %v902_v57 = vadd.f32 %v10638_v29, %v901_v14  ;;  %v10274_v32 = vmov 5  }
 0x35a   :  { %8855 = vmatpush3.bf16.msra.mxu0 %v10518_v17  ;;  %6965 = vmatprep.mubr.msk.f32.mxu0 %vm10267_vm0, %v10268_v3 }
 0x35b   :  { %8856 = vmatprep.subr.bf16.mxu0 %v10266_v2  ;;  %10042 = vset.pattern.permute.xlu0 %v10274_v32 }
 0x35c   :  { %1344 = vperm.xlu0 %10042, %v10512_v13  }
 0x35e   :  { %8858 = vmatpush3.bf16.msra.mxu0 %v10522_v22 }
 0x35f   :  { %8859 = vmatprep.subr.bf16.mxu0 %v10266_v2 }
 0x360   :  { %10045 = vset.pattern.permute.xlu0 %v10269_v4  ;;  %v1122_v4 = vpop.permute.xlu1 %1121 }
 0x362   :  { %8861 = vmatpush3.bf16.msra.mxu0 %v10530_v28 }
 0x363   :  { %8862 = vmatprep.subr.bf16.mxu0 %v10266_v2 }
 0x366   :  { %8864 = vmatpush3.bf16.msra.mxu0 %v10538_v34 }
 0x367   :  { %v746_v40 = vpop.f32.mrb[6].mxu0  ;;  %8865 = vmatprep.subr.bf16.mxu0 %v10266_v2 }
 0x368   :  { %v750_v42 = vadd.f32 %v746_v40, %v679_v39  ;;  %v6827_v43 = vpop.f32.mrb[7].mxu0 }
 0x36a   :  { %v751_v48 = vadd.f32 %v10644_v33, %v750_v42  ;;  %8867 = vmatpush3.bf16.msra.mxu0 %v10576_v56 }
 0x36b   :  { %8868 = vmatprep.subr.bf16.mxu0 %v10266_v2 }
 0x36c   :  { %10065 = vtanh.f32 %v751_v48 }
 0x36e   :  { %8870 = vmatpush3.bf16.msra.mxu0 %v10582_v62 }
 0x36f   :  { %8871 = vmatprep.subr.bf16.mxu0 %v10266_v2 }
 0x372   :  { %8873 = vmatpush3.bf16.msra.mxu0 %v10590_v9 }
 0x373   :  { %8874 = vmatprep.subr.bf16.mxu0 %v10266_v2 }
 0x376   :  { %v10066_v49 = vpop.eup %10065  ;;  %8876 = vmatpush3.bf16.msra.mxu0 %v10597_v18 }
 0x377   :  { %6861 = vmatmul.mubr.f32.vlgmr.msra.gmra.mrb[6].mxu1 %v10066_v49  ;;  %8901 = vmatprep.subr.bf16.mxu0 %v10266_v2 }
 0x378   :  { %8831 = vmatpush3.bf16.msra.mxu1 %v10503_v8  ;;  %6930 = vmatprep.mubr.msk.f32.mxu1 %vm10267_vm0, %v10268_v3 }
 0x379   :  { %8832 = vmatprep.subr.bf16.mxu1 %v10266_v2 }
 0x37c   :  { %8834 = vmatpush3.bf16.msra.mxu1 %v10506_v10 }
 0x37d   :  { %8835 = vmatprep.subr.bf16.mxu1 %v10266_v2 }
 0x380   :  { %8837 = vmatpush3.bf16.msra.mxu1 %v10516_v16 }
 0x381   :  { %8838 = vmatprep.subr.bf16.mxu1 %v10266_v2 }
 0x384   :  { %8840 = vmatpush3.bf16.msra.mxu1 %v10526_v25 }
 0x385   :  { %8841 = vmatprep.subr.bf16.mxu1 %v10266_v2 }
 0x388   :  { %8843 = vmatpush3.bf16.msra.mxu1 %v10534_v31 }
 0x389   :  { %8844 = vmatprep.subr.bf16.mxu1 %v10266_v2 }
 0x38c   :  { %8846 = vmatpush3.bf16.msra.mxu1 %v10542_v35 }
 0x38d   :  { %8847 = vmatprep.subr.bf16.mxu1 %v10266_v2 }
 0x390   :  { %8849 = vmatpush3.bf16.msra.mxu1 %v10548_v38 }
 0x391   :  { %8850 = vmatprep.subr.bf16.mxu1 %v10266_v2 }
 0x394   :  { %8852 = vmatpush3.bf16.msra.mxu1 %v10552_v41 }
 0x395   :  { %8877 = vmatprep.subr.bf16.mxu1 %v10266_v2 }
 0x397   :  { %6931 = vmatmul.mubr.f32.vlgmr.msra.gmra.mrb[8].mxu1 %v10066_v49 }
 0x398   :  { %8879 = vmatpush3.bf16.msra.mxu1 %v10556_v44  ;;  %7000 = vmatprep.mubr.msk.f32.mxu1 %vm10267_vm0, %v10268_v3 }
 0x399   :  { %8880 = vmatprep.subr.bf16.mxu1 %v10266_v2 }
 0x39c   :  { %8882 = vmatpush3.bf16.msra.mxu1 %v10561_v47 }
 0x39d   :  { %8883 = vmatprep.subr.bf16.mxu1 %v10266_v2 }
 0x3a0   :  { %8885 = vmatpush3.bf16.msra.mxu1 %v10567_v50 }
 0x3a1   :  { %8886 = vmatprep.subr.bf16.mxu1 %v10266_v2 }
 0x3a4   :  { %8888 = vmatpush3.bf16.msra.mxu1 %v10571_v53 }
 0x3a5   :  { %8889 = vmatprep.subr.bf16.mxu1 %v10266_v2 }
 0x3a8   :  { %8891 = vmatpush3.bf16.msra.mxu1 %v10580_v59 }
 0x3a9   :  { %8892 = vmatprep.subr.bf16.mxu1 %v10266_v2 }
 0x3ac   :  { %8894 = vmatpush3.bf16.msra.mxu1 %v10588_v1 }
 0x3ad   :  { %8895 = vmatprep.subr.bf16.mxu1 %v10266_v2 }
 0x3b0   :  { %8897 = vmatpush3.bf16.msra.mxu1 %v10593_v15 }
 0x3b1   :  { %8898 = vmatprep.subr.bf16.mxu1 %v10266_v2 }
 0x3b4   :  { %8900 = vmatpush3.bf16.msra.mxu1 %v10601_v21 }
 0x3b5   :  { %8925 = vmatprep.subr.bf16.mxu1 %v10266_v2 }
 0x42c   :  { %v889_v54 = vpop.f32.mrb[8].mxu0 }
 0x42d   :  { %v6897_v55 = vpop.f32.mrb[9].mxu0 }
 0x42e   :  { %v1124_v55 = vmul.f32 %v10632_v26, %v1122_v4 }
 0x44a   :  { %v819_v58 = vpop.f32.mrb[6].mxu1 }
 0x44b   :  { %v820_v60 = vadd.f32 %v10688_v46, %v819_v58  ;;  %v6862_v61 = vpop.f32.mrb[7].mxu1  ;;  %v1125_v58 = vadd.f32 %v10638_v29, %v1124_v55 }
 0x44d   :  { %v893_v63 = vadd.f32 %v889_v54, %v820_v60 }
 0x44f   :  { %v894_v0 = vadd.f32 %v10694_v52, %v893_v63 }
 0x451   :  { %10067 = vtanh.f32 %v894_v0 }
 0x45b   :  { %v10068_v6 = vpop.eup %10067 }
 0x45c   :  { %v10827_v7 = vadd.f32 %v10068_v6, %v673_v5  ;;  %7001 = vmatmul.mubr.f32.vlgmr.msra.gmra.mrb[10].mxu1 %v10068_v6  ;;  %v10275_v6 = vmov 6  }
 0x45d   :  { %8927 = vmatpush3.bf16.msra.mxu1 %v10518_v17  ;;  %7070 = vmatprep.mubr.msk.f32.mxu1 %vm10267_vm0, %v10268_v3 }
 0x45e   :  { %8928 = vmatprep.subr.bf16.mxu1 %v10266_v2  ;;  %10043 = vset.pattern.permute.xlu1 %v10275_v6 }
 0x45f   :  { %1567 = vperm.xlu1 %10043, %v10512_v13   ;;  %v1345_v13 = vpop.permute.xlu0 %1344 }
 0x461   :  { %8930 = vmatpush3.bf16.msra.mxu1 %v10522_v22 }
 0x462   :  { %8931 = vmatprep.subr.bf16.mxu1 %v10266_v2 }
 0x465   :  { %8933 = vmatpush3.bf16.msra.mxu1 %v10530_v28 }
 0x466   :  { %8934 = vmatprep.subr.bf16.mxu1 %v10266_v2 }
 0x469   :  { %8936 = vmatpush3.bf16.msra.mxu1 %v10538_v34 }
 0x46a   :  { %v969_v19 = vpop.f32.mrb[8].mxu1  ;;  %8937 = vmatprep.subr.bf16.mxu1 %v10266_v2 }
 0x46b   :  { %v973_v20 = vadd.f32 %v969_v19, %v902_v57  ;;  %v6932_v24 = vpop.f32.mrb[9].mxu1 }
 0x46d   :  { %v974_v27 = vadd.f32 %v10644_v33, %v973_v20  ;;  %8939 = vmatpush3.bf16.msra.mxu1 %v10576_v56 }
 0x46e   :  { %8940 = vmatprep.subr.bf16.mxu1 %v10266_v2 }
 0x46f   :  { %10069 = vtanh.f32 %v974_v27 }
 0x471   :  { %8942 = vmatpush3.bf16.msra.mxu1 %v10582_v62 }
 0x472   :  { %8943 = vmatprep.subr.bf16.mxu1 %v10266_v2 }
 0x475   :  { %8945 = vmatpush3.bf16.msra.mxu1 %v10590_v9 }
 0x476   :  { %8946 = vmatprep.subr.bf16.mxu1 %v10266_v2 }
 0x479   :  { %v10070_v30 = vpop.eup %10069  ;;  %8948 = vmatpush3.bf16.msra.mxu1 %v10597_v18 }
 0x47a   :  { %6966 = vmatmul.mubr.f32.vlgmr.msra.gmra.mrb[10].mxu0 %v10070_v30  ;;  %8973 = vmatprep.subr.bf16.mxu1 %v10266_v2 }
 0x47b   :  { %8903 = vmatpush3.bf16.msra.mxu0 %v10503_v8  ;;  %7035 = vmatprep.mubr.msk.f32.mxu0 %vm10267_vm0, %v10268_v3 }
 0x47c   :  { %8904 = vmatprep.subr.bf16.mxu0 %v10266_v2 }
 0x47f   :  { %8906 = vmatpush3.bf16.msra.mxu0 %v10506_v10 }
 0x480   :  { %8907 = vmatprep.subr.bf16.mxu0 %v10266_v2 }
 0x483   :  { %8909 = vmatpush3.bf16.msra.mxu0 %v10516_v16 }
 0x484   :  { %8910 = vmatprep.subr.bf16.mxu0 %v10266_v2 }
 0x487   :  { %8912 = vmatpush3.bf16.msra.mxu0 %v10526_v25 }
 0x488   :  { %8913 = vmatprep.subr.bf16.mxu0 %v10266_v2 }
 0x48b   :  { %8915 = vmatpush3.bf16.msra.mxu0 %v10534_v31 }
 0x48c   :  { %8916 = vmatprep.subr.bf16.mxu0 %v10266_v2 }
 0x48f   :  { %8918 = vmatpush3.bf16.msra.mxu0 %v10542_v35 }
 0x490   :  { %8919 = vmatprep.subr.bf16.mxu0 %v10266_v2 }
 0x493   :  { %8921 = vmatpush3.bf16.msra.mxu0 %v10548_v38 }
 0x494   :  { %8922 = vmatprep.subr.bf16.mxu0 %v10266_v2 }
 0x497   :  { %8924 = vmatpush3.bf16.msra.mxu0 %v10552_v41 }
 0x498   :  { %8949 = vmatprep.subr.bf16.mxu0 %v10266_v2 }
 0x49a   :  { %7036 = vmatmul.mubr.f32.vlgmr.msra.gmra.mrb[12].mxu0 %v10070_v30 }
 0x49b   :  { %8951 = vmatpush3.bf16.msra.mxu0 %v10556_v44  ;;  %7105 = vmatprep.mubr.msk.f32.mxu0 %vm10267_vm0, %v10268_v3 }
 0x49c   :  { %8952 = vmatprep.subr.bf16.mxu0 %v10266_v2 }
 0x49f   :  { %8954 = vmatpush3.bf16.msra.mxu0 %v10561_v47 }
 0x4a0   :  { %8955 = vmatprep.subr.bf16.mxu0 %v10266_v2 }
 0x4a3   :  { %8957 = vmatpush3.bf16.msra.mxu0 %v10567_v50 }
 0x4a4   :  { %8958 = vmatprep.subr.bf16.mxu0 %v10266_v2 }
 0x4a7   :  { %8960 = vmatpush3.bf16.msra.mxu0 %v10571_v53 }
 0x4a8   :  { %8961 = vmatprep.subr.bf16.mxu0 %v10266_v2 }
 0x4ab   :  { %8963 = vmatpush3.bf16.msra.mxu0 %v10580_v59 }
 0x4ac   :  { %8964 = vmatprep.subr.bf16.mxu0 %v10266_v2 }
 0x4af   :  { %8966 = vmatpush3.bf16.msra.mxu0 %v10588_v1 }
 0x4b0   :  { %8967 = vmatprep.subr.bf16.mxu0 %v10266_v2 }
 0x4b3   :  { %8969 = vmatpush3.bf16.msra.mxu0 %v10593_v15 }
 0x4b4   :  { %8970 = vmatprep.subr.bf16.mxu0 %v10266_v2 }
 0x4b7   :  { %8972 = vmatpush3.bf16.msra.mxu0 %v10601_v21 }
 0x4b8   :  { %8997 = vmatprep.subr.bf16.mxu0 %v10266_v2 }
 0x52f   :  { %v1112_v36 = vpop.f32.mrb[10].mxu1 }
 0x530   :  { %v7002_v37 = vpop.f32.mrb[11].mxu1 }
 0x54d   :  { %v1042_v39 = vpop.f32.mrb[10].mxu0 }
 0x54e   :  { %v1043_v40 = vadd.f32 %v10688_v46, %v1042_v39  ;;  %v6967_v42 = vpop.f32.mrb[11].mxu0 }
 0x550   :  { %v1116_v43 = vadd.f32 %v1112_v36, %v1043_v40  ;;  %v1347_v36 = vmul.f32 %v10632_v26, %v1345_v13  ;;  %v10136_v13 = vld [vmem:[%s12148_s7] ss:$0 sm:$0xff] }
 0x552   :  { %v1117_v48 = vadd.f32 %v10694_v52, %v1116_v43  ;;  %v1348_v37 = vadd.f32 %v10638_v29, %v1347_v36 }
 0x554   :  { %10071 = vtanh.f32 %v1117_v48 }
 0x55e   :  { %v10072_v49 = vpop.eup %10071 }
 0x55f   :  { %7106 = vmatmul.mubr.f32.vlgmr.msra.gmra.mrb[14].mxu0 %v10072_v49  ;;  %v10892_v54 = vadd.f32 %v10072_v49, %v10827_v7  ;;  %v10276_v49 = vmov 7  }
 0x560   :  { %8999 = vmatpush3.bf16.msra.mxu0 %v10518_v17  ;;  %7175 = vmatprep.mubr.msk.f32.mxu0 %vm10267_vm0, %v10268_v3 }
 0x561   :  { %9000 = vmatprep.subr.bf16.mxu0 %v10266_v2  ;;  %10044 = vset.pattern.permute.xlu1 %v10276_v49 }
 0x564   :  { %9002 = vmatpush3.bf16.msra.mxu0 %v10522_v22 }
 0x565   :  { %9003 = vmatprep.subr.bf16.mxu0 %v10266_v2 }
 0x568   :  { %9005 = vmatpush3.bf16.msra.mxu0 %v10530_v28 }
 0x569   :  { %9006 = vmatprep.subr.bf16.mxu0 %v10266_v2 }
 0x56c   :  { %9008 = vmatpush3.bf16.msra.mxu0 %v10538_v34 }
 0x56d   :  { %v1192_v60 = vpop.f32.mrb[12].mxu0  ;;  %9009 = vmatprep.subr.bf16.mxu0 %v10266_v2 }
 0x56e   :  { %v1196_v61 = vadd.f32 %v1192_v60, %v1125_v58  ;;  %v7037_v63 = vpop.f32.mrb[13].mxu0 }
 0x570   :  { %v1197_v0 = vadd.f32 %v10644_v33, %v1196_v61  ;;  %9011 = vmatpush3.bf16.msra.mxu0 %v10576_v56 }
 0x571   :  { %9012 = vmatprep.subr.bf16.mxu0 %v10266_v2 }
 0x572   :  { %10073 = vtanh.f32 %v1197_v0 }
 0x574   :  { %9014 = vmatpush3.bf16.msra.mxu0 %v10582_v62 }
 0x575   :  { %9015 = vmatprep.subr.bf16.mxu0 %v10266_v2 }
 0x578   :  { %9017 = vmatpush3.bf16.msra.mxu0 %v10590_v9 }
 0x579   :  { %9018 = vmatprep.subr.bf16.mxu0 %v10266_v2 }
 0x57c   :  { %v10074_v5 = vpop.eup %10073  ;;  %9020 = vmatpush3.bf16.msra.mxu0 %v10597_v18 }
 0x57d   :  { %7071 = vmatmul.mubr.f32.vlgmr.msra.gmra.mrb[12].mxu1 %v10074_v5  ;;  %9045 = vmatprep.subr.bf16.mxu0 %v10266_v2 }
 0x57e   :  { %8975 = vmatpush3.bf16.msra.mxu1 %v10503_v8  ;;  %7140 = vmatprep.mubr.msk.f32.mxu1 %vm10267_vm0, %v10268_v3 }
 0x57f   :  { %8976 = vmatprep.subr.bf16.mxu1 %v10266_v2 }
 0x582   :  { %8978 = vmatpush3.bf16.msra.mxu1 %v10506_v10 }
 0x583   :  { %8979 = vmatprep.subr.bf16.mxu1 %v10266_v2 }
 0x586   :  { %8981 = vmatpush3.bf16.msra.mxu1 %v10516_v16 }
 0x587   :  { %8982 = vmatprep.subr.bf16.mxu1 %v10266_v2 }
 0x58a   :  { %8984 = vmatpush3.bf16.msra.mxu1 %v10526_v25 }
 0x58b   :  { %8985 = vmatprep.subr.bf16.mxu1 %v10266_v2 }
 0x58e   :  { %8987 = vmatpush3.bf16.msra.mxu1 %v10534_v31 }
 0x58f   :  { %8988 = vmatprep.subr.bf16.mxu1 %v10266_v2 }
 0x592   :  { %8990 = vmatpush3.bf16.msra.mxu1 %v10542_v35 }
 0x593   :  { %8991 = vmatprep.subr.bf16.mxu1 %v10266_v2 }
 0x596   :  { %8993 = vmatpush3.bf16.msra.mxu1 %v10548_v38 }
 0x597   :  { %8994 = vmatprep.subr.bf16.mxu1 %v10266_v2 }
 0x59a   :  { %8996 = vmatpush3.bf16.msra.mxu1 %v10552_v41 }
 0x59b   :  { %9021 = vmatprep.subr.bf16.mxu1 %v10266_v2 }
 0x59d   :  { %7141 = vmatmul.mubr.f32.vlgmr.msra.gmra.mrb[14].mxu1 %v10074_v5 }
 0x59e   :  { %9023 = vmatpush3.bf16.msra.mxu1 %v10556_v44  ;;  %7210 = vmatprep.mubr.msk.f32.mxu1 %vm10267_vm0, %v10268_v3 }
 0x59f   :  { %9024 = vmatprep.subr.bf16.mxu1 %v10266_v2 }
 0x5a2   :  { %9026 = vmatpush3.bf16.msra.mxu1 %v10561_v47 }
 0x5a3   :  { %9027 = vmatprep.subr.bf16.mxu1 %v10266_v2 }
 0x5a6   :  { %9029 = vmatpush3.bf16.msra.mxu1 %v10567_v50 }
 0x5a7   :  { %9030 = vmatprep.subr.bf16.mxu1 %v10266_v2 }
 0x5aa   :  { %9032 = vmatpush3.bf16.msra.mxu1 %v10571_v53 }
 0x5ab   :  { %9033 = vmatprep.subr.bf16.mxu1 %v10266_v2 }
 0x5ae   :  { %9035 = vmatpush3.bf16.msra.mxu1 %v10580_v59 }
 0x5af   :  { %9036 = vmatprep.subr.bf16.mxu1 %v10266_v2 }
 0x5b2   :  { %9038 = vmatpush3.bf16.msra.mxu1 %v10588_v1 }
 0x5b3   :  { %9039 = vmatprep.subr.bf16.mxu1 %v10266_v2 }
 0x5b6   :  { %9041 = vmatpush3.bf16.msra.mxu1 %v10593_v15 }
 0x5b7   :  { %9042 = vmatprep.subr.bf16.mxu1 %v10266_v2 }
 0x5ba   :  { %9044 = vmatpush3.bf16.msra.mxu1 %v10601_v21 }
 0x5bb   :  { %9069 = vmatprep.subr.bf16.mxu1 %v10266_v2 }
 0x632   :  { %v1335_v7 = vpop.f32.mrb[14].mxu0 }
 0x633   :  { %v7107_v12 = vpop.f32.mrb[15].mxu0 }
 0x650   :  { %v1265_v14 = vpop.f32.mrb[12].mxu1 }
 0x651   :  { %v1266_v57 = vadd.f32 %v10688_v46, %v1265_v14  ;;  %v7072_v19 = vpop.f32.mrb[13].mxu1 }
 0x653   :  { %v1339_v20 = vadd.f32 %v1335_v7, %v1266_v57 }
 0x655   :  { %v1340_v24 = vadd.f32 %v10694_v52, %v1339_v20 }
 0x657   :  { %10075 = vtanh.f32 %v1340_v24  ;;  %v2164_v24 = vld [vmem:[#allocation9 + $0x58] sm:$0xff] }
 0x661   :  { %v10076_v27 = vpop.eup %10075 }
 0x662   :  { %7211 = vmatmul.mubr.f32.vlgmr.msra.gmra.mrb[16].mxu1 %v10076_v27  ;;  %v10956_v30 = vadd.f32 %v10076_v27, %v10892_v54  ;;  %v10133_v54 = vld [vmem:[%s12176_s30] sm:$0xff] }
 0x663   :  { %9071 = vmatpush3.bf16.msra.mxu1 %v10518_v17  ;;  %7280 = vmatprep.mubr.msk.f32.mxu1 %vm10267_vm0, %v10268_v3 }
 0x664   :  { %9072 = vmatprep.subr.bf16.mxu1 %v10266_v2  ;;  %1790 = vperm.xlu1 %10044, %v10133_v54  }
 0x667   :  { %9074 = vmatpush3.bf16.msra.mxu1 %v10522_v22 }
 0x668   :  { %9075 = vmatprep.subr.bf16.mxu1 %v10266_v2  ;;  %10046 = vset.pattern.permute.xlu1 %v10270_v23  ;;  %v1568_v23 = vpop.permute.xlu1 %1567 }
 0x669   :  { %v1570_v12 = vmul.f32 %v10632_v26, %v1568_v23  ;;  %v10134_v26 = vld [vmem:[%s12177_s24] ss:$0 sm:$0xff]  ;;  %s10285_s24 = smov 6  }
 0x66a   :  { %v2016_v23 = vld [vmem:[#allocation11 + $0x18] sm:$0xff] }
 0x66b   :  { %9077 = vmatpush3.bf16.msra.mxu1 %v10530_v28  ;;  %v1571_v14 = vadd.f32 %v10638_v29, %v1570_v12 }
 0x66c   :  { %9078 = vmatprep.subr.bf16.mxu1 %v10266_v2 }
 0x66f   :  { %9080 = vmatpush3.bf16.msra.mxu1 %v10538_v34 }
 0x670   :  { %v1415_v39 = vpop.f32.mrb[14].mxu1  ;;  %9081 = vmatprep.subr.bf16.mxu1 %v10266_v2 }
 0x671   :  { %v1419_v40 = vadd.f32 %v1415_v39, %v1348_v37  ;;  %v7142_v42 = vpop.f32.mrb[15].mxu1  ;;  %v2165_v39 = vld [vmem:[#allocation9 + $0x60] sm:$0xff] }
 0x673   :  { %v1420_v43 = vadd.f32 %v10644_v33, %v1419_v40  ;;  %9083 = vmatpush3.bf16.msra.mxu1 %v10576_v56  ;;  %v2166_v40 = vld [vmem:[#allocation9 + $0x68] sm:$0xff] }
 0x674   :  { %9084 = vmatprep.subr.bf16.mxu1 %v10266_v2  ;;  %v11140_v42 = vpack.c.bf16 %v2166_v40, %v2165_v39  ;;  %v10277_v40 = vmov 8  }
 0x675   :  { %10077 = vtanh.f32 %v1420_v43  ;;  %v2167_v43 = vld [vmem:[#allocation9 + $0x70] sm:$0xff] }
 0x677   :  { %9086 = vmatpush3.bf16.msra.mxu1 %v10582_v62 }
 0x678   :  { %9087 = vmatprep.subr.bf16.mxu1 %v10266_v2 }
 0x67b   :  { %9089 = vmatpush3.bf16.msra.mxu1 %v10590_v9 }
 0x67c   :  { %9090 = vmatprep.subr.bf16.mxu1 %v10266_v2 }
 0x67f   :  { %v10078_v48 = vpop.eup %10077  ;;  %9092 = vmatpush3.bf16.msra.mxu1 %v10597_v18 }
 0x680   :  { %7176 = vmatmul.mubr.f32.vlgmr.msra.gmra.mrb[16].mxu0 %v10078_v48  ;;  %9117 = vmatprep.subr.bf16.mxu1 %v10266_v2 }
 0x681   :  { %9047 = vmatpush3.bf16.msra.mxu0 %v10503_v8  ;;  %7245 = vmatprep.mubr.msk.f32.mxu0 %vm10267_vm0, %v10268_v3 }
 0x682   :  { %9048 = vmatprep.subr.bf16.mxu0 %v10266_v2 }
 0x685   :  { %9050 = vmatpush3.bf16.msra.mxu0 %v10506_v10 }
 0x686   :  { %9051 = vmatprep.subr.bf16.mxu0 %v10266_v2 }
 0x689   :  { %9053 = vmatpush3.bf16.msra.mxu0 %v10516_v16 }
 0x68a   :  { %9054 = vmatprep.subr.bf16.mxu0 %v10266_v2 }
 0x68d   :  { %9056 = vmatpush3.bf16.msra.mxu0 %v10526_v25 }
 0x68e   :  { %9057 = vmatprep.subr.bf16.mxu0 %v10266_v2 }
 0x691   :  { %9059 = vmatpush3.bf16.msra.mxu0 %v10534_v31 }
 0x692   :  { %9060 = vmatprep.subr.bf16.mxu0 %v10266_v2 }
 0x695   :  { %9062 = vmatpush3.bf16.msra.mxu0 %v10542_v35 }
 0x696   :  { %9063 = vmatprep.subr.bf16.mxu0 %v10266_v2 }
 0x699   :  { %9065 = vmatpush3.bf16.msra.mxu0 %v10548_v38 }
 0x69a   :  { %9066 = vmatprep.subr.bf16.mxu0 %v10266_v2 }
 0x69d   :  { %9068 = vmatpush3.bf16.msra.mxu0 %v10552_v41 }
 0x69e   :  { %9093 = vmatprep.subr.bf16.mxu0 %v10266_v2 }
 0x6a0   :  { %7246 = vmatmul.mubr.f32.vlgmr.msra.gmra.mrb[18].mxu0 %v10078_v48  ;;  %v2168_v48 = vld [vmem:[#allocation9 + $0x78] sm:$0xff] }
 0x6a1   :  { %9095 = vmatpush3.bf16.msra.mxu0 %v10556_v44  ;;  %7315 = vmatprep.mubr.msk.f32.mxu0 %vm10267_vm0, %v10268_v3 }
 0x6a2   :  { %9096 = vmatprep.subr.bf16.mxu0 %v10266_v2 }
 0x6a5   :  { %9098 = vmatpush3.bf16.msra.mxu0 %v10561_v47 }
 0x6a6   :  { %9099 = vmatprep.subr.bf16.mxu0 %v10266_v2 }
 0x6a9   :  { %9101 = vmatpush3.bf16.msra.mxu0 %v10567_v50 }
 0x6aa   :  { %9102 = vmatprep.subr.bf16.mxu0 %v10266_v2 }
 0x6ad   :  { %9104 = vmatpush3.bf16.msra.mxu0 %v10571_v53 }
 0x6ae   :  { %9105 = vmatprep.subr.bf16.mxu0 %v10266_v2 }
 0x6b1   :  { %9107 = vmatpush3.bf16.msra.mxu0 %v10580_v59 }
 0x6b2   :  { %9108 = vmatprep.subr.bf16.mxu0 %v10266_v2 }
 0x6b5   :  { %9110 = vmatpush3.bf16.msra.mxu0 %v10588_v1 }
 0x6b6   :  { %9111 = vmatprep.subr.bf16.mxu0 %v10266_v2 }
 0x6b9   :  { %9113 = vmatpush3.bf16.msra.mxu0 %v10593_v15 }
 0x6ba   :  { %9114 = vmatprep.subr.bf16.mxu0 %v10266_v2 }
 0x6bd   :  { %9116 = vmatpush3.bf16.msra.mxu0 %v10601_v21 }
 0x6be   :  { %9141 = vmatprep.subr.bf16.mxu0 %v10266_v2 }
 0x735   :  { %v1558_v4 = vpop.f32.mrb[16].mxu1 }
 0x736   :  { %v7212_v55 = vpop.f32.mrb[17].mxu1 }
 0x737   :  { %v2346_v55 = vld [vmem:[#allocation9 + $0x88] sm:$0xff] }
 0x753   :  { %v1488_v58 = vpop.f32.mrb[16].mxu0 }
 0x754   :  { %v1489_v60 = vadd.f32 %v10688_v46, %v1488_v58  ;;  %v7177_v61 = vpop.f32.mrb[17].mxu0  ;;  %v2013_v58 = vld [vmem:[#allocation11] sm:$0xff] }
 0x755   :  { %v2014_v61 = vld [vmem:[#allocation11 + $0x8] sm:$0xff] }
 0x756   :  { %v1562_v63 = vadd.f32 %v1558_v4, %v1489_v60  ;;  %v2345_v4 = vld [vmem:[#allocation9 + $0x80] sm:$0xff] }
 0x757   :  { %v11153_v60 = vpack.c.bf16 %v2346_v55, %v2345_v4  ;;  %v10137_v55 = vld [vmem:[%s12147_s6 + $0x1] ss:$0 sm:$0xff] }
 0x758   :  { %v1563_v0 = vadd.f32 %v10694_v52, %v1562_v63  ;;  %v2347_v63 = vld [vmem:[#allocation9 + $0x90] sm:$0xff] }
 0x75a   :  { %10079 = vtanh.f32 %v1563_v0  ;;  %v2348_v0 = vld [vmem:[#allocation9 + $0x98] sm:$0xff] }
 0x75b   :  { %v11156_v12 = vpack.c.bf16 %v2348_v0, %v2347_v63 }
 0x764   :  { %v10080_v5 = vpop.eup %10079 }
 0x765   :  { %7316 = vmatmul.mubr.f32.vlgmr.msra.gmra.mrb[20].mxu0 %v10080_v5  ;;  %v11023_v7 = vadd.f32 %v10080_v5, %v10956_v30  ;;  %v9190_v5 = vpack.c.bf16 %v2014_v61, %v2013_v58 }
 0x766   :  { %9143 = vmatpush3.bf16.msra.mxu0 %v10518_v17  ;;  %7385 = vmatprep.mubr.msk.f32.mxu0 %vm10267_vm0, %v10268_v3 }
 0x767   :  { %9144 = vmatprep.subr.bf16.mxu0 %v10266_v2 }
 0x76a   :  { %9146 = vmatpush3.bf16.msra.mxu0 %v10522_v22 }
 0x76b   :  { %9147 = vmatprep.subr.bf16.mxu0 %v10266_v2 }
 0x76e   :  { %9149 = vmatpush3.bf16.msra.mxu0 %v10530_v28 }
 0x76f   :  { %9150 = vmatprep.subr.bf16.mxu0 %v10266_v2 }
 0x772   :  { %9152 = vmatpush3.bf16.msra.mxu0 %v10538_v34 }
 0x773   :  { %v1638_v17 = vpop.f32.mrb[18].mxu0  ;;  %9153 = vmatprep.subr.bf16.mxu0 %v10266_v2 }
 0x774   :  { %v1642_v57 = vadd.f32 %v1638_v17, %v1571_v14  ;;  %v7247_v19 = vpop.f32.mrb[19].mxu0  ;;  %v2349_v17 = vld [vmem:[#allocation9 + $0xa0] sm:$0xff] }
 0x775   :  { %v2017_v19 = vld [vmem:[#allocation11 + $0x20] sm:$0xff] }
 0x776   :  { %v1643_v20 = vadd.f32 %v10644_v33, %v1642_v57  ;;  %9155 = vmatpush3.bf16.msra.mxu0 %v10576_v56  ;;  %v2350_v57 = vld [vmem:[#allocation9 + $0xa8] sm:$0xff] }
 0x777   :  { %9156 = vmatprep.subr.bf16.mxu0 %v10266_v2 }
 0x778   :  { %10081 = vtanh.f32 %v1643_v20  ;;  %v2018_v20 = vld [vmem:[#allocation11 + $0x28] sm:$0xff] }
 0x77a   :  { %9158 = vmatpush3.bf16.msra.mxu0 %v10582_v62  ;;  %v2157_v62 = vld [vmem:[#allocation9 + $0x20] sm:$0xff] }
 0x77b   :  { %9159 = vmatprep.subr.bf16.mxu0 %v10266_v2 }
 0x77e   :  { %9161 = vmatpush3.bf16.msra.mxu0 %v10590_v9  ;;  %v1791_v9 = vpop.permute.xlu1 %1790 }
 0x77f   :  { %9162 = vmatprep.subr.bf16.mxu0 %v10266_v2  ;;  %v1793_v29 = vmul.f32 %v10134_v26, %v1791_v9  ;;  %v2356_v9 = vld [vmem:[#allocation9 + $0xd8] sm:$0xff] }
 0x780   :  { %v2024_v26 = vld [vmem:[#allocation11 + $0x58] sm:$0xff] }
 0x782   :  { %v10082_v22 = vpop.eup %10081  ;;  %9164 = vmatpush3.bf16.msra.mxu0 %v10597_v18  ;;  %v2159_v18 = vld [vmem:[#allocation9 + $0x30] sm:$0xff] }
 0x783   :  { %7281 = vmatmul.mubr.f32.vlgmr.msra.gmra.mrb[18].mxu1 %v10082_v22  ;;  %9189 = vmatprep.subr.bf16.mxu0 %v10266_v2 }
 0x784   :  { %9119 = vmatpush3.bf16.msra.mxu1 %v10503_v8  ;;  %7350 = vmatprep.mubr.msk.f32.mxu1 %vm10267_vm0, %v10268_v3  ;;  %v11085_v8 = vld [vmem:[%s12179_s16] sm:$0xff] }
 0x785   :  { %9120 = vmatprep.subr.bf16.mxu1 %v10266_v2  ;;  %2136 = vperm.xlu0 %10045, %v11085_v8  }
 0x786   :  { %2468 = vperm.xlu1 %10046, %v11085_v8  }
 0x788   :  { %9122 = vmatpush3.bf16.msra.mxu1 %v10506_v10 }
 0x789   :  { %9123 = vmatprep.subr.bf16.mxu1 %v10266_v2  ;;  %10048 = vset.pattern.permute.xlu0 %v10272_v11 }
 0x78a   :  { %10047 = vset.pattern.permute.xlu1 %v10271_v45  ;;  %3078 = vperm.xlu0 %10048, %v11085_v8   ;;  %v2161_v45 = vld [vmem:[#allocation9 + $0x40] sm:$0xff] }
 0x78b   :  { %2773 = vperm.xlu1 %10047, %v11085_v8  }
 0x78c   :  { %9125 = vmatpush3.bf16.msra.mxu1 %v10516_v16 }
 0x78d   :  { %9126 = vmatprep.subr.bf16.mxu1 %v10266_v2 }
 0x78e   :  { %10051 = vset.pattern.permute.xlu0 %v10275_v6  ;;  %v2163_v6 = vld [vmem:[#allocation9 + $0x50] sm:$0xff] }
 0x78f   :  { %10049 = vset.pattern.permute.xlu1 %v10273_v51  ;;  %3993 = vperm.xlu0 %10051, %v11085_v8   ;;  %v11136_v37 = vpack.c.bf16 %v2164_v24, %v2163_v6  ;;  %v2359_v6 = vld [vmem:[#allocation9 + $0xf0] sm:$0xff]  ;;  %v2360_v24 = vld [vmem:[#allocation9 + $0xf8] sm:$0xff] }
 0x790   :  { %9128 = vmatpush3.bf16.msra.mxu1 %v10526_v25  ;;  %3383 = vperm.xlu1 %10049, %v11085_v8  }
 0x791   :  { %9129 = vmatprep.subr.bf16.mxu1 %v10266_v2 }
 0x794   :  { %9131 = vmatpush3.bf16.msra.mxu1 %v10534_v31  ;;  %10050 = vset.pattern.permute.xlu1 %v10274_v32 }
 0x795   :  { %9132 = vmatprep.subr.bf16.mxu1 %v10266_v2  ;;  %3688 = vperm.xlu1 %10050, %v11085_v8  }
 0x798   :  { %9134 = vmatpush3.bf16.msra.mxu1 %v10542_v35 }
 0x799   :  { %9135 = vmatprep.subr.bf16.mxu1 %v10266_v2  ;;  %10052 = vset.pattern.permute.xlu1 %v10276_v49  ;;  %v11144_v49 = vpack.c.bf16 %v2168_v48, %v2167_v43  ;;  %v10278_v43 = vmov 10  }
 0x79a   :  { %4298 = vperm.xlu1 %10052, %v11085_v8  }
 0x79c   :  { %9137 = vmatpush3.bf16.msra.mxu1 %v10548_v38  ;;  %v2153_v38 = vld [vmem:[#allocation9] sm:$0xff] }
 0x79d   :  { %9138 = vmatprep.subr.bf16.mxu1 %v10266_v2 }
 0x79e   :  { %10053 = vset.pattern.permute.xlu1 %v10277_v40  ;;  %v2264_v40 = vld [vmem:[#allocation8 + $0xf0] sm:$0xff] }
 0x79f   :  { %4603 = vperm.xlu1 %10053, %v11085_v8  }
 0x7a0   :  { %9140 = vmatpush3.bf16.msra.mxu1 %v10552_v41  ;;  %v2154_v41 = vld [vmem:[#allocation9 + $0x8] sm:$0xff] }
 0x7a1   :  { %9165 = vmatprep.subr.bf16.mxu1 %v10266_v2 }
 0x7a3   :  { %7351 = vmatmul.mubr.f32.vlgmr.msra.gmra.mrb[20].mxu1 %v10082_v22  ;;  %v11161_v22 = vpack.c.bf16 %v2350_v57, %v2349_v17  ;;  %10055 = vset.pattern.permute.xlu1 %v10278_v43  ;;  %v2251_v17 = vld [vmem:[#allocation8 + $0x88] sm:$0xff] }
 0x7a4   :  { %9167 = vmatpush3.bf16.msra.mxu1 %v10556_v44  ;;  %7420 = vmatprep.mubr.msk.f32.mxu1 %vm10267_vm0, %v10268_v3  ;;  %v11103_v44 = vpack.c.bf16 %v2154_v41, %v2153_v38  ;;  %v2353_v38 = vld [vmem:[#allocation9 + $0xc0] sm:$0xff]  ;;  %v2354_v41 = vld [vmem:[#allocation9 + $0xc8] sm:$0xff] }
 0x7a5   :  { %9168 = vmatprep.subr.bf16.mxu1 %v10266_v2  ;;  %5213 = vperm.xlu1 %10055, %v11085_v8  }
 0x7a8   :  { %9170 = vmatpush3.bf16.msra.mxu1 %v10561_v47  ;;  %v2155_v47 = vld [vmem:[#allocation9 + $0x10] sm:$0xff] }
 0x7a9   :  { %9171 = vmatprep.subr.bf16.mxu1 %v10266_v2 }
 0x7ac   :  { %9173 = vmatpush3.bf16.msra.mxu1 %v10567_v50  ;;  %v2156_v50 = vld [vmem:[#allocation9 + $0x18] sm:$0xff] }
 0x7ad   :  { %9174 = vmatprep.subr.bf16.mxu1 %v10266_v2 }
 0x7b0   :  { %9176 = vmatpush3.bf16.msra.mxu1 %v10571_v53 }
 0x7b1   :  { %9177 = vmatprep.subr.bf16.mxu1 %v10266_v2 }
 0x7b4   :  { %9179 = vmatpush3.bf16.msra.mxu1 %v10580_v59  ;;  %v11109_v59 = vpack.c.bf16 %v2156_v50, %v2155_v47  ;;  %v11172_v47 = vpack.c.bf16 %v2354_v41, %v2353_v38  ;;  %v2021_v50 = vld [vmem:[#allocation11 + $0x40] sm:$0xff] }
 0x7b5   :  { %9180 = vmatprep.subr.bf16.mxu1 %v10266_v2 }
 0x7b8   :  { %9182 = vmatpush3.bf16.msra.mxu1 %v10588_v1  ;;  %v2158_v1 = vld [vmem:[#allocation9 + $0x28] sm:$0xff] }
 0x7b9   :  { %9183 = vmatprep.subr.bf16.mxu1 %v10266_v2 }
 0x7bc   :  { %9185 = vmatpush3.bf16.msra.mxu1 %v10593_v15  ;;  %v11115_v15 = vpack.c.bf16 %v2158_v1, %v2157_v62  ;;  %v2355_v1 = vld [vmem:[#allocation9 + $0xd0] sm:$0xff] }
 0x7bd   :  { %9186 = vmatprep.subr.bf16.mxu1 %v10266_v2 }
 0x7c0   :  { %9188 = vmatpush3.bf16.msra.mxu1 %v10601_v21  ;;  %v2160_v21 = vld [vmem:[#allocation9 + $0x38] sm:$0xff] }
 0x7c1   :  { %9213 = vmatprep.subr.bf16.mxu1 %v10266_v2  ;;  %v11122_v33 = vpack.c.bf16 %v2160_v21, %v2159_v18  ;;  %v11177_v18 = vpack.c.bf16 %v2356_v9, %v2355_v1  ;;  %v2023_v21 = vld [vmem:[#allocation11 + $0x50] sm:$0xff]  ;;  %v11229_v1 = vld [vmem:[%s12150_s9] ss:$0 sm:$0xff] }
 0x804   :  { %v2137_v38 = vpop.permute.xlu0 %2136 }
 0x838   :  { %v1781_v10 = vpop.f32.mrb[20].mxu0 }
 0x839   :  { %v7317_v16 = vpop.f32.mrb[21].mxu0 }
 0x83a   :  { %v2351_v16 = vld [vmem:[#allocation9 + $0xb0] sm:$0xff] }
 0x856   :  { %v1711_v25 = vpop.f32.mrb[18].mxu1 }
 0x857   :  { %v1712_v28 = vadd.f32 %v10688_v46, %v1711_v25  ;;  %v7282_v31 = vpop.f32.mrb[19].mxu1  ;;  %v2162_v46 = vld [vmem:[#allocation9 + $0x48] sm:$0xff]  ;;  %v2352_v25 = vld [vmem:[#allocation9 + $0xb8] sm:$0xff] }
 0x858   :  { %v11129_v51 = vpack.c.bf16 %v2162_v46, %v2161_v45  ;;  %v2019_v31 = vld [vmem:[#allocation11 + $0x30] sm:$0xff]  ;;  %v9205_v45 = vpack.c.bf16 %v2024_v26, %v2023_v21  ;;  %v2358_v46 = vld [vmem:[#allocation9 + $0xe8] sm:$0xff]  ;;  %v2258_v26 = vld [vmem:[#allocation8 + $0xc0] sm:$0xff] }
 0x859   :  { %v1785_v34 = vadd.f32 %v1781_v10, %v1712_v28  ;;  %v9196_v10 = vpack.c.bf16 %v2018_v20, %v2017_v19  ;;  %v11166_v28 = vpack.c.bf16 %v2352_v25, %v2351_v16  ;;  %v2253_v16 = vld [vmem:[#allocation8 + $0x98] sm:$0xff] }
 0x85b   :  { %v1786_v35 = vadd.f32 %v10694_v52, %v1785_v34  ;;  %v10135_v52 = vld [vmem:[%s12178_s19] ss:$0 sm:$0xff]  ;;  %s10281_s19 = smov 2  }
 0x85c   :  { %v1794_v11 = vadd.f32 %v10135_v52, %v1793_v29  ;;  %v2020_v34 = vld [vmem:[#allocation11 + $0x38] sm:$0xff]  ;;  %v2357_v29 = vld [vmem:[#allocation9 + $0xe0] sm:$0xff] }
 0x85d   :  { %10083 = vtanh.f32 %v1786_v35  ;;  %v9199_v35 = vpack.c.bf16 %v2020_v34, %v2019_v31  ;;  %v2025_v52 = vld [vmem:[#allocation11 + $0x60] sm:$0xff] }
 0x85e   :  { %v2254_v34 = vld [vmem:[#allocation8 + $0xa0] sm:$0xff] }
 0x867   :  { %v10084_v53 = vpop.eup %10083 }
 0x868   :  { %7421 = vmatmul.mubr.f32.vlgmr.msra.gmra.mrb[22].mxu1 %v10084_v53  ;;  %v11106_v56 = vadd.f32 %v10084_v53, %v11023_v7  ;;  %v2015_v7 = vld [vmem:[#allocation11 + $0x10] sm:$0xff]  ;;  %v2022_v53 = vld [vmem:[#allocation11 + $0x48] sm:$0xff] }
 0x869   :  { %9215 = vmatpush3.bf16.msra.mxu1 %v11103_v44  ;;  %7490 = vmatprep.mubr.msk.f32.mxu1 %vm10267_vm0, %v10268_v3  ;;  %v9193_v14 = vpack.c.bf16 %v2016_v23, %v2015_v7  ;;  %v9202_v62 = vpack.c.bf16 %v2022_v53, %v2021_v50  ;;  %v10138_v7 = vld [vmem:[%s12148_s7 + $0x1] ss:$0 sm:$0xff]  ;;  %v2256_v53 = vld [vmem:[#allocation8 + $0xb0] sm:$0xff] }
 0x86a   :  { %9216 = vmatprep.subr.bf16.mxu1 %v10266_v2 }
 0x86d   :  { %9218 = vmatpush3.bf16.msra.mxu1 %v11109_v59 }
 0x86e   :  { %9219 = vmatprep.subr.bf16.mxu1 %v10266_v2 }
 0x871   :  { %9221 = vmatpush3.bf16.msra.mxu1 %v11115_v15 }
 0x872   :  { %9222 = vmatprep.subr.bf16.mxu1 %v10266_v2 }
 0x875   :  { %9224 = vmatpush3.bf16.msra.mxu1 %v11122_v33 }
 0x876   :  { %v1861_v32 = vpop.f32.mrb[20].mxu1  ;;  %9225 = vmatprep.subr.bf16.mxu1 %v10266_v2 }
 0x877   :  { %v1865_v27 = vadd.f32 %v1861_v32, %v1794_v11  ;;  %v7352_v30 = vpop.f32.mrb[21].mxu1  ;;  %v2026_v11 = vld [vmem:[#allocation11 + $0x68] sm:$0xff]  ;;  %v11182_v32 = vpack.c.bf16 %v2358_v46, %v2357_v29 }
 0x878   :  { %v11186_v30 = vpack.c.bf16 %v2360_v24, %v2359_v6  ;;  %v2259_v29 = vld [vmem:[#allocation8 + $0xc8] sm:$0xff]  ;;  %v11247_v6 = vld [vmem:[%s12154_s13] ss:$0 sm:$0xff] }
 0x879   :  { %v1866_v36 = vadd.f32 %v10136_v13, %v1865_v27  ;;  %9227 = vmatpush3.bf16.msra.mxu1 %v11129_v51  ;;  %v9208_v27 = vpack.c.bf16 %v2026_v11, %v2025_v52  ;;  %v2027_v13 = vld [vmem:[#allocation11 + $0x70] sm:$0xff]  ;;  %v2261_v11 = vld [vmem:[#allocation8 + $0xd8] sm:$0xff] }
 0x87a   :  { %9228 = vmatprep.subr.bf16.mxu1 %v10266_v2  ;;  %v2260_v52 = vld [vmem:[#allocation8 + $0xd0] sm:$0xff] }
 0x87b   :  { %10085 = vtanh.f32 %v1866_v36  ;;  %v2028_v36 = vld [vmem:[#allocation11 + $0x78] sm:$0xff]  ;;  %v11252_v24 = vpack.c.bf16 %v2261_v11, %v2260_v52 }
 0x87c   :  { %v9211_v39 = vpack.c.bf16 %v2028_v36, %v2027_v13  ;;  %v2262_v13 = vld [vmem:[#allocation8 + $0xe0] sm:$0xff]  ;;  %v2263_v36 = vld [vmem:[#allocation8 + $0xe8] sm:$0xff] }
 0x87d   :  { %9230 = vmatpush3.bf16.msra.mxu1 %v11136_v37 }
 0x87e   :  { %9231 = vmatprep.subr.bf16.mxu1 %v10266_v2 }
 0x881   :  { %9233 = vmatpush3.bf16.msra.mxu1 %v11140_v42 }
 0x882   :  { %9234 = vmatprep.subr.bf16.mxu1 %v10266_v2 }
 0x885   :  { %v10086_v54 = vpop.eup %10085  ;;  %9236 = vmatpush3.bf16.msra.mxu1 %v11144_v49 }
 0x886   :  { %7386 = vmatmul.mubr.f32.vlgmr.msra.gmra.mrb[22].mxu0 %v10086_v54  ;;  %9261 = vmatprep.subr.bf16.mxu1 %v10266_v2 }
 0x887   :  { %7455 = vmatprep.mubr.msk.f32.mxu0 %vm10267_vm0, %v10268_v3  ;;  %9191 = vmatpush3.bf16.msra.mxu0 %v9190_v5 }
 0x888   :  { %7491 = vmatmul.mubr.f32.vlgmr.msra.gmra.mrb[24].mxu1 %v10086_v54  ;;  %9192 = vmatprep.subr.bf16.mxu0 %v10266_v2 }
 0x889   :  { %7560 = vmatprep.mubr.msk.f32.mxu1 %vm10267_vm0, %v10268_v3  ;;  %9263 = vmatpush3.bf16.msra.mxu1 %v11153_v60 }
 0x88a   :  { %9264 = vmatprep.subr.bf16.mxu1 %v10266_v2 }
 0x88b   :  { %9194 = vmatpush3.bf16.msra.mxu0 %v9193_v14  ;;  %v2250_v14 = vld [vmem:[#allocation8 + $0x80] sm:$0xff] }
 0x88c   :  { %9195 = vmatprep.subr.bf16.mxu0 %v10266_v2  ;;  %v11202_v19 = vpack.c.bf16 %v2251_v17, %v2250_v14 }
 0x88d   :  { %9266 = vmatpush3.bf16.msra.mxu1 %v11156_v12 }
 0x88e   :  { %9267 = vmatprep.subr.bf16.mxu1 %v10266_v2 }
 0x88f   :  { %9197 = vmatpush3.bf16.msra.mxu0 %v9196_v10  ;;  %v2252_v10 = vld [vmem:[#allocation8 + $0x90] sm:$0xff] }
 0x890   :  { %9198 = vmatprep.subr.bf16.mxu0 %v10266_v2  ;;  %v11209_v31 = vpack.c.bf16 %v2253_v16, %v2252_v10  ;;  %v11326_v16 = vld [vmem:[%s12154_s13 + $0x1] ss:$0 sm:$0xff] }
 0x891   :  { %9269 = vmatpush3.bf16.msra.mxu1 %v11161_v22 }
 0x892   :  { %9270 = vmatprep.subr.bf16.mxu1 %v10266_v2 }
 0x893   :  { %9200 = vmatpush3.bf16.msra.mxu0 %v9199_v35  ;;  %v2255_v35 = vld [vmem:[#allocation8 + $0xa8] sm:$0xff] }
 0x894   :  { %9201 = vmatprep.subr.bf16.mxu0 %v10266_v2  ;;  %v11222_v41 = vpack.c.bf16 %v2255_v35, %v2254_v34  ;;  %v11332_v35 = vld [vmem:[%s12155_s14] ss:$0 sm:$0xff] }
 0x895   :  { %9272 = vmatpush3.bf16.msra.mxu1 %v11166_v28 }
 0x896   :  { %9273 = vmatprep.subr.bf16.mxu1 %v10266_v2 }
 0x897   :  { %9203 = vmatpush3.bf16.msra.mxu0 %v9202_v62  ;;  %v2257_v62 = vld [vmem:[#allocation8 + $0xb8] sm:$0xff] }
 0x898   :  { %9204 = vmatprep.subr.bf16.mxu0 %v10266_v2  ;;  %v11234_v9 = vpack.c.bf16 %v2257_v62, %v2256_v53  ;;  %v2469_v53 = vpop.permute.xlu1 %2468 }
 0x899   :  { %9275 = vmatpush3.bf16.msra.mxu1 %v11172_v47 }
 0x89a   :  { %9276 = vmatprep.subr.bf16.mxu1 %v10266_v2 }
 0x89b   :  { %9206 = vmatpush3.bf16.msra.mxu0 %v9205_v45  ;;  %v11241_v45 = vpack.c.bf16 %v2259_v29, %v2258_v26 }
 0x89c   :  { %9207 = vmatprep.subr.bf16.mxu0 %v10266_v2 }
 0x89d   :  { %9278 = vmatpush3.bf16.msra.mxu1 %v11177_v18 }
 0x89e   :  { %9279 = vmatprep.subr.bf16.mxu1 %v10266_v2 }
 0x89f   :  { %9209 = vmatpush3.bf16.msra.mxu0 %v9208_v27 }
 0x8a0   :  { %9210 = vmatprep.subr.bf16.mxu0 %v10266_v2 }
 0x8a1   :  { %9281 = vmatpush3.bf16.msra.mxu1 %v11182_v32 }
 0x8a2   :  { %9282 = vmatprep.subr.bf16.mxu1 %v10266_v2 }
 0x8a3   :  { %9212 = vmatpush3.bf16.msra.mxu0 %v9211_v39  ;;  %v11259_v39 = vpack.c.bf16 %v2263_v36, %v2262_v13 }
 0x8a4   :  { %9237 = vmatprep.subr.bf16.mxu0 %v10266_v2 }
 0x8a5   :  { %9284 = vmatpush3.bf16.msra.mxu1 %v11186_v30 }
 0x8a6   :  { %9309 = vmatprep.subr.bf16.mxu1 %v10266_v2 }
 0x93b   :  { %v2004_v48 = vpop.f32.mrb[22].mxu1 }
 0x93c   :  { %v7422_v54 = vpop.f32.mrb[23].mxu1 }
 0x959   :  { %v1934_v4 = vpop.f32.mrb[22].mxu0 }
 0x95a   :  { %v1935_v58 = vadd.f32 %v10137_v55, %v1934_v4  ;;  %v7387_v61 = vpop.f32.mrb[23].mxu0  ;;  %v10279_v55 = vmov 9  }
 0x95b   :  { %v2235_v63 = vpop.f32.mrb[24].mxu1  ;;  %10054 = vset.pattern.permute.xlu0 %v10279_v55 }
 0x95c   :  { %v2008_v0 = vadd.f32 %v2004_v48, %v1935_v58  ;;  %v7492_v5 = vpop.f32.mrb[25].mxu1  ;;  %v2265_v48 = vld [vmem:[#allocation8 + $0xf8] sm:$0xff]  ;;  %4908 = vperm.xlu0 %10054, %v11085_v8  }
 0x95d   :  { %v11265_v54 = vpack.c.bf16 %v2265_v48, %v2264_v40  ;;  %v5536_v8 = vld [vmem:[%s12159_s18] ss:$0 sm:$0xff] }
 0x95e   :  { %v2009_v23 = vadd.f32 %v10138_v7, %v2008_v0 }
 0x960   :  { %10087 = vtanh.f32 %v2009_v23  ;;  %10056 = vset.pattern.permute.xlu0 %v10278_v43  ;;  %v11320_v43 = vld [vmem:[%s12153_s12 + $0x1] ss:$0 sm:$0xff] }
 0x96a   :  { %v10088_v57 = vpop.eup %10087 }
 0x96b   :  { %7561 = vmatmul.mubr.f32.vlgmr.msra.gmra.mrb[26].mxu1 %v10088_v57  ;;  %v2011_v20 = vadd.f32 %v10088_v57, %v11106_v56  ;;  %v11217_v56 = vld [vmem:[%s12149_s8] ss:$0 sm:$0xff] }
 0x96c   :  { %9311 = vmatpush3.bf16.msra.mxu1 %v11202_v19  ;;  %7630 = vmatprep.mubr.msk.f32.mxu1 %vm10267_vm0, %v10268_v3  ;;  %v2145_v50 = vmul.f32 %v11217_v56, %v2137_v38  ;;  %v2471_v62 = vmul.f32 %v11217_v56, %v2469_v53 }
 0x96d   :  { %v2012_v25 = vmul.f32 0.125, %v2011_v20  ;;  %9312 = vmatprep.subr.bf16.mxu1 %v10266_v2 }
 0x96e   :  { %v2152_v21 = vadd.f32 %v11229_v1, %v2145_v50 }
 0x96f   :  { %7456 = vmatmul.mubr.f32.vlgmr.msra.gmra.mrb[24].mxu0 %v2012_v25 }
 0x970   :  { %9239 = vmatpush3.bf16.msra.mxu0 %v11202_v19  ;;  %7525 = vmatprep.mubr.msk.f32.mxu0 %vm10267_vm0, %v10268_v3  ;;  %v2239_v46 = vadd.f32 %v2235_v63, %v2152_v21  ;;  %v5535_v63 = vld [vmem:[%s12158_s17] ss:$0 sm:$0xff]  ;;  %v2472_v21 = vadd.f32 %v11229_v1, %v2471_v62  ;;  %v3095_v62 = vld [vmem:[#allocation9 + $0x60] sm:$0xff] }
 0x971   :  { %9240 = vmatprep.subr.bf16.mxu0 %v10266_v2  ;;  %9314 = vmatpush3.bf16.msra.mxu1 %v11209_v31 }
 0x972   :  { %9315 = vmatprep.subr.bf16.mxu1 %v10266_v2  ;;  %v2247_v27 = vadd.f32 %v11247_v6, %v2239_v46 }
 0x974   :  { %9242 = vmatpush3.bf16.msra.mxu0 %v11209_v31  ;;  %10089 = vtanh.f32 %v2247_v27 }
 0x975   :  { %9243 = vmatprep.subr.bf16.mxu0 %v10266_v2  ;;  %9317 = vmatpush3.bf16.msra.mxu1 %v11222_v41 }
 0x976   :  { %9318 = vmatprep.subr.bf16.mxu1 %v10266_v2 }
 0x978   :  { %9245 = vmatpush3.bf16.msra.mxu0 %v11222_v41 }
 0x979   :  { %9246 = vmatprep.subr.bf16.mxu0 %v10266_v2  ;;  %9320 = vmatpush3.bf16.msra.mxu1 %v11234_v9 }
 0x97a   :  { %9321 = vmatprep.subr.bf16.mxu1 %v10266_v2 }
 0x97c   :  { %9248 = vmatpush3.bf16.msra.mxu0 %v11234_v9 }
 0x97d   :  { %9249 = vmatprep.subr.bf16.mxu0 %v10266_v2  ;;  %9323 = vmatpush3.bf16.msra.mxu1 %v11241_v45 }
 0x97e   :  { %9324 = vmatprep.subr.bf16.mxu1 %v10266_v2  ;;  %v10090_v4 = vpop.eup %10089 }
 0x980   :  { %9251 = vmatpush3.bf16.msra.mxu0 %v11241_v45 }
 0x981   :  { %9252 = vmatprep.subr.bf16.mxu0 %v10266_v2  ;;  %9326 = vmatpush3.bf16.msra.mxu1 %v11252_v24 }
 0x982   :  { %9327 = vmatprep.subr.bf16.mxu1 %v10266_v2 }
 0x984   :  { %9254 = vmatpush3.bf16.msra.mxu0 %v11252_v24 }
 0x985   :  { %9255 = vmatprep.subr.bf16.mxu0 %v10266_v2  ;;  %9329 = vmatpush3.bf16.msra.mxu1 %v11259_v39 }
 0x986   :  { %9330 = vmatprep.subr.bf16.mxu1 %v10266_v2 }
 0x988   :  { %9257 = vmatpush3.bf16.msra.mxu0 %v11259_v39 }
 0x989   :  { %9258 = vmatprep.subr.bf16.mxu0 %v10266_v2  ;;  %9332 = vmatpush3.bf16.msra.mxu1 %v11265_v54 }
 0x98a   :  { %9357 = vmatprep.subr.bf16.mxu1 %v10266_v2 }
 0x98c   :  { %9260 = vmatpush3.bf16.msra.mxu0 %v11265_v54 }
 0x98d   :  { %9285 = vmatprep.subr.bf16.mxu0 %v10266_v2 }
 0x98f   :  { %7526 = vmatmul.mubr.f32.vlgmr.msra.gmra.mrb[26].mxu0 %v10090_v4 }
 0x990   :  { %9287 = vmatpush3.bf16.msra.mxu0 %v11103_v44  ;;  %7595 = vmatprep.mubr.msk.f32.mxu0 %vm10267_vm0, %v10268_v3 }
 0x991   :  { %9288 = vmatprep.subr.bf16.mxu0 %v10266_v2 }
 0x994   :  { %9290 = vmatpush3.bf16.msra.mxu0 %v11109_v59 }
 0x995   :  { %9291 = vmatprep.subr.bf16.mxu0 %v10266_v2 }
 0x998   :  { %9293 = vmatpush3.bf16.msra.mxu0 %v11115_v15 }
 0x999   :  { %9294 = vmatprep.subr.bf16.mxu0 %v10266_v2 }
 0x99c   :  { %9296 = vmatpush3.bf16.msra.mxu0 %v11122_v33 }
 0x99d   :  { %9297 = vmatprep.subr.bf16.mxu0 %v10266_v2 }
 0x9a0   :  { %9299 = vmatpush3.bf16.msra.mxu0 %v11129_v51 }
 0x9a1   :  { %9300 = vmatprep.subr.bf16.mxu0 %v10266_v2 }
 0x9a4   :  { %9302 = vmatpush3.bf16.msra.mxu0 %v11136_v37 }
 0x9a5   :  { %9303 = vmatprep.subr.bf16.mxu0 %v10266_v2 }
 0x9a8   :  { %9305 = vmatpush3.bf16.msra.mxu0 %v11140_v42 }
 0x9a9   :  { %9306 = vmatprep.subr.bf16.mxu0 %v10266_v2 }
 0x9ac   :  { %9308 = vmatpush3.bf16.msra.mxu0 %v11144_v49 }
 0x9ad   :  { %9333 = vmatprep.subr.bf16.mxu0 %v10266_v2 }
 0x9af   :  { %7596 = vmatmul.mubr.f32.vlgmr.msra.gmra.mrb[28].mxu0 %v10090_v4 }
 0x9b0   :  { %9335 = vmatpush3.bf16.msra.mxu0 %v11153_v60  ;;  %7665 = vmatprep.mubr.msk.f32.mxu0 %vm10267_vm0, %v10268_v3 }
 0x9b1   :  { %9336 = vmatprep.subr.bf16.mxu0 %v10266_v2 }
 0x9b4   :  { %9338 = vmatpush3.bf16.msra.mxu0 %v11156_v12 }
 0x9b5   :  { %9339 = vmatprep.subr.bf16.mxu0 %v10266_v2 }
 0x9b8   :  { %9341 = vmatpush3.bf16.msra.mxu0 %v11161_v22 }
 0x9b9   :  { %9342 = vmatprep.subr.bf16.mxu0 %v10266_v2 }
 0x9bc   :  { %9344 = vmatpush3.bf16.msra.mxu0 %v11166_v28 }
 0x9bd   :  { %9345 = vmatprep.subr.bf16.mxu0 %v10266_v2 }
 0x9c0   :  { %9347 = vmatpush3.bf16.msra.mxu0 %v11172_v47 }
 0x9c1   :  { %9348 = vmatprep.subr.bf16.mxu0 %v10266_v2 }
 0x9c4   :  { %9350 = vmatpush3.bf16.msra.mxu0 %v11177_v18 }
 0x9c5   :  { %9351 = vmatprep.subr.bf16.mxu0 %v10266_v2 }
 0x9c8   :  { %9353 = vmatpush3.bf16.msra.mxu0 %v11182_v32 }
 0x9c9   :  { %9354 = vmatprep.subr.bf16.mxu0 %v10266_v2 }
 0x9cc   :  { %9356 = vmatpush3.bf16.msra.mxu0 %v11186_v30 }
 0x9cd   :  { %9381 = vmatprep.subr.bf16.mxu0 %v10266_v2 }
 0xa3e   :  { %v2427_v58 = vpop.f32.mrb[26].mxu1 }
 0xa3f   :  { %v7562_v61 = vpop.f32.mrb[27].mxu1 }
 0xa40   :  { %v3083_v61 = vld [vmem:[#allocation9] sm:$0xff] }
 0xa42   :  { %v2102_v0 = vpop.f32.mrb[24].mxu0 }
 0xa43   :  { %v2103_v5 = vadd.f32 %v5535_v63, %v2102_v0  ;;  %v7457_v7 = vpop.f32.mrb[25].mxu0  ;;  %v3084_v63 = vld [vmem:[#allocation9 + $0x8] sm:$0xff] }
 0xa44   :  { %v11433_v0 = vpack.c.bf16 %v3084_v63, %v3083_v61  ;;  %v3086_v7 = vld [vmem:[#allocation9 + $0x18] sm:$0xff] }
 0xa45   :  { %v2107_v23 = vmul.f32 0.01, %v2103_v5  ;;  %vm2106_vm1 = vcmp.ge.f32.partialorder %v2103_v5, 0.0  ;;  %v3287_v61 = vld [vmem:[#allocation9 + $0xf8] sm:$0xff] }
 0xa47   :  { %v2108_v14 = vsel %vm2106_vm1, %v2103_v5, %v2107_v23  ;;  %v3085_v5 = vld [vmem:[#allocation9 + $0x10] sm:$0xff]  ;;  %vm3683_vm1 = vcmask 48168  }
 0xa48   :  { %v2116_v17 = vmul.f32 %v5536_v8, %v2108_v14  ;;  %v3087_v8 = vld [vmem:[#allocation9 + $0x20] sm:$0xff] }
 0xa4a   :  { %2117 = vadd.xlane.f32.xlu1 %v2116_v17  ;;  %v3089_v17 = vld [vmem:[#allocation9 + $0x30] sm:$0xff] }
 0xa62   :  { %v2340_v57 = vpop.f32.mrb[26].mxu0 }
 0xa63   :  { %v2341_v20 = vadd.f32 %v11320_v43, %v2340_v57  ;;  %v7527_v10 = vpop.f32.mrb[27].mxu0  ;;  %v3090_v57 = vld [vmem:[#allocation9 + $0x38] sm:$0xff] }
 0xa64   :  { %v3091_v10 = vld [vmem:[#allocation9 + $0x40] sm:$0xff] }
 0xa65   :  { %v2431_v25 = vadd.f32 %v2427_v58, %v2341_v20  ;;  %v11446_v20 = vpack.c.bf16 %v3090_v57, %v3089_v17  ;;  %v3187_v57 = vld [vmem:[#allocation8 + $0xc0] sm:$0xff] }
 0xa67   :  { %v2440_v34 = vadd.f32 %v11326_v16, %v2431_v25  ;;  %v3092_v25 = vld [vmem:[#allocation9 + $0x48] sm:$0xff] }
 0xa69   :  { %10091 = vtanh.f32 %v2440_v34  ;;  %v11450_v34 = vpack.c.bf16 %v3092_v25, %v3091_v10  ;;  %v3188_v10 = vld [vmem:[#allocation8 + $0xc8] sm:$0xff] }
 0xa73   :  { %v10092_v38 = vpop.eup %10091 }
 0xa74   :  { %7666 = vmatmul.mubr.f32.vlgmr.msra.gmra.mrb[30].mxu0 %v10092_v38  ;;  %v2448_v50 = vmul.f32 %v10092_v38, %v11332_v35  ;;  %v3093_v38 = vld [vmem:[#allocation9 + $0x50] sm:$0xff] }
 0xa75   :  { %9383 = vmatpush3.bf16.msra.mxu0 %v11202_v19  ;;  %7735 = vmatprep.mubr.msk.f32.mxu0 %vm10267_vm0, %v10268_v3 }
 0xa76   :  { %2449 = vadd.xlane.f32.xlu0 %v2448_v50  ;;  %9384 = vmatprep.subr.bf16.mxu0 %v10266_v2  ;;  %v3094_v50 = vld [vmem:[#allocation9 + $0x58] sm:$0xff] }
 0xa77   :  { %v11454_v53 = vpack.c.bf16 %v3094_v50, %v3093_v38  ;;  %v11509_v38 = vpack.c.bf16 %v3188_v10, %v3187_v57 }
 0xa79   :  { %9386 = vmatpush3.bf16.msra.mxu0 %v11209_v31 }
 0xa7a   :  { %9387 = vmatprep.subr.bf16.mxu0 %v10266_v2 }
 0xa7d   :  { %9389 = vmatpush3.bf16.msra.mxu0 %v11222_v41 }
 0xa7e   :  { %9390 = vmatprep.subr.bf16.mxu0 %v10266_v2 }
 0xa81   :  { %9392 = vmatpush3.bf16.msra.mxu0 %v11234_v9 }
 0xa82   :  { %v2555_v26 = vpop.f32.mrb[28].mxu0  ;;  %9393 = vmatprep.subr.bf16.mxu0 %v10266_v2 }
 0xa83   :  { %v2559_v29 = vadd.f32 %v2555_v26, %v2472_v21  ;;  %v7597_v46 = vpop.f32.mrb[29].mxu0  ;;  %v3096_v21 = vld [vmem:[#allocation9 + $0x68] sm:$0xff] }
 0xa84   :  { %v11458_v26 = vpack.c.bf16 %v3096_v21, %v3095_v62  ;;  %v3098_v46 = vld [vmem:[#allocation9 + $0x78] sm:$0xff]  ;;  %v3189_v62 = vld [vmem:[#allocation8 + $0xd0] sm:$0xff] }
 0xa85   :  { %v2567_v52 = vadd.f32 %v11247_v6, %v2559_v29  ;;  %9395 = vmatpush3.bf16.msra.mxu0 %v11241_v45  ;;  %v3097_v29 = vld [vmem:[#allocation9 + $0x70] sm:$0xff]  ;;  %v3190_v21 = vld [vmem:[#allocation8 + $0xd8] sm:$0xff] }
 0xa86   :  { %9396 = vmatprep.subr.bf16.mxu0 %v10266_v2 }
 0xa87   :  { %10093 = vtanh.f32 %v2567_v52  ;;  %v11462_v52 = vpack.c.bf16 %v3098_v46, %v3097_v29  ;;  %v11519_v46 = vpack.c.bf16 %v3190_v21, %v3189_v62  ;;  %v3486_v21 = vld [vmem:[#allocation8 + $0x90] sm:$0xff] }
 0xa89   :  { %9398 = vmatpush3.bf16.msra.mxu0 %v11252_v24 }
 0xa8a   :  { %9399 = vmatprep.subr.bf16.mxu0 %v10266_v2 }
 0xa8d   :  { %9401 = vmatpush3.bf16.msra.mxu0 %v11259_v39 }
 0xa8e   :  { %9402 = vmatprep.subr.bf16.mxu0 %v10266_v2 }
 0xa91   :  { %v10094_v41 = vpop.eup %10093  ;;  %9404 = vmatpush3.bf16.msra.mxu0 %v11265_v54 }
 0xa92   :  { %7631 = vmatmul.mubr.f32.vlgmr.msra.gmra.mrb[28].mxu1 %v10094_v41  ;;  %9429 = vmatprep.subr.bf16.mxu0 %v10266_v2 }
 0xa93   :  { %9359 = vmatpush3.bf16.msra.mxu1 %v11103_v44  ;;  %7700 = vmatprep.mubr.msk.f32.mxu1 %vm10267_vm0, %v10268_v3  ;;  %v2774_v44 = vpop.permute.xlu1 %2773 }
 0xa94   :  { %9360 = vmatprep.subr.bf16.mxu1 %v10266_v2  ;;  %v2776_v48 = vmul.f32 %v11217_v56, %v2774_v44  ;;  %v3273_v44 = vld [vmem:[#allocation9 + $0x88] sm:$0xff] }
 0xa96   :  { %v2777_v54 = vadd.f32 %v11229_v1, %v2776_v48  ;;  %v3283_v48 = vld [vmem:[#allocation9 + $0xd8] sm:$0xff] }
 0xa97   :  { %9362 = vmatpush3.bf16.msra.mxu1 %v11109_v59  ;;  %v11380_v59 = vpop.permute.xlu1 %3383 }
 0xa98   :  { %9363 = vmatprep.subr.bf16.mxu1 %v10266_v2 }
 0xa9b   :  { %9365 = vmatpush3.bf16.msra.mxu1 %v11115_v15  ;;  %v11384_v15 = vpop.permute.xlu1 %3688 }
 0xa9c   :  { %9366 = vmatprep.subr.bf16.mxu1 %v10266_v2 }
 0xa9f   :  { %9368 = vmatpush3.bf16.msra.mxu1 %v11122_v33  ;;  %v11390_v33 = vpop.permute.xlu1 %4298 }
 0xaa0   :  { %9369 = vmatprep.subr.bf16.mxu1 %v10266_v2 }
 0xaa3   :  { %9371 = vmatpush3.bf16.msra.mxu1 %v11129_v51  ;;  %v11394_v51 = vpop.permute.xlu1 %4603 }
 0xaa4   :  { %9372 = vmatprep.subr.bf16.mxu1 %v10266_v2 }
 0xaa7   :  { %9374 = vmatpush3.bf16.msra.mxu1 %v11136_v37  ;;  %v11400_v37 = vpop.permute.xlu1 %5213 }
 0xaa8   :  { %9375 = vmatprep.subr.bf16.mxu1 %v10266_v2 }
 0xaab   :  { %9377 = vmatpush3.bf16.msra.mxu1 %v11140_v42  ;;  %v5537_v42 = vld [vmem:[#allocation3] ss:$0 sm:$0xff] }
 0xaac   :  { %9378 = vmatprep.subr.bf16.mxu1 %v10266_v2 }
 0xaaf   :  { %9380 = vmatpush3.bf16.msra.mxu1 %v11144_v49 }
 0xab0   :  { %9405 = vmatprep.subr.bf16.mxu1 %v10266_v2 }
 0xab2   :  { %7701 = vmatmul.mubr.f32.vlgmr.msra.gmra.mrb[30].mxu1 %v10094_v41  ;;  %v3272_v41 = vld [vmem:[#allocation9 + $0x80] sm:$0xff] }
 0xab3   :  { %9407 = vmatpush3.bf16.msra.mxu1 %v11153_v60  ;;  %7770 = vmatprep.mubr.msk.f32.mxu1 %vm10267_vm0, %v10268_v3 }
 0xab4   :  { %9408 = vmatprep.subr.bf16.mxu1 %v10266_v2 }
 0xab7   :  { %9410 = vmatpush3.bf16.msra.mxu1 %v11156_v12  ;;  %v11406_v12 = vpop.permute.xlu0 %3078 }
 0xab8   :  { %9411 = vmatprep.subr.bf16.mxu1 %v10266_v2 }
 0xabb   :  { %9413 = vmatpush3.bf16.msra.mxu1 %v11161_v22  ;;  %v11408_v22 = vpop.permute.xlu0 %3993 }
 0xabc   :  { %9414 = vmatprep.subr.bf16.mxu1 %v10266_v2 }
 0xabf   :  { %9416 = vmatpush3.bf16.msra.mxu1 %v11166_v28  ;;  %v11410_v28 = vpop.permute.xlu0 %4908 }
 0xac0   :  { %9417 = vmatprep.subr.bf16.mxu1 %v10266_v2 }
 0xac3   :  { %9419 = vmatpush3.bf16.msra.mxu1 %v11172_v47  ;;  %v11412_v47 = vld [vmem:[#allocation2] ss:$0 sm:$0xff] }
 0xac4   :  { %9420 = vmatprep.subr.bf16.mxu1 %v10266_v2 }
 0xac7   :  { %9422 = vmatpush3.bf16.msra.mxu1 %v11177_v18 }
 0xac8   :  { %9423 = vmatprep.subr.bf16.mxu1 %v10266_v2 }
 0xacb   :  { %9425 = vmatpush3.bf16.msra.mxu1 %v11182_v32 }
 0xacc   :  { %9426 = vmatprep.subr.bf16.mxu1 %v10266_v2 }
 0xacf   :  { %9428 = vmatpush3.bf16.msra.mxu1 %v11186_v30 }
 0xad0   :  { %9453 = vmatprep.subr.bf16.mxu1 %v10266_v2 }
 0xad7   :  { %v2118_v49 = vpop.xlane.xlu1 %2117 }
 0xad8   :  { %v2126_v60 = vadd.f32 %v5537_v42, %v2118_v49  ;;  %v3274_v42 = vld [vmem:[#allocation9 + $0x90] sm:$0xff]  ;;  %v11469_v49 = vpack.c.bf16 %v3273_v44, %v3272_v41  ;;  %v3191_v41 = vld [vmem:[#allocation8 + $0xe0] sm:$0xff]  ;;  %v3192_v44 = vld [vmem:[#allocation8 + $0xe8] sm:$0xff] }
 0xada   :  { %2128 = vst.msk [vmem:[%s12161_s21] sm:$0xff] %vm2127_vm2, %v2126_v60  ;;  %v3275_v60 = vld [vmem:[#allocation9 + $0x98] sm:$0xff] }
 0xb03   :  { %v2450_v18 = vpop.xlane.xlu0 %2449 }
 0xb04   :  { %v11415_v32 = vadd.f32 %v11412_v47, %v2450_v18  ;;  %v11472_v18 = vpack.c.bf16 %v3275_v60, %v3274_v42  ;;  %v11523_v42 = vpack.c.bf16 %v3192_v44, %v3191_v41  ;;  %v3194_v60 = vld [vmem:[#allocation8 + $0xf8] sm:$0xff] }
 0xb05   :  { %v3487_v41 = vld [vmem:[#allocation8 + $0x98] sm:$0xff] }
 0xb06   :  { %2460 = vrot.lane.b32.xlu0 %v11415_v32, %s10280_s4  ;;  %vm2458_vm4 = vcmp.eq.f32.partialorder %v11415_v32, -10002.0  ;;  %v3193_v32 = vld [vmem:[#allocation8 + $0xf0] sm:$0xff]  ;;  %v11588_v44 = vpack.c.bf16 %v3487_v41, %v3486_v21 }
 0xb47   :  { %v2744_v30 = vpop.f32.mrb[30].mxu0 }
 0xb48   :  { %v7667_v9 = vpop.f32.mrb[31].mxu0 }
 0xb49   :  { %v3277_v9 = vld [vmem:[#allocation9 + $0xa8] sm:$0xff] }
 0xb65   :  { %v2658_v45 = vpop.f32.mrb[28].mxu1 }
 0xb66   :  { %v2659_v11 = vadd.f32 %v11320_v43, %v2658_v45  ;;  %v7632_v24 = vpop.f32.mrb[29].mxu1 }
 0xb67   :  { %v3279_v24 = vld [vmem:[#allocation9 + $0xb8] sm:$0xff] }
 0xb68   :  { %v2748_v27 = vadd.f32 %v2744_v30, %v2659_v11  ;;  %v3276_v30 = vld [vmem:[#allocation9 + $0xa0] sm:$0xff]  ;;  %v3278_v11 = vld [vmem:[#allocation9 + $0xb0] sm:$0xff] }
 0xb69   :  { %v11476_v45 = vpack.c.bf16 %v3277_v9, %v3276_v30  ;;  %v11526_v30 = vpack.c.bf16 %v3194_v60, %v3193_v32 }
 0xb6a   :  { %v2756_v13 = vadd.f32 %v11326_v16, %v2748_v27  ;;  %v11480_v27 = vpack.c.bf16 %v3279_v24, %v3278_v11 }
 0xb6c   :  { %10095 = vtanh.f32 %v2756_v13  ;;  %v3280_v13 = vld [vmem:[#allocation9 + $0xc0] sm:$0xff] }
 0xb76   :  { %v10096_v36 = vpop.eup %10095 }
 0xb77   :  { %7771 = vmatmul.mubr.f32.vlgmr.msra.gmra.mrb[32].mxu1 %v10096_v36  ;;  %v2758_v39 = vmul.f32 %v10096_v36, %v11332_v35  ;;  %v3281_v36 = vld [vmem:[#allocation9 + $0xc8] sm:$0xff] }
 0xb78   :  { %v2461_v40 = vpop.permute.xlu0 %2460  ;;  %9455 = vmatpush3.bf16.msra.mxu1 %v11202_v19  ;;  %7840 = vmatprep.mubr.msk.f32.mxu1 %vm10267_vm0, %v10268_v3 }
 0xb79   :  { %2464 = vst.msk [vmem:[%s12160_s20] sm:$0xff] %vm2463_vm3, %v2461_v40  ;;  %2759 = vadd.xlane.f32.xlu1 %v2758_v39  ;;  %9456 = vmatprep.subr.bf16.mxu1 %v10266_v2  ;;  %v11485_v39 = vpack.c.bf16 %v3281_v36, %v3280_v13  ;;  %v3282_v40 = vld [vmem:[#allocation9 + $0xd0] sm:$0xff] }
 0xb7c   :  { %9458 = vmatpush3.bf16.msra.mxu1 %v11209_v31  ;;  %v11436_v31 = vpack.c.bf16 %v3086_v7, %v3085_v5  ;;  %v3183_v5 = vld [vmem:[#allocation8 + $0xa0] sm:$0xff]  ;;  %v3184_v7 = vld [vmem:[#allocation8 + $0xa8] sm:$0xff] }
 0xb7d   :  { %9459 = vmatprep.subr.bf16.mxu1 %v10266_v2 }
 0xb85   :  { %v2860_v4 = vpop.f32.mrb[30].mxu1 }
 0xb86   :  { %v2864_v19 = vadd.f32 %v2860_v4, %v2777_v54  ;;  %v7702_v55 = vpop.f32.mrb[31].mxu1  ;;  %v11489_v54 = vpack.c.bf16 %v3283_v48, %v3282_v40  ;;  %v3284_v4 = vld [vmem:[#allocation9 + $0xe0] sm:$0xff] }
 0xb88   :  { %v2872_v58 = vadd.f32 %v11247_v6, %v2864_v19  ;;  %v3088_v6 = vld [vmem:[#allocation9 + $0x28] sm:$0xff] }
 0xb89   :  { %v11442_v14 = vpack.c.bf16 %v3088_v6, %v3087_v8  ;;  %v3285_v19 = vld [vmem:[#allocation9 + $0xe8] sm:$0xff]  ;;  %v11501_v8 = vpack.c.bf16 %v3184_v7, %v3183_v5  ;;  %v3186_v6 = vld [vmem:[#allocation8 + $0xb8] sm:$0xff] }
 0xb8a   :  { %10097 = vtanh.f32 %v2872_v58  ;;  %v11492_v55 = vpack.c.bf16 %v3285_v19, %v3284_v4  ;;  %v3286_v58 = vld [vmem:[#allocation9 + $0xf0] sm:$0xff] }
 0xb8b   :  { %v11496_v63 = vpack.c.bf16 %v3287_v61, %v3286_v58  ;;  %9461 = vmatpush3.bf16.msra.mxu1 %v11501_v8  ;;  %v3081_v61 = vmul.f32 %v11217_v56, %v11406_v12  ;;  %v3484_v12 = vld [vmem:[#allocation8 + $0x80] sm:$0xff] }
 0xb8c   :  { %9462 = vmatprep.subr.bf16.mxu1 %v10266_v2 }
 0xb8d   :  { %v3082_v5 = vadd.f32 %v11229_v1, %v3081_v61 }
 0xb94   :  { %v10098_v23 = vpop.eup %10097 }
 0xb95   :  { %7736 = vmatmul.mubr.f32.vlgmr.msra.gmra.mrb[32].mxu0 %v10098_v23 }
 0xb96   :  { %9431 = vmatpush3.bf16.msra.mxu0 %v11433_v0  ;;  %7805 = vmatprep.mubr.msk.f32.mxu0 %vm10267_vm0, %v10268_v3 }
 0xb97   :  { %9432 = vmatprep.subr.bf16.mxu0 %v10266_v2 }
 0xb9a   :  { %9434 = vmatpush3.bf16.msra.mxu0 %v11436_v31 }
 0xb9b   :  { %9435 = vmatprep.subr.bf16.mxu0 %v10266_v2 }
 0xb9e   :  { %9437 = vmatpush3.bf16.msra.mxu0 %v11442_v14 }
 0xb9f   :  { %9438 = vmatprep.subr.bf16.mxu0 %v10266_v2 }
 0xba2   :  { %9440 = vmatpush3.bf16.msra.mxu0 %v11446_v20 }
 0xba3   :  { %9441 = vmatprep.subr.bf16.mxu0 %v10266_v2 }
 0xba6   :  { %9443 = vmatpush3.bf16.msra.mxu0 %v11450_v34 }
 0xba7   :  { %9444 = vmatprep.subr.bf16.mxu0 %v10266_v2 }
 0xbaa   :  { %9446 = vmatpush3.bf16.msra.mxu0 %v11454_v53 }
 0xbab   :  { %9447 = vmatprep.subr.bf16.mxu0 %v10266_v2 }
 0xbae   :  { %9449 = vmatpush3.bf16.msra.mxu0 %v11458_v26 }
 0xbaf   :  { %9450 = vmatprep.subr.bf16.mxu0 %v10266_v2 }
 0xbb2   :  { %9452 = vmatpush3.bf16.msra.mxu0 %v11462_v52 }
 0xbb3   :  { %9477 = vmatprep.subr.bf16.mxu0 %v10266_v2 }
 0xbb5   :  { %7806 = vmatmul.mubr.f32.vlgmr.msra.gmra.mrb[34].mxu0 %v10098_v23  ;;  %v3185_v23 = vld [vmem:[#allocation8 + $0xb0] sm:$0xff] }
 0xbb6   :  { %7875 = vmatprep.mubr.msk.f32.mxu0 %vm10267_vm0, %v10268_v3  ;;  %9479 = vmatpush3.bf16.msra.mxu0 %v11469_v49  ;;  %v11504_v17 = vpack.c.bf16 %v3186_v6, %v3185_v23  ;;  %v11545_v23 = vld [vmem:[%s12154_s13] ss:$0 sm:$0xff] }
 0xbb7   :  { %9480 = vmatprep.subr.bf16.mxu0 %v10266_v2 }
 0xbb8   :  { %9464 = vmatpush3.bf16.msra.mxu1 %v11504_v17 }
 0xbb9   :  { %9465 = vmatprep.subr.bf16.mxu1 %v10266_v2 }
 0xbba   :  { %9482 = vmatpush3.bf16.msra.mxu0 %v11472_v18 }
 0xbbb   :  { %9483 = vmatprep.subr.bf16.mxu0 %v10266_v2 }
 0xbbc   :  { %9467 = vmatpush3.bf16.msra.mxu1 %v11509_v38 }
 0xbbd   :  { %9468 = vmatprep.subr.bf16.mxu1 %v10266_v2 }
 0xbbe   :  { %9485 = vmatpush3.bf16.msra.mxu0 %v11476_v45 }
 0xbbf   :  { %9486 = vmatprep.subr.bf16.mxu0 %v10266_v2 }
 0xbc0   :  { %9470 = vmatpush3.bf16.msra.mxu1 %v11519_v46 }
 0xbc1   :  { %9471 = vmatprep.subr.bf16.mxu1 %v10266_v2 }
 0xbc2   :  { %9488 = vmatpush3.bf16.msra.mxu0 %v11480_v27 }
 0xbc3   :  { %9489 = vmatprep.subr.bf16.mxu0 %v10266_v2 }
 0xbc4   :  { %9473 = vmatpush3.bf16.msra.mxu1 %v11523_v42 }
 0xbc5   :  { %9474 = vmatprep.subr.bf16.mxu1 %v10266_v2 }
 0xbc6   :  { %9491 = vmatpush3.bf16.msra.mxu0 %v11485_v39 }
 0xbc7   :  { %9492 = vmatprep.subr.bf16.mxu0 %v10266_v2 }
 0xbc8   :  { %9476 = vmatpush3.bf16.msra.mxu1 %v11526_v30 }
 0xbc9   :  { %9501 = vmatprep.subr.bf16.mxu1 %v10266_v2 }
 0xbca   :  { %9494 = vmatpush3.bf16.msra.mxu0 %v11489_v54 }
 0xbcb   :  { %9495 = vmatprep.subr.bf16.mxu0 %v10266_v2 }
 0xbce   :  { %9497 = vmatpush3.bf16.msra.mxu0 %v11492_v55 }
 0xbcf   :  { %9498 = vmatprep.subr.bf16.mxu0 %v10266_v2 }
 0xbd2   :  { %9500 = vmatpush3.bf16.msra.mxu0 %v11496_v63 }
 0xbd3   :  { %9525 = vmatprep.subr.bf16.mxu0 %v10266_v2 }
 0xc06   :  { %v2760_v25 = vpop.xlane.xlu1 %2759 }
 0xc07   :  { %v2761_v50 = vadd.f32 %v11412_v47, %v2760_v25 }
 0xc09   :  { %vm2762_vm5 = vcmp.eq.f32.partialorder %v2761_v50, -10002.0  ;;  %2765 = vrot.lane.b32.xlu1 %v2761_v50, %s10281_s19  ;;  %v3485_v50 = vld [vmem:[#allocation8 + $0x88] sm:$0xff] }
 0xc0a   :  { %vm11515_vm6 = vmor %vm2458_vm4, %vm2762_vm5  ;;  %v11584_v62 = vpack.c.bf16 %v3485_v50, %v3484_v12  ;;  %v11685_v12 = vld [vmem:[%s12153_s12 + $0x1] ss:$0 sm:$0xff]  ;;  %vm3988_vm5 = vcmask 56368  }
 0xc4a   :  { %v3049_v9 = vpop.f32.mrb[32].mxu1 }
 0xc4b   :  { %v7772_v11 = vpop.f32.mrb[33].mxu1 }
 0xc68   :  { %v2963_v24 = vpop.f32.mrb[32].mxu0 }
 0xc69   :  { %v2964_v13 = vadd.f32 %v11320_v43, %v2963_v24  ;;  %v7737_v36 = vpop.f32.mrb[33].mxu0 }
 0xc6b   :  { %v3053_v40 = vadd.f32 %v3049_v9, %v2964_v13 }
 0xc6d   :  { %v3061_v48 = vadd.f32 %v11326_v16, %v3053_v40 }
 0xc6f   :  { %10099 = vtanh.f32 %v3061_v48 }
 0xc79   :  { %v10100_v4 = vpop.eup %10099 }
 0xc7a   :  { %7876 = vmatmul.mubr.f32.vlgmr.msra.gmra.mrb[36].mxu0 %v10100_v4  ;;  %v3063_v19 = vmul.f32 %v10100_v4, %v11332_v35 }
 0xc7b   :  { %v2766_v58 = vpop.permute.xlu1 %2765  ;;  %7945 = vmatprep.mubr.msk.f32.mxu0 %vm10267_vm0, %v10268_v3  ;;  %9527 = vmatpush3.bf16.msra.mxu0 %v11584_v62 }
 0xc7c   :  { %2769 = vst.msk [vmem:[%s12160_s20] sm:$0xff] %vm2768_vm7, %v2766_v58  ;;  %3064 = vadd.xlane.f32.xlu0 %v3063_v19  ;;  %9528 = vmatprep.subr.bf16.mxu0 %v10266_v2 }
 0xc7f   :  { %9530 = vmatpush3.bf16.msra.mxu0 %v11588_v44 }
 0xc80   :  { %9531 = vmatprep.subr.bf16.mxu0 %v10266_v2 }
 0xc83   :  { %9533 = vmatpush3.bf16.msra.mxu0 %v11501_v8 }
 0xc84   :  { %9534 = vmatprep.subr.bf16.mxu0 %v10266_v2 }
 0xc87   :  { %9536 = vmatpush3.bf16.msra.mxu0 %v11504_v17 }
 0xc88   :  { %v3165_v7 = vpop.f32.mrb[34].mxu0  ;;  %9537 = vmatprep.subr.bf16.mxu0 %v10266_v2 }
 0xc89   :  { %v3169_v6 = vadd.f32 %v3165_v7, %v3082_v5  ;;  %v7807_v57 = vpop.f32.mrb[35].mxu0 }
 0xc8a   :  { %v4314_v57 = vld [vmem:[#allocation9 + $0x58] sm:$0xff] }
 0xc8b   :  { %v3177_v10 = vadd.f32 %v11545_v23, %v3169_v6  ;;  %9539 = vmatpush3.bf16.msra.mxu0 %v11509_v38 }
 0xc8c   :  { %9540 = vmatprep.subr.bf16.mxu0 %v10266_v2 }
 0xc8d   :  { %10101 = vtanh.f32 %v3177_v10 }
 0xc8f   :  { %9542 = vmatpush3.bf16.msra.mxu0 %v11519_v46 }
 0xc90   :  { %9543 = vmatprep.subr.bf16.mxu0 %v10266_v2 }
 0xc93   :  { %9545 = vmatpush3.bf16.msra.mxu0 %v11523_v42 }
 0xc94   :  { %9546 = vmatprep.subr.bf16.mxu0 %v10266_v2 }
 0xc97   :  { %v10102_v25 = vpop.eup %10101  ;;  %9548 = vmatpush3.bf16.msra.mxu0 %v11526_v30 }
 0xc98   :  { %7841 = vmatmul.mubr.f32.vlgmr.msra.gmra.mrb[34].mxu1 %v10102_v25  ;;  %9573 = vmatprep.subr.bf16.mxu0 %v10266_v2 }
 0xc99   :  { %9503 = vmatpush3.bf16.msra.mxu1 %v11433_v0  ;;  %7910 = vmatprep.mubr.msk.f32.mxu1 %vm10267_vm0, %v10268_v3 }
 0xc9a   :  { %9504 = vmatprep.subr.bf16.mxu1 %v10266_v2 }
 0xc9d   :  { %9506 = vmatpush3.bf16.msra.mxu1 %v11436_v31 }
 0xc9e   :  { %9507 = vmatprep.subr.bf16.mxu1 %v10266_v2 }
 0xca1   :  { %9509 = vmatpush3.bf16.msra.mxu1 %v11442_v14 }
 0xca2   :  { %9510 = vmatprep.subr.bf16.mxu1 %v10266_v2 }
 0xca5   :  { %9512 = vmatpush3.bf16.msra.mxu1 %v11446_v20 }
 0xca6   :  { %9513 = vmatprep.subr.bf16.mxu1 %v10266_v2 }
 0xca9   :  { %9515 = vmatpush3.bf16.msra.mxu1 %v11450_v34 }
 0xcaa   :  { %9516 = vmatprep.subr.bf16.mxu1 %v10266_v2 }
 0xcad   :  { %9518 = vmatpush3.bf16.msra.mxu1 %v11454_v53 }
 0xcae   :  { %9519 = vmatprep.subr.bf16.mxu1 %v10266_v2 }
 0xcb1   :  { %9521 = vmatpush3.bf16.msra.mxu1 %v11458_v26 }
 0xcb2   :  { %9522 = vmatprep.subr.bf16.mxu1 %v10266_v2 }
 0xcb5   :  { %9524 = vmatpush3.bf16.msra.mxu1 %v11462_v52 }
 0xcb6   :  { %9549 = vmatprep.subr.bf16.mxu1 %v10266_v2 }
 0xcb8   :  { %7911 = vmatmul.mubr.f32.vlgmr.msra.gmra.mrb[36].mxu1 %v10102_v25 }
 0xcb9   :  { %9551 = vmatpush3.bf16.msra.mxu1 %v11469_v49  ;;  %7980 = vmatprep.mubr.msk.f32.mxu1 %vm10267_vm0, %v10268_v3 }
 0xcba   :  { %9552 = vmatprep.subr.bf16.mxu1 %v10266_v2 }
 0xcbd   :  { %9554 = vmatpush3.bf16.msra.mxu1 %v11472_v18 }
 0xcbe   :  { %9555 = vmatprep.subr.bf16.mxu1 %v10266_v2 }
 0xcc1   :  { %9557 = vmatpush3.bf16.msra.mxu1 %v11476_v45 }
 0xcc2   :  { %9558 = vmatprep.subr.bf16.mxu1 %v10266_v2 }
 0xcc5   :  { %9560 = vmatpush3.bf16.msra.mxu1 %v11480_v27 }
 0xcc6   :  { %9561 = vmatprep.subr.bf16.mxu1 %v10266_v2 }
 0xcc9   :  { %9563 = vmatpush3.bf16.msra.mxu1 %v11485_v39 }
 0xcca   :  { %9564 = vmatprep.subr.bf16.mxu1 %v10266_v2 }
 0xccd   :  { %9566 = vmatpush3.bf16.msra.mxu1 %v11489_v54 }
 0xcce   :  { %9567 = vmatprep.subr.bf16.mxu1 %v10266_v2 }
 0xcd1   :  { %9569 = vmatpush3.bf16.msra.mxu1 %v11492_v55 }
 0xcd2   :  { %9570 = vmatprep.subr.bf16.mxu1 %v10266_v2 }
 0xcd5   :  { %9572 = vmatpush3.bf16.msra.mxu1 %v11496_v63 }
 0xcd6   :  { %9597 = vmatprep.subr.bf16.mxu1 %v10266_v2 }
 0xd09   :  { %v3065_v32 = vpop.xlane.xlu0 %3064 }
 0xd0a   :  { %v3066_v60 = vadd.f32 %v11412_v47, %v3065_v32  ;;  %v11691_v32 = vld [vmem:[%s12154_s13 + $0x1] ss:$0 sm:$0xff] }
 0xd0c   :  { %vm3067_vm8 = vcmp.eq.f32.partialorder %v3066_v60, -10002.0  ;;  %3070 = vrot.lane.b32.xlu1 %v3066_v60, %s10282_s28 }
 0xd0d   :  { %vm11601_vm9 = vmor %vm11515_vm6, %vm3067_vm8  ;;  %vm4293_vm8 = vcmask 64568  }
 0xd4d   :  { %v3354_v11 = vpop.f32.mrb[36].mxu0 }
 0xd4e   :  { %v7877_v24 = vpop.f32.mrb[37].mxu0 }
 0xd6b   :  { %v3268_v13 = vpop.f32.mrb[34].mxu1 }
 0xd6c   :  { %v3269_v29 = vadd.f32 %v11320_v43, %v3268_v13  ;;  %v7842_v36 = vpop.f32.mrb[35].mxu1  ;;  %v3386_v43 = vmul.f32 %v11217_v56, %v11380_v59 }
 0xd6e   :  { %v3358_v40 = vadd.f32 %v3354_v11, %v3269_v29  ;;  %v11707_v29 = vld [vmem:[%s12149_s8] ss:$0 sm:$0xff]  ;;  %s10284_s8 = smov 5  }
 0xd6f   :  { %v3691_v36 = vmul.f32 %v11707_v29, %v11384_v15 }
 0xd70   :  { %v3366_v48 = vadd.f32 %v11326_v16, %v3358_v40  ;;  %v3387_v16 = vadd.f32 %v11229_v1, %v3386_v43  ;;  %v11716_v40 = vld [vmem:[%s12150_s9] ss:$0 sm:$0xff] }
 0xd72   :  { %10103 = vtanh.f32 %v3366_v48  ;;  %v3692_v48 = vadd.f32 %v11716_v40, %v3691_v36 }
 0xd7c   :  { %v10104_v4 = vpop.eup %10103 }
 0xd7d   :  { %7981 = vmatmul.mubr.f32.vlgmr.msra.gmra.mrb[38].mxu1 %v10104_v4  ;;  %v3368_v19 = vmul.f32 %v10104_v4, %v11332_v35 }
 0xd7e   :  { %v3071_v58 = vpop.permute.xlu1 %3070  ;;  %9599 = vmatpush3.bf16.msra.mxu1 %v11584_v62  ;;  %8050 = vmatprep.mubr.msk.f32.mxu1 %vm10267_vm0, %v10268_v3 }
 0xd7f   :  { %3074 = vst.msk [vmem:[%s12160_s20] sm:$0xff] %vm3073_vm10, %v3071_v58  ;;  %3369 = vadd.xlane.f32.xlu1 %v3368_v19  ;;  %9600 = vmatprep.subr.bf16.mxu1 %v10266_v2 }
 0xd82   :  { %9602 = vmatpush3.bf16.msra.mxu1 %v11588_v44 }
 0xd83   :  { %9603 = vmatprep.subr.bf16.mxu1 %v10266_v2 }
 0xd86   :  { %9605 = vmatpush3.bf16.msra.mxu1 %v11501_v8 }
 0xd87   :  { %9606 = vmatprep.subr.bf16.mxu1 %v10266_v2 }
 0xd8a   :  { %9608 = vmatpush3.bf16.msra.mxu1 %v11504_v17 }
 0xd8b   :  { %v3470_v61 = vpop.f32.mrb[36].mxu1  ;;  %9609 = vmatprep.subr.bf16.mxu1 %v10266_v2 }
 0xd8c   :  { %v3474_v5 = vadd.f32 %v3470_v61, %v3387_v16  ;;  %v7912_v7 = vpop.f32.mrb[37].mxu1  ;;  %v4309_v61 = vld [vmem:[#allocation9 + $0x30] sm:$0xff] }
 0xd8e   :  { %v3482_v6 = vadd.f32 %v11545_v23, %v3474_v5  ;;  %9611 = vmatpush3.bf16.msra.mxu1 %v11509_v38  ;;  %v4310_v5 = vld [vmem:[#allocation9 + $0x38] sm:$0xff] }
 0xd8f   :  { %9612 = vmatprep.subr.bf16.mxu1 %v10266_v2  ;;  %v11802_v7 = vpack.c.bf16 %v4310_v5, %v4309_v61  ;;  %v4409_v5 = vld [vmem:[#allocation8 + $0xd0] sm:$0xff] }
 0xd90   :  { %10105 = vtanh.f32 %v3482_v6  ;;  %v4311_v6 = vld [vmem:[#allocation9 + $0x40] sm:$0xff] }
 0xd92   :  { %9614 = vmatpush3.bf16.msra.mxu1 %v11519_v46 }
 0xd93   :  { %9615 = vmatprep.subr.bf16.mxu1 %v10266_v2 }
 0xd96   :  { %9617 = vmatpush3.bf16.msra.mxu1 %v11523_v42 }
 0xd97   :  { %9618 = vmatprep.subr.bf16.mxu1 %v10266_v2 }
 0xd9a   :  { %v10106_v56 = vpop.eup %10105  ;;  %9620 = vmatpush3.bf16.msra.mxu1 %v11526_v30 }
 0xd9b   :  { %7946 = vmatmul.mubr.f32.vlgmr.msra.gmra.mrb[38].mxu0 %v10106_v56  ;;  %9645 = vmatprep.subr.bf16.mxu1 %v10266_v2 }
 0xd9c   :  { %9575 = vmatpush3.bf16.msra.mxu0 %v11433_v0  ;;  %8015 = vmatprep.mubr.msk.f32.mxu0 %vm10267_vm0, %v10268_v3 }
 0xd9d   :  { %9576 = vmatprep.subr.bf16.mxu0 %v10266_v2 }
 0xda0   :  { %9578 = vmatpush3.bf16.msra.mxu0 %v11436_v31 }
 0xda1   :  { %9579 = vmatprep.subr.bf16.mxu0 %v10266_v2 }
 0xda4   :  { %9581 = vmatpush3.bf16.msra.mxu0 %v11442_v14 }
 0xda5   :  { %9582 = vmatprep.subr.bf16.mxu0 %v10266_v2 }
 0xda8   :  { %9584 = vmatpush3.bf16.msra.mxu0 %v11446_v20 }
 0xda9   :  { %9585 = vmatprep.subr.bf16.mxu0 %v10266_v2 }
 0xdac   :  { %9587 = vmatpush3.bf16.msra.mxu0 %v11450_v34 }
 0xdad   :  { %9588 = vmatprep.subr.bf16.mxu0 %v10266_v2 }
 0xdb0   :  { %9590 = vmatpush3.bf16.msra.mxu0 %v11454_v53 }
 0xdb1   :  { %9591 = vmatprep.subr.bf16.mxu0 %v10266_v2 }
 0xdb4   :  { %9593 = vmatpush3.bf16.msra.mxu0 %v11458_v26 }
 0xdb5   :  { %9594 = vmatprep.subr.bf16.mxu0 %v10266_v2 }
 0xdb8   :  { %9596 = vmatpush3.bf16.msra.mxu0 %v11462_v52 }
 0xdb9   :  { %9621 = vmatprep.subr.bf16.mxu0 %v10266_v2 }
 0xdbb   :  { %8016 = vmatmul.mubr.f32.vlgmr.msra.gmra.mrb[40].mxu0 %v10106_v56  ;;  %v4312_v56 = vld [vmem:[#allocation9 + $0x48] sm:$0xff] }
 0xdbc   :  { %9623 = vmatpush3.bf16.msra.mxu0 %v11469_v49  ;;  %8085 = vmatprep.mubr.msk.f32.mxu0 %vm10267_vm0, %v10268_v3 }
 0xdbd   :  { %9624 = vmatprep.subr.bf16.mxu0 %v10266_v2 }
 0xdc0   :  { %9626 = vmatpush3.bf16.msra.mxu0 %v11472_v18 }
 0xdc1   :  { %9627 = vmatprep.subr.bf16.mxu0 %v10266_v2 }
 0xdc4   :  { %9629 = vmatpush3.bf16.msra.mxu0 %v11476_v45 }
 0xdc5   :  { %9630 = vmatprep.subr.bf16.mxu0 %v10266_v2 }
 0xdc8   :  { %9632 = vmatpush3.bf16.msra.mxu0 %v11480_v27 }
 0xdc9   :  { %9633 = vmatprep.subr.bf16.mxu0 %v10266_v2 }
 0xdcc   :  { %9635 = vmatpush3.bf16.msra.mxu0 %v11485_v39 }
 0xdcd   :  { %9636 = vmatprep.subr.bf16.mxu0 %v10266_v2 }
 0xdd0   :  { %9638 = vmatpush3.bf16.msra.mxu0 %v11489_v54 }
 0xdd1   :  { %9639 = vmatprep.subr.bf16.mxu0 %v10266_v2 }
 0xdd4   :  { %9641 = vmatpush3.bf16.msra.mxu0 %v11492_v55 }
 0xdd5   :  { %9642 = vmatprep.subr.bf16.mxu0 %v10266_v2 }
 0xdd8   :  { %9644 = vmatpush3.bf16.msra.mxu0 %v11496_v63 }
 0xdd9   :  { %9669 = vmatprep.subr.bf16.mxu0 %v10266_v2 }
 0xe0c   :  { %v3370_v1 = vpop.xlane.xlu1 %3369 }
 0xe0d   :  { %v3371_v59 = vadd.f32 %v11412_v47, %v3370_v1  ;;  %v11806_v1 = vpack.c.bf16 %v4312_v56, %v4311_v6  ;;  %v4410_v6 = vld [vmem:[#allocation8 + $0xd8] sm:$0xff] }
 0xe0f   :  { %vm3372_vm11 = vcmp.eq.f32.partialorder %v3371_v59, -10002.0  ;;  %3375 = vrot.lane.b32.xlu0 %v3371_v59, %s10283_s26  ;;  %v4313_v59 = vld [vmem:[#allocation9 + $0x50] sm:$0xff] }
 0xe10   :  { %vm11678_vm12 = vmor %vm11601_vm9, %vm3372_vm11 }
 0xe50   :  { %v3659_v10 = vpop.f32.mrb[38].mxu1 }
 0xe51   :  { %v7982_v25 = vpop.f32.mrb[39].mxu1 }
 0xe52   :  { %v4315_v25 = vld [vmem:[#allocation9 + $0x60] sm:$0xff] }
 0xe6e   :  { %v3573_v50 = vpop.f32.mrb[38].mxu0 }
 0xe6f   :  { %v3574_v21 = vadd.f32 %v11685_v12, %v3573_v50  ;;  %v7947_v41 = vpop.f32.mrb[39].mxu0  ;;  %v4316_v50 = vld [vmem:[#allocation9 + $0x68] sm:$0xff] }
 0xe70   :  { %v4317_v41 = vld [vmem:[#allocation9 + $0x70] sm:$0xff] }
 0xe71   :  { %v3663_v60 = vadd.f32 %v3659_v10, %v3574_v21  ;;  %v11810_v10 = vpack.c.bf16 %v4314_v57, %v4313_v59  ;;  %v11814_v21 = vpack.c.bf16 %v4316_v50, %v4315_v25  ;;  %v11878_v59 = vpack.c.bf16 %v4410_v6, %v4409_v5  ;;  %v4411_v57 = vld [vmem:[#allocation8 + $0xe0] sm:$0xff]  ;;  %v4412_v25 = vld [vmem:[#allocation8 + $0xe8] sm:$0xff]  ;;  %v4413_v50 = vld [vmem:[#allocation8 + $0xf0] sm:$0xff] }
 0xe73   :  { %v3671_v9 = vadd.f32 %v11691_v32, %v3663_v60  ;;  %v4318_v60 = vld [vmem:[#allocation9 + $0x78] sm:$0xff] }
 0xe75   :  { %10107 = vtanh.f32 %v3671_v9  ;;  %v11818_v9 = vpack.c.bf16 %v4318_v60, %v4317_v41  ;;  %v11882_v41 = vpack.c.bf16 %v4412_v25, %v4411_v57  ;;  %v4414_v60 = vld [vmem:[#allocation8 + $0xf8] sm:$0xff]  ;;  %v10290_v57 = vmov -10001.0  }
 0xe7f   :  { %v10108_v11 = vpop.eup %10107 }
 0xe80   :  { %8086 = vmatmul.mubr.f32.vlgmr.msra.gmra.mrb[42].mxu0 %v10108_v11  ;;  %v3673_v24 = vmul.f32 %v10108_v11, %v11332_v35  ;;  %v4492_v11 = vld [vmem:[#allocation9 + $0x80] sm:$0xff] }
 0xe81   :  { %v3376_v13 = vpop.permute.xlu0 %3375  ;;  %9671 = vmatpush3.bf16.msra.mxu0 %v11584_v62  ;;  %8155 = vmatprep.mubr.msk.f32.mxu0 %vm10267_vm0, %v10268_v3 }
 0xe82   :  { %3379 = vst.msk [vmem:[%s12160_s20] sm:$0xff] %vm3378_vm13, %v3376_v13  ;;  %3674 = vadd.xlane.f32.xlu1 %v3673_v24  ;;  %9672 = vmatprep.subr.bf16.mxu0 %v10266_v2  ;;  %v4493_v24 = vld [vmem:[#allocation9 + $0x88] sm:$0xff]  ;;  %v4494_v13 = vld [vmem:[#allocation9 + $0x90] sm:$0xff]  ;;  %vm4598_vm13 = vcmask 72768  }
 0xe83   :  { %v11825_v36 = vpack.c.bf16 %v4493_v24, %v4492_v11  ;;  %v11885_v11 = vpack.c.bf16 %v4414_v60, %v4413_v50 }
 0xe85   :  { %9674 = vmatpush3.bf16.msra.mxu0 %v11588_v44 }
 0xe86   :  { %9675 = vmatprep.subr.bf16.mxu0 %v10266_v2 }
 0xe89   :  { %9677 = vmatpush3.bf16.msra.mxu0 %v11501_v8 }
 0xe8a   :  { %9678 = vmatprep.subr.bf16.mxu0 %v10266_v2 }
 0xe8d   :  { %9680 = vmatpush3.bf16.msra.mxu0 %v11504_v17 }
 0xe8e   :  { %v3775_v4 = vpop.f32.mrb[40].mxu0  ;;  %9681 = vmatprep.subr.bf16.mxu0 %v10266_v2 }
 0xe8f   :  { %v3779_v19 = vadd.f32 %v3775_v4, %v3692_v48  ;;  %v8017_v58 = vpop.f32.mrb[41].mxu0  ;;  %v4495_v48 = vld [vmem:[#allocation9 + $0x98] sm:$0xff] }
 0xe90   :  { %v11828_v4 = vpack.c.bf16 %v4495_v48, %v4494_v13  ;;  %v4497_v58 = vld [vmem:[#allocation9 + $0xa8] sm:$0xff] }
 0xe91   :  { %v3787_v15 = vadd.f32 %v11545_v23, %v3779_v19  ;;  %9683 = vmatpush3.bf16.msra.mxu0 %v11509_v38  ;;  %v4303_v38 = vld [vmem:[#allocation9] sm:$0xff] }
 0xe92   :  { %9684 = vmatprep.subr.bf16.mxu0 %v10266_v2  ;;  %v4496_v19 = vld [vmem:[#allocation9 + $0xa0] sm:$0xff] }
 0xe93   :  { %10109 = vtanh.f32 %v3787_v15  ;;  %v11832_v15 = vpack.c.bf16 %v4497_v58, %v4496_v19 }
 0xe95   :  { %9686 = vmatpush3.bf16.msra.mxu0 %v11519_v46  ;;  %v4304_v46 = vld [vmem:[#allocation9 + $0x8] sm:$0xff] }
 0xe96   :  { %9687 = vmatprep.subr.bf16.mxu0 %v10266_v2 }
 0xe99   :  { %9689 = vmatpush3.bf16.msra.mxu0 %v11523_v42  ;;  %v11789_v42 = vpack.c.bf16 %v4304_v46, %v4303_v38  ;;  %v4406_v38 = vld [vmem:[#allocation8 + $0xb8] sm:$0xff] }
 0xe9a   :  { %9690 = vmatprep.subr.bf16.mxu0 %v10266_v2 }
 0xe9d   :  { %v10110_v8 = vpop.eup %10109  ;;  %9692 = vmatpush3.bf16.msra.mxu0 %v11526_v30  ;;  %v4305_v30 = vld [vmem:[#allocation9 + $0x10] sm:$0xff] }
 0xe9e   :  { %8051 = vmatmul.mubr.f32.vlgmr.msra.gmra.mrb[40].mxu1 %v10110_v8  ;;  %9717 = vmatprep.subr.bf16.mxu0 %v10266_v2 }
 0xe9f   :  { %9647 = vmatpush3.bf16.msra.mxu1 %v11433_v0  ;;  %8120 = vmatprep.mubr.msk.f32.mxu1 %vm10267_vm0, %v10268_v3 }
 0xea0   :  { %9648 = vmatprep.subr.bf16.mxu1 %v10266_v2 }
 0xea3   :  { %9650 = vmatpush3.bf16.msra.mxu1 %v11436_v31 }
 0xea4   :  { %9651 = vmatprep.subr.bf16.mxu1 %v10266_v2 }
 0xea7   :  { %9653 = vmatpush3.bf16.msra.mxu1 %v11442_v14 }
 0xea8   :  { %9654 = vmatprep.subr.bf16.mxu1 %v10266_v2 }
 0xeab   :  { %9656 = vmatpush3.bf16.msra.mxu1 %v11446_v20 }
 0xeac   :  { %9657 = vmatprep.subr.bf16.mxu1 %v10266_v2 }
 0xeaf   :  { %9659 = vmatpush3.bf16.msra.mxu1 %v11450_v34 }
 0xeb0   :  { %9660 = vmatprep.subr.bf16.mxu1 %v10266_v2 }
 0xeb3   :  { %9662 = vmatpush3.bf16.msra.mxu1 %v11454_v53 }
 0xeb4   :  { %9663 = vmatprep.subr.bf16.mxu1 %v10266_v2 }
 0xeb7   :  { %9665 = vmatpush3.bf16.msra.mxu1 %v11458_v26 }
 0xeb8   :  { %9666 = vmatprep.subr.bf16.mxu1 %v10266_v2 }
 0xebb   :  { %9668 = vmatpush3.bf16.msra.mxu1 %v11462_v52 }
 0xebc   :  { %9693 = vmatprep.subr.bf16.mxu1 %v10266_v2 }
 0xebe   :  { %8121 = vmatmul.mubr.f32.vlgmr.msra.gmra.mrb[42].mxu1 %v10110_v8  ;;  %v4498_v8 = vld [vmem:[#allocation9 + $0xb0] sm:$0xff] }
 0xebf   :  { %9695 = vmatpush3.bf16.msra.mxu1 %v11469_v49  ;;  %8190 = vmatprep.mubr.msk.f32.mxu1 %vm10267_vm0, %v10268_v3 }
 0xec0   :  { %9696 = vmatprep.subr.bf16.mxu1 %v10266_v2 }
 0xec3   :  { %9698 = vmatpush3.bf16.msra.mxu1 %v11472_v18 }
 0xec4   :  { %9699 = vmatprep.subr.bf16.mxu1 %v10266_v2 }
 0xec7   :  { %9701 = vmatpush3.bf16.msra.mxu1 %v11476_v45 }
 0xec8   :  { %9702 = vmatprep.subr.bf16.mxu1 %v10266_v2 }
 0xecb   :  { %9704 = vmatpush3.bf16.msra.mxu1 %v11480_v27 }
 0xecc   :  { %9705 = vmatprep.subr.bf16.mxu1 %v10266_v2 }
 0xecf   :  { %9707 = vmatpush3.bf16.msra.mxu1 %v11485_v39 }
 0xed0   :  { %9708 = vmatprep.subr.bf16.mxu1 %v10266_v2 }
 0xed3   :  { %9710 = vmatpush3.bf16.msra.mxu1 %v11489_v54 }
 0xed4   :  { %9711 = vmatprep.subr.bf16.mxu1 %v10266_v2 }
 0xed7   :  { %9713 = vmatpush3.bf16.msra.mxu1 %v11492_v55 }
 0xed8   :  { %9714 = vmatprep.subr.bf16.mxu1 %v10266_v2 }
 0xedb   :  { %9716 = vmatpush3.bf16.msra.mxu1 %v11496_v63 }
 0xedc   :  { %9741 = vmatprep.subr.bf16.mxu1 %v10266_v2 }
 0xf0f   :  { %v3675_v0 = vpop.xlane.xlu1 %3674 }
 0xf10   :  { %v3676_v31 = vadd.f32 %v11412_v47, %v3675_v0  ;;  %v4499_v0 = vld [vmem:[#allocation9 + $0xb8] sm:$0xff] }
 0xf12   :  { %vm3677_vm14 = vcmp.eq.f32.partialorder %v3676_v31, -10002.0  ;;  %3680 = vrot.lane.b32.xlu1 %v3676_v31, %s10284_s8  ;;  %v11836_v31 = vpack.c.bf16 %v4499_v0, %v4498_v8 }
 0xf13   :  { %vm11769_vm15 = vmor %vm11678_vm12, %vm3677_vm14 }
 0xf53   :  { %v3964_v20 = vpop.f32.mrb[42].mxu0 }
 0xf54   :  { %v8087_v34 = vpop.f32.mrb[43].mxu0 }
 0xf55   :  { %v4501_v34 = vld [vmem:[#allocation9 + $0xc8] sm:$0xff] }
 0xf71   :  { %v3878_v53 = vpop.f32.mrb[40].mxu1 }
 0xf72   :  { %v3879_v26 = vadd.f32 %v11685_v12, %v3878_v53  ;;  %v8052_v52 = vpop.f32.mrb[41].mxu1 }
 0xf73   :  { %v4503_v52 = vld [vmem:[#allocation9 + $0xd8] sm:$0xff] }
 0xf74   :  { %v3968_v49 = vadd.f32 %v3964_v20, %v3879_v26  ;;  %v4500_v20 = vld [vmem:[#allocation9 + $0xc0] sm:$0xff]  ;;  %v4502_v26 = vld [vmem:[#allocation9 + $0xd0] sm:$0xff] }
 0xf75   :  { %v11841_v53 = vpack.c.bf16 %v4501_v34, %v4500_v20  ;;  %v11895_v20 = vld [vmem:[%s12155_s14] ss:$0 sm:$0xff] }
 0xf76   :  { %v3976_v18 = vadd.f32 %v11691_v32, %v3968_v49  ;;  %v11845_v49 = vpack.c.bf16 %v4503_v52, %v4502_v26  ;;  %v4301_v52 = vmul.f32 %v11707_v29, %v11390_v33  ;;  %v4704_v33 = vld [vmem:[#allocation8 + $0x80] sm:$0xff] }
 0xf78   :  { %10111 = vtanh.f32 %v3976_v18  ;;  %v4504_v18 = vld [vmem:[#allocation9 + $0xe0] sm:$0xff] }
 0xf82   :  { %v10112_v47 = vpop.eup %10111 }
 0xf83   :  { %8191 = vmatmul.mubr.f32.vlgmr.msra.gmra.mrb[44].mxu1 %v10112_v47  ;;  %v3978_v45 = vmul.f32 %v10112_v47, %v11332_v35  ;;  %v3996_v35 = vmul.f32 %v11707_v29, %v11408_v22  ;;  %v4307_v22 = vld [vmem:[#allocation9 + $0x20] sm:$0xff]  ;;  %v4505_v47 = vld [vmem:[#allocation9 + $0xe8] sm:$0xff] }
 0xf84   :  { %v3681_v27 = vpop.permute.xlu1 %3680  ;;  %9743 = vmatpush3.bf16.msra.mxu1 %v11584_v62  ;;  %8260 = vmatprep.mubr.msk.f32.mxu1 %vm10267_vm0, %v10268_v3  ;;  %v4306_v62 = vld [vmem:[#allocation9 + $0x18] sm:$0xff] }
 0xf85   :  { %3684 = vst.msk [vmem:[%s12160_s20] sm:$0xff] %vm3683_vm1, %v3681_v27  ;;  %3979 = vadd.xlane.f32.xlu0 %v3978_v45  ;;  %9744 = vmatprep.subr.bf16.mxu1 %v10266_v2  ;;  %v3997_v39 = vadd.f32 %v11716_v40, %v3996_v35  ;;  %v11792_v43 = vpack.c.bf16 %v4306_v62, %v4305_v30  ;;  %v4506_v27 = vld [vmem:[#allocation9 + $0xf0] sm:$0xff]  ;;  %v4507_v35 = vld [vmem:[#allocation9 + $0xf8] sm:$0xff]  ;;  %v4407_v30 = vld [vmem:[#allocation8 + $0xc0] sm:$0xff] }
 0xf86   :  { %v11848_v45 = vpack.c.bf16 %v4505_v47, %v4504_v18  ;;  %v4408_v62 = vld [vmem:[#allocation8 + $0xc8] sm:$0xff]  ;;  %v4302_v18 = vadd.f32 %v11716_v40, %v4301_v52 }
 0xf88   :  { %9746 = vmatpush3.bf16.msra.mxu1 %v11588_v44 }
 0xf89   :  { %9747 = vmatprep.subr.bf16.mxu1 %v10266_v2 }
 0xf91   :  { %v4080_v54 = vpop.f32.mrb[42].mxu1 }
 0xf92   :  { %v4084_v55 = vadd.f32 %v4080_v54, %v3997_v39  ;;  %v8122_v63 = vpop.f32.mrb[43].mxu1  ;;  %v11852_v39 = vpack.c.bf16 %v4507_v35, %v4506_v27  ;;  %v4403_v54 = vld [vmem:[#allocation8 + $0xa0] sm:$0xff]  ;;  %v11909_v27 = vld [vmem:[%s12154_s13] ss:$0 sm:$0xff] }
 0xf93   :  { %v4405_v63 = vld [vmem:[#allocation8 + $0xb0] sm:$0xff] }
 0xf94   :  { %v4092_v17 = vadd.f32 %v11545_v23, %v4084_v55  ;;  %v4308_v23 = vld [vmem:[#allocation9 + $0x28] sm:$0xff]  ;;  %v11860_v46 = vpack.c.bf16 %v4406_v38, %v4405_v63 }
 0xf95   :  { %v11798_v16 = vpack.c.bf16 %v4308_v23, %v4307_v22  ;;  %v4404_v55 = vld [vmem:[#allocation8 + $0xa8] sm:$0xff]  ;;  %v11865_v22 = vpack.c.bf16 %v4408_v62, %v4407_v30  ;;  %v11867_v23 = vld [vmem:[#allocation2] ss:$0 sm:$0xff]  ;;  %v4706_v62 = vld [vmem:[#allocation8 + $0x90] sm:$0xff] }
 0xf96   :  { %10113 = vtanh.f32 %v4092_v17  ;;  %v11857_v17 = vpack.c.bf16 %v4404_v55, %v4403_v54  ;;  %v4705_v38 = vld [vmem:[#allocation8 + $0x88] sm:$0xff] }
 0xf97   :  { %v11948_v30 = vpack.c.bf16 %v4705_v38, %v4704_v33 }
 0xf98   :  { %9749 = vmatpush3.bf16.msra.mxu1 %v11857_v17 }
 0xf99   :  { %9750 = vmatprep.subr.bf16.mxu1 %v10266_v2 }
 0xf9c   :  { %9752 = vmatpush3.bf16.msra.mxu1 %v11860_v46 }
 0xf9d   :  { %9753 = vmatprep.subr.bf16.mxu1 %v10266_v2 }
 0xfa0   :  { %v10114_v44 = vpop.eup %10113  ;;  %9755 = vmatpush3.bf16.msra.mxu1 %v11865_v22 }
 0xfa1   :  { %8156 = vmatmul.mubr.f32.vlgmr.msra.gmra.mrb[44].mxu0 %v10114_v44  ;;  %9756 = vmatprep.subr.bf16.mxu1 %v10266_v2 }
 0xfa2   :  { %9719 = vmatpush3.bf16.msra.mxu0 %v11789_v42  ;;  %8225 = vmatprep.mubr.msk.f32.mxu0 %vm10267_vm0, %v10268_v3 }
 0xfa3   :  { %9720 = vmatprep.subr.bf16.mxu0 %v10266_v2 }
 0xfa4   :  { %9758 = vmatpush3.bf16.msra.mxu1 %v11878_v59 }
 0xfa5   :  { %9759 = vmatprep.subr.bf16.mxu1 %v10266_v2 }
 0xfa6   :  { %9722 = vmatpush3.bf16.msra.mxu0 %v11792_v43 }
 0xfa7   :  { %9723 = vmatprep.subr.bf16.mxu0 %v10266_v2 }
 0xfa8   :  { %9761 = vmatpush3.bf16.msra.mxu1 %v11882_v41 }
 0xfa9   :  { %9762 = vmatprep.subr.bf16.mxu1 %v10266_v2 }
 0xfaa   :  { %9725 = vmatpush3.bf16.msra.mxu0 %v11798_v16 }
 0xfab   :  { %9726 = vmatprep.subr.bf16.mxu0 %v10266_v2 }
 0xfac   :  { %9764 = vmatpush3.bf16.msra.mxu1 %v11885_v11 }
 0xfad   :  { %9789 = vmatprep.subr.bf16.mxu1 %v10266_v2 }
 0xfae   :  { %9728 = vmatpush3.bf16.msra.mxu0 %v11802_v7 }
 0xfaf   :  { %9729 = vmatprep.subr.bf16.mxu0 %v10266_v2 }
 0xfb2   :  { %9731 = vmatpush3.bf16.msra.mxu0 %v11806_v1 }
 0xfb3   :  { %9732 = vmatprep.subr.bf16.mxu0 %v10266_v2 }
 0xfb6   :  { %9734 = vmatpush3.bf16.msra.mxu0 %v11810_v10 }
 0xfb7   :  { %9735 = vmatprep.subr.bf16.mxu0 %v10266_v2 }
 0xfba   :  { %9737 = vmatpush3.bf16.msra.mxu0 %v11814_v21 }
 0xfbb   :  { %9738 = vmatprep.subr.bf16.mxu0 %v10266_v2 }
 0xfbe   :  { %9740 = vmatpush3.bf16.msra.mxu0 %v11818_v9 }
 0xfbf   :  { %9765 = vmatprep.subr.bf16.mxu0 %v10266_v2 }
 0xfc1   :  { %8226 = vmatmul.mubr.f32.vlgmr.msra.gmra.mrb[46].mxu0 %v10114_v44 }
 0xfc2   :  { %8295 = vmatprep.mubr.msk.f32.mxu0 %vm10267_vm0, %v10268_v3  ;;  %9767 = vmatpush3.bf16.msra.mxu0 %v11825_v36 }
 0xfc3   :  { %9768 = vmatprep.subr.bf16.mxu0 %v10266_v2 }
 0xfc6   :  { %9770 = vmatpush3.bf16.msra.mxu0 %v11828_v4 }
 0xfc7   :  { %9771 = vmatprep.subr.bf16.mxu0 %v10266_v2 }
 0xfca   :  { %9773 = vmatpush3.bf16.msra.mxu0 %v11832_v15 }
 0xfcb   :  { %9774 = vmatprep.subr.bf16.mxu0 %v10266_v2 }
 0xfce   :  { %9776 = vmatpush3.bf16.msra.mxu0 %v11836_v31 }
 0xfcf   :  { %9777 = vmatprep.subr.bf16.mxu0 %v10266_v2 }
 0xfd2   :  { %9779 = vmatpush3.bf16.msra.mxu0 %v11841_v53 }
 0xfd3   :  { %9780 = vmatprep.subr.bf16.mxu0 %v10266_v2 }
 0xfd6   :  { %9782 = vmatpush3.bf16.msra.mxu0 %v11845_v49 }
 0xfd7   :  { %9783 = vmatprep.subr.bf16.mxu0 %v10266_v2 }
 0xfda   :  { %9785 = vmatpush3.bf16.msra.mxu0 %v11848_v45 }
 0xfdb   :  { %9786 = vmatprep.subr.bf16.mxu0 %v10266_v2 }
 0xfde   :  { %9788 = vmatpush3.bf16.msra.mxu0 %v11852_v39 }
 0xfdf   :  { %9813 = vmatprep.subr.bf16.mxu0 %v10266_v2 }
0x1012   :  { %v3980_v44 = vpop.xlane.xlu0 %3979 }
0x1013   :  { %v3981_v61 = vadd.f32 %v11867_v23, %v3980_v44  ;;  %v4707_v44 = vld [vmem:[#allocation8 + $0x98] sm:$0xff] }
0x1015   :  { %vm3982_vm3 = vcmp.eq.f32.partialorder %v3981_v61, -10002.0  ;;  %3985 = vrot.lane.b32.xlu1 %v3981_v61, %s10285_s24  ;;  %v11952_v61 = vpack.c.bf16 %v4707_v44, %v4706_v62 }
0x1016   :  { %vm11874_vm4 = vmor %vm11769_vm15, %vm3982_vm3  ;;  %vm4903_vm3 = vcmask 80968  }
0x1056   :  { %v4269_v14 = vpop.f32.mrb[44].mxu1 }
0x1057   :  { %v8192_v24 = vpop.f32.mrb[45].mxu1 }
0x1074   :  { %v4183_v13 = vpop.f32.mrb[44].mxu0 }
0x1075   :  { %v4184_v48 = vadd.f32 %v11685_v12, %v4183_v13  ;;  %v8157_v19 = vpop.f32.mrb[45].mxu0 }
0x1077   :  { %v4273_v58 = vadd.f32 %v4269_v14, %v4184_v48 }
0x1079   :  { %v4281_v8 = vadd.f32 %v11691_v32, %v4273_v58 }
0x107b   :  { %10115 = vtanh.f32 %v4281_v8 }
0x1085   :  { %v10116_v0 = vpop.eup %10115 }
0x1086   :  { %8296 = vmatmul.mubr.f32.vlgmr.msra.gmra.mrb[48].mxu0 %v10116_v0  ;;  %v4283_v34 = vmul.f32 %v11895_v20, %v10116_v0 }
0x1087   :  { %v3986_v26 = vpop.permute.xlu1 %3985  ;;  %8365 = vmatprep.mubr.msk.f32.mxu0 %vm10267_vm0, %v10268_v3  ;;  %9815 = vmatpush3.bf16.msra.mxu0 %v11948_v30 }
0x1088   :  { %3989 = vst.msk [vmem:[%s12160_s20] sm:$0xff] %vm3988_vm5, %v3986_v26  ;;  %4284 = vadd.xlane.f32.xlu1 %v4283_v34  ;;  %9816 = vmatprep.subr.bf16.mxu0 %v10266_v2  ;;  %vm5515_vm5 = vcmask 97368  }
0x108b   :  { %9818 = vmatpush3.bf16.msra.mxu0 %v11952_v61 }
0x108c   :  { %9819 = vmatprep.subr.bf16.mxu0 %v10266_v2 }
0x108f   :  { %9821 = vmatpush3.bf16.msra.mxu0 %v11857_v17 }
0x1090   :  { %9822 = vmatprep.subr.bf16.mxu0 %v10266_v2 }
0x1093   :  { %9824 = vmatpush3.bf16.msra.mxu0 %v11860_v46 }
0x1094   :  { %v4385_v47 = vpop.f32.mrb[46].mxu0  ;;  %9825 = vmatprep.subr.bf16.mxu0 %v10266_v2 }
0x1095   :  { %v4389_v35 = vadd.f32 %v4385_v47, %v4302_v18  ;;  %v8227_v54 = vpop.f32.mrb[47].mxu0  ;;  %v12042_v47 = vld [vmem:[%s12153_s12 + $0x1] ss:$0 sm:$0xff]  ;;  %s10287_s12 = smov 9  }
0x1097   :  { %v4397_v55 = vadd.f32 %v11909_v27, %v4389_v35  ;;  %9827 = vmatpush3.bf16.msra.mxu0 %v11865_v22 }
0x1098   :  { %9828 = vmatprep.subr.bf16.mxu0 %v10266_v2 }
0x1099   :  { %10117 = vtanh.f32 %v4397_v55 }
0x109b   :  { %9830 = vmatpush3.bf16.msra.mxu0 %v11878_v59 }
0x109c   :  { %9831 = vmatprep.subr.bf16.mxu0 %v10266_v2 }
0x109f   :  { %9833 = vmatpush3.bf16.msra.mxu0 %v11882_v41 }
0x10a0   :  { %9834 = vmatprep.subr.bf16.mxu0 %v10266_v2 }
0x10a3   :  { %v10118_v63 = vpop.eup %10117  ;;  %9836 = vmatpush3.bf16.msra.mxu0 %v11885_v11 }
0x10a4   :  { %8261 = vmatmul.mubr.f32.vlgmr.msra.gmra.mrb[46].mxu1 %v10118_v63  ;;  %9861 = vmatprep.subr.bf16.mxu0 %v10266_v2 }
0x10a5   :  { %9791 = vmatpush3.bf16.msra.mxu1 %v11789_v42  ;;  %8330 = vmatprep.mubr.msk.f32.mxu1 %vm10267_vm0, %v10268_v3 }
0x10a6   :  { %9792 = vmatprep.subr.bf16.mxu1 %v10266_v2 }
0x10a9   :  { %9794 = vmatpush3.bf16.msra.mxu1 %v11792_v43 }
0x10aa   :  { %9795 = vmatprep.subr.bf16.mxu1 %v10266_v2 }
0x10ad   :  { %9797 = vmatpush3.bf16.msra.mxu1 %v11798_v16 }
0x10ae   :  { %9798 = vmatprep.subr.bf16.mxu1 %v10266_v2 }
0x10b1   :  { %9800 = vmatpush3.bf16.msra.mxu1 %v11802_v7 }
0x10b2   :  { %9801 = vmatprep.subr.bf16.mxu1 %v10266_v2 }
0x10b5   :  { %9803 = vmatpush3.bf16.msra.mxu1 %v11806_v1 }
0x10b6   :  { %9804 = vmatprep.subr.bf16.mxu1 %v10266_v2 }
0x10b9   :  { %9806 = vmatpush3.bf16.msra.mxu1 %v11810_v10 }
0x10ba   :  { %9807 = vmatprep.subr.bf16.mxu1 %v10266_v2 }
0x10bd   :  { %9809 = vmatpush3.bf16.msra.mxu1 %v11814_v21 }
0x10be   :  { %9810 = vmatprep.subr.bf16.mxu1 %v10266_v2 }
0x10c1   :  { %9812 = vmatpush3.bf16.msra.mxu1 %v11818_v9 }
0x10c2   :  { %9837 = vmatprep.subr.bf16.mxu1 %v10266_v2 }
0x10c4   :  { %8331 = vmatmul.mubr.f32.vlgmr.msra.gmra.mrb[48].mxu1 %v10118_v63  ;;  %v12048_v63 = vld [vmem:[%s12154_s13 + $0x1] ss:$0 sm:$0xff]  ;;  %s10288_s13 = smov 10  }
0x10c5   :  { %9839 = vmatpush3.bf16.msra.mxu1 %v11825_v36  ;;  %8400 = vmatprep.mubr.msk.f32.mxu1 %vm10267_vm0, %v10268_v3 }
0x10c6   :  { %9840 = vmatprep.subr.bf16.mxu1 %v10266_v2 }
0x10c9   :  { %9842 = vmatpush3.bf16.msra.mxu1 %v11828_v4 }
0x10ca   :  { %9843 = vmatprep.subr.bf16.mxu1 %v10266_v2 }
0x10cd   :  { %9845 = vmatpush3.bf16.msra.mxu1 %v11832_v15 }
0x10ce   :  { %9846 = vmatprep.subr.bf16.mxu1 %v10266_v2 }
0x10d1   :  { %9848 = vmatpush3.bf16.msra.mxu1 %v11836_v31 }
0x10d2   :  { %9849 = vmatprep.subr.bf16.mxu1 %v10266_v2 }
0x10d5   :  { %9851 = vmatpush3.bf16.msra.mxu1 %v11841_v53 }
0x10d6   :  { %9852 = vmatprep.subr.bf16.mxu1 %v10266_v2 }
0x10d9   :  { %9854 = vmatpush3.bf16.msra.mxu1 %v11845_v49 }
0x10da   :  { %9855 = vmatprep.subr.bf16.mxu1 %v10266_v2 }
0x10dd   :  { %9857 = vmatpush3.bf16.msra.mxu1 %v11848_v45 }
0x10de   :  { %9858 = vmatprep.subr.bf16.mxu1 %v10266_v2 }
0x10e1   :  { %9860 = vmatpush3.bf16.msra.mxu1 %v11852_v39 }
0x10e2   :  { %9885 = vmatprep.subr.bf16.mxu1 %v10266_v2 }
0x1115   :  { %v4285_v5 = vpop.xlane.xlu1 %4284 }
0x1116   :  { %v4286_v6 = vadd.f32 %v11867_v23, %v4285_v5  ;;  %v4911_v5 = vmul.f32 %v11707_v29, %v11410_v28 }
0x1118   :  { %vm4287_vm6 = vcmp.eq.f32.partialorder %v4286_v6, -10002.0  ;;  %4290 = vrot.lane.b32.xlu0 %v4286_v6, %s10286_s0  ;;  %v4912_v6 = vadd.f32 %v11716_v40, %v4911_v5 }
0x1119   :  { %vm11965_vm7 = vmor %vm11874_vm4, %vm4287_vm6  ;;  %vm5208_vm4 = vcmask 89168  }
0x1159   :  { %v4574_v25 = vpop.f32.mrb[48].mxu0 }
0x115a   :  { %v8297_v50 = vpop.f32.mrb[49].mxu0 }
0x1177   :  { %v4488_v60 = vpop.f32.mrb[46].mxu1 }
0x1178   :  { %v4489_v56 = vadd.f32 %v11685_v12, %v4488_v60  ;;  %v8262_v14 = vpop.f32.mrb[47].mxu1  ;;  %v4606_v12 = vmul.f32 %v11707_v29, %v11394_v51 }
0x117a   :  { %v4578_v24 = vadd.f32 %v4574_v25, %v4489_v56 }
0x117c   :  { %v4586_v13 = vadd.f32 %v11691_v32, %v4578_v24  ;;  %v4607_v32 = vadd.f32 %v11716_v40, %v4606_v12 }
0x117e   :  { %10119 = vtanh.f32 %v4586_v13 }
0x1188   :  { %v10120_v48 = vpop.eup %10119 }
0x1189   :  { %8401 = vmatmul.mubr.f32.vlgmr.msra.gmra.mrb[50].mxu1 %v10120_v48  ;;  %v4588_v19 = vmul.f32 %v11895_v20, %v10120_v48 }
0x118a   :  { %v4291_v58 = vpop.permute.xlu0 %4290  ;;  %9887 = vmatpush3.bf16.msra.mxu1 %v11948_v30  ;;  %8470 = vmatprep.mubr.msk.f32.mxu1 %vm10267_vm0, %v10268_v3 }
0x118b   :  { %4294 = vst.msk [vmem:[%s12160_s20] sm:$0xff] %vm4293_vm8, %v4291_v58  ;;  %4589 = vadd.xlane.f32.xlu1 %v4588_v19  ;;  %9888 = vmatprep.subr.bf16.mxu1 %v10266_v2 }
0x118e   :  { %9890 = vmatpush3.bf16.msra.mxu1 %v11952_v61 }
0x118f   :  { %9891 = vmatprep.subr.bf16.mxu1 %v10266_v2 }
0x1192   :  { %9893 = vmatpush3.bf16.msra.mxu1 %v11857_v17 }
0x1193   :  { %9894 = vmatprep.subr.bf16.mxu1 %v10266_v2 }
0x1196   :  { %9896 = vmatpush3.bf16.msra.mxu1 %v11860_v46 }
0x1197   :  { %v4690_v8 = vpop.f32.mrb[48].mxu1  ;;  %9897 = vmatprep.subr.bf16.mxu1 %v10266_v2 }
0x1198   :  { %v4694_v0 = vadd.f32 %v4690_v8, %v4607_v32  ;;  %v8332_v34 = vpop.f32.mrb[49].mxu1 }
0x119a   :  { %v4702_v26 = vadd.f32 %v11909_v27, %v4694_v0  ;;  %9899 = vmatpush3.bf16.msra.mxu1 %v11865_v22 }
0x119b   :  { %9900 = vmatprep.subr.bf16.mxu1 %v10266_v2 }
0x119c   :  { %10121 = vtanh.f32 %v4702_v26 }
0x119e   :  { %9902 = vmatpush3.bf16.msra.mxu1 %v11878_v59 }
0x119f   :  { %9903 = vmatprep.subr.bf16.mxu1 %v10266_v2 }
0x11a2   :  { %9905 = vmatpush3.bf16.msra.mxu1 %v11882_v41 }
0x11a3   :  { %9906 = vmatprep.subr.bf16.mxu1 %v10266_v2 }
0x11a6   :  { %v10122_v51 = vpop.eup %10121  ;;  %9908 = vmatpush3.bf16.msra.mxu1 %v11885_v11 }
0x11a7   :  { %8366 = vmatmul.mubr.f32.vlgmr.msra.gmra.mrb[50].mxu0 %v10122_v51  ;;  %9933 = vmatprep.subr.bf16.mxu1 %v10266_v2 }
0x11a8   :  { %9863 = vmatpush3.bf16.msra.mxu0 %v11789_v42  ;;  %8435 = vmatprep.mubr.msk.f32.mxu0 %vm10267_vm0, %v10268_v3 }
0x11a9   :  { %9864 = vmatprep.subr.bf16.mxu0 %v10266_v2 }
0x11ac   :  { %9866 = vmatpush3.bf16.msra.mxu0 %v11792_v43 }
0x11ad   :  { %9867 = vmatprep.subr.bf16.mxu0 %v10266_v2 }
0x11b0   :  { %9869 = vmatpush3.bf16.msra.mxu0 %v11798_v16 }
0x11b1   :  { %9870 = vmatprep.subr.bf16.mxu0 %v10266_v2 }
0x11b4   :  { %9872 = vmatpush3.bf16.msra.mxu0 %v11802_v7 }
0x11b5   :  { %9873 = vmatprep.subr.bf16.mxu0 %v10266_v2 }
0x11b8   :  { %9875 = vmatpush3.bf16.msra.mxu0 %v11806_v1 }
0x11b9   :  { %9876 = vmatprep.subr.bf16.mxu0 %v10266_v2 }
0x11bc   :  { %9878 = vmatpush3.bf16.msra.mxu0 %v11810_v10 }
0x11bd   :  { %9879 = vmatprep.subr.bf16.mxu0 %v10266_v2 }
0x11c0   :  { %9881 = vmatpush3.bf16.msra.mxu0 %v11814_v21 }
0x11c1   :  { %9882 = vmatprep.subr.bf16.mxu0 %v10266_v2 }
0x11c4   :  { %9884 = vmatpush3.bf16.msra.mxu0 %v11818_v9 }
0x11c5   :  { %9909 = vmatprep.subr.bf16.mxu0 %v10266_v2 }
0x11c7   :  { %8436 = vmatmul.mubr.f32.vlgmr.msra.gmra.mrb[52].mxu0 %v10122_v51 }
0x11c8   :  { %9911 = vmatpush3.bf16.msra.mxu0 %v11825_v36  ;;  %8505 = vmatprep.mubr.msk.f32.mxu0 %vm10267_vm0, %v10268_v3 }
0x11c9   :  { %9912 = vmatprep.subr.bf16.mxu0 %v10266_v2 }
0x11cc   :  { %9914 = vmatpush3.bf16.msra.mxu0 %v11828_v4 }
0x11cd   :  { %9915 = vmatprep.subr.bf16.mxu0 %v10266_v2 }
0x11d0   :  { %9917 = vmatpush3.bf16.msra.mxu0 %v11832_v15 }
0x11d1   :  { %9918 = vmatprep.subr.bf16.mxu0 %v10266_v2 }
0x11d4   :  { %9920 = vmatpush3.bf16.msra.mxu0 %v11836_v31 }
0x11d5   :  { %9921 = vmatprep.subr.bf16.mxu0 %v10266_v2 }
0x11d8   :  { %9923 = vmatpush3.bf16.msra.mxu0 %v11841_v53 }
0x11d9   :  { %9924 = vmatprep.subr.bf16.mxu0 %v10266_v2 }
0x11dc   :  { %9926 = vmatpush3.bf16.msra.mxu0 %v11845_v49 }
0x11dd   :  { %9927 = vmatprep.subr.bf16.mxu0 %v10266_v2 }
0x11e0   :  { %9929 = vmatpush3.bf16.msra.mxu0 %v11848_v45 }
0x11e1   :  { %9930 = vmatprep.subr.bf16.mxu0 %v10266_v2 }
0x11e4   :  { %9932 = vmatpush3.bf16.msra.mxu0 %v11852_v39 }
0x11e5   :  { %9957 = vmatprep.subr.bf16.mxu0 %v10266_v2 }
0x125c   :  { %v4879_v52 = vpop.f32.mrb[50].mxu1 }
0x125d   :  { %v8402_v18 = vpop.f32.mrb[51].mxu1 }
0x127a   :  { %v4793_v35 = vpop.f32.mrb[50].mxu0 }
0x127b   :  { %v4794_v54 = vadd.f32 %v12042_v47, %v4793_v35  ;;  %v8367_v55 = vpop.f32.mrb[51].mxu0 }
0x127d   :  { %v4883_v33 = vadd.f32 %v4879_v52, %v4794_v54 }
0x127f   :  { %v4891_v38 = vadd.f32 %v12048_v63, %v4883_v33 }
0x1281   :  { %10123 = vtanh.f32 %v4891_v38 }
0x128b   :  { %v10124_v62 = vpop.eup %10123 }
0x128c   :  { %8506 = vmatmul.mubr.f32.vlgmr.msra.gmra.mrb[54].mxu0 %v10124_v62  ;;  %v4893_v44 = vmul.f32 %v11895_v20, %v10124_v62 }
0x128d   :  { %9959 = vmatpush3.bf16.msra.mxu0 %v11948_v30  ;;  %8575 = vmatprep.mubr.msk.f32.mxu0 %vm10267_vm0, %v10268_v3 }
0x128e   :  { %4894 = vadd.xlane.f32.xlu1 %v4893_v44  ;;  %9960 = vmatprep.subr.bf16.mxu0 %v10266_v2 }
0x1291   :  { %9962 = vmatpush3.bf16.msra.mxu0 %v11952_v61 }
0x1292   :  { %9963 = vmatprep.subr.bf16.mxu0 %v10266_v2 }
0x1295   :  { %9965 = vmatpush3.bf16.msra.mxu0 %v11857_v17 }
0x1296   :  { %9966 = vmatprep.subr.bf16.mxu0 %v10266_v2 }
0x1299   :  { %9968 = vmatpush3.bf16.msra.mxu0 %v11860_v46 }
0x129a   :  { %v4995_v30 = vpop.f32.mrb[52].mxu0  ;;  %9969 = vmatprep.subr.bf16.mxu0 %v10266_v2 }
0x129b   :  { %v4999_v25 = vadd.f32 %v4995_v30, %v4912_v6  ;;  %v8437_v50 = vpop.f32.mrb[53].mxu0 }
0x129d   :  { %v5007_v61 = vadd.f32 %v11909_v27, %v4999_v25  ;;  %9971 = vmatpush3.bf16.msra.mxu0 %v11865_v22 }
0x129e   :  { %9972 = vmatprep.subr.bf16.mxu0 %v10266_v2 }
0x129f   :  { %10125 = vtanh.f32 %v5007_v61 }
0x12a1   :  { %9974 = vmatpush3.bf16.msra.mxu0 %v11878_v59 }
0x12a2   :  { %9975 = vmatprep.subr.bf16.mxu0 %v10266_v2 }
0x12a5   :  { %9977 = vmatpush3.bf16.msra.mxu0 %v11882_v41 }
0x12a6   :  { %9978 = vmatprep.subr.bf16.mxu0 %v10266_v2 }
0x12a9   :  { %v10126_v28 = vpop.eup %10125  ;;  %9980 = vmatpush3.bf16.msra.mxu0 %v11885_v11 }
0x12aa   :  { %8471 = vmatmul.mubr.f32.vlgmr.msra.gmra.mrb[52].mxu1 %v10126_v28 }
0x12ab   :  { %9935 = vmatpush3.bf16.msra.mxu1 %v11789_v42  ;;  %8540 = vmatprep.mubr.msk.f32.mxu1 %vm10267_vm0, %v10268_v3 }
0x12ac   :  { %9936 = vmatprep.subr.bf16.mxu1 %v10266_v2 }
0x12af   :  { %9938 = vmatpush3.bf16.msra.mxu1 %v11792_v43 }
0x12b0   :  { %9939 = vmatprep.subr.bf16.mxu1 %v10266_v2 }
0x12b3   :  { %9941 = vmatpush3.bf16.msra.mxu1 %v11798_v16 }
0x12b4   :  { %9942 = vmatprep.subr.bf16.mxu1 %v10266_v2 }
0x12b7   :  { %9944 = vmatpush3.bf16.msra.mxu1 %v11802_v7 }
0x12b8   :  { %9945 = vmatprep.subr.bf16.mxu1 %v10266_v2 }
0x12bb   :  { %9947 = vmatpush3.bf16.msra.mxu1 %v11806_v1 }
0x12bc   :  { %9948 = vmatprep.subr.bf16.mxu1 %v10266_v2 }
0x12bf   :  { %9950 = vmatpush3.bf16.msra.mxu1 %v11810_v10 }
0x12c0   :  { %9951 = vmatprep.subr.bf16.mxu1 %v10266_v2 }
0x12c3   :  { %9953 = vmatpush3.bf16.msra.mxu1 %v11814_v21 }
0x12c4   :  { %9954 = vmatprep.subr.bf16.mxu1 %v10266_v2 }
0x12c7   :  { %9956 = vmatpush3.bf16.msra.mxu1 %v11818_v9 }
0x12c8   :  { %9981 = vmatprep.subr.bf16.mxu1 %v10266_v2 }
0x12ca   :  { %8541 = vmatmul.mubr.f32.vlgmr.msra.gmra.mrb[54].mxu1 %v10126_v28 }
0x12cb   :  { %9983 = vmatpush3.bf16.msra.mxu1 %v11825_v36  ;;  %8610 = vmatprep.mubr.msk.f32.mxu1 %vm10267_vm0, %v10268_v3 }
0x12cc   :  { %9984 = vmatprep.subr.bf16.mxu1 %v10266_v2 }
0x12cf   :  { %9986 = vmatpush3.bf16.msra.mxu1 %v11828_v4 }
0x12d0   :  { %9987 = vmatprep.subr.bf16.mxu1 %v10266_v2 }
0x12d3   :  { %9989 = vmatpush3.bf16.msra.mxu1 %v11832_v15 }
0x12d4   :  { %9990 = vmatprep.subr.bf16.mxu1 %v10266_v2 }
0x12d7   :  { %9992 = vmatpush3.bf16.msra.mxu1 %v11836_v31 }
0x12d8   :  { %9993 = vmatprep.subr.bf16.mxu1 %v10266_v2 }
0x12db   :  { %9995 = vmatpush3.bf16.msra.mxu1 %v11841_v53 }
0x12dc   :  { %9996 = vmatprep.subr.bf16.mxu1 %v10266_v2 }
0x12df   :  { %9998 = vmatpush3.bf16.msra.mxu1 %v11845_v49 }
0x12e0   :  { %9999 = vmatprep.subr.bf16.mxu1 %v10266_v2 }
0x12e3   :  { %10001 = vmatpush3.bf16.msra.mxu1 %v11848_v45 }
0x12e4   :  { %10002 = vmatprep.subr.bf16.mxu1 %v10266_v2  ;;  %v5216_v2 = vmul.f32 %v11707_v29, %v11400_v37 }
0x12e6   :  { %v5217_v36 = vadd.f32 %v11716_v40, %v5216_v2  ;;  %v4590_v40 = vpop.xlane.xlu1 %4589 }
0x12e7   :  { %10004 = vmatpush3.bf16.msra.mxu1 %v11852_v39  ;;  %v4591_v11 = vadd.f32 %v11867_v23, %v4590_v40 }
0x12e9   :  { %vm4592_vm0 = vcmp.eq.f32.partialorder %v4591_v11, -10002.0 }
0x12ea   :  { %vm4593_vm11 = vmor %vm11965_vm7, %vm4592_vm0 }
0x135f   :  { %v5184_v3 = vpop.f32.mrb[54].mxu0 }
0x1360   :  { %v8507_v42 = vpop.f32.mrb[55].mxu0 }
0x137d   :  { %v5098_v43 = vpop.f32.mrb[52].mxu1 }
0x137e   :  { %v5099_v16 = vadd.f32 %v12042_v47, %v5098_v43  ;;  %v8472_v7 = vpop.f32.mrb[53].mxu1 }
0x1380   :  { %v5188_v1 = vadd.f32 %v5184_v3, %v5099_v16 }
0x1382   :  { %v5196_v10 = vadd.f32 %v12048_v63, %v5188_v1 }
0x1384   :  { %10127 = vtanh.f32 %v5196_v10 }
0x138e   :  { %v10128_v21 = vpop.eup %10127 }
0x138f   :  { %8611 = vmatmul.mubr.f32.vlgmr.msra.gmra.mrb[56].mxu1 %v10128_v21  ;;  %v5198_v9 = vmul.f32 %v11895_v20, %v10128_v21 }
0x1391   :  { %5199 = vadd.xlane.f32.xlu0 %v5198_v9 }
0x139d   :  { %v5300_v4 = vpop.f32.mrb[54].mxu1 }
0x139e   :  { %v5304_v15 = vadd.f32 %v5300_v4, %v5217_v36  ;;  %v8542_v31 = vpop.f32.mrb[55].mxu1 }
0x13a0   :  { %v5312_v53 = vadd.f32 %v11909_v27, %v5304_v15  ;;  %v4895_v27 = vpop.xlane.xlu1 %4894 }
0x13a1   :  { %v4896_v60 = vadd.f32 %v11867_v23, %v4895_v27 }
0x13a2   :  { %10129 = vtanh.f32 %v5312_v53 }
0x13a3   :  { %vm4897_vm9 = vcmp.eq.f32.partialorder %v4896_v60, -10002.0 }
0x13a4   :  { %vm4898_vm12 = vmor %vm4593_vm11, %vm4897_vm9 }
0x13ac   :  { %v10130_v49 = vpop.eup %10129 }
0x13ad   :  { %8576 = vmatmul.mubr.f32.vlgmr.msra.gmra.mrb[56].mxu0 %v10130_v49 }
0x141e   :  { %v5200_v56 = vpop.xlane.xlu0 %5199 }
0x141f   :  { %v5201_v14 = vadd.f32 %v11867_v23, %v5200_v56 }
0x1421   :  { %vm5202_vm10 = vcmp.eq.f32.partialorder %v5201_v14, -10002.0 }
0x1422   :  { %vm5203_vm14 = vmor %vm4898_vm12, %vm5202_vm10 }
0x1462   :  { %v5489_v45 = vpop.f32.mrb[56].mxu1 }
0x1463   :  { %v8612_v39 = vpop.f32.mrb[57].mxu1 }
0x1480   :  { %v5403_v17 = vpop.f32.mrb[56].mxu0 }
0x1481   :  { %v5404_v46 = vadd.f32 %v12042_v47, %v5403_v17  ;;  %v8577_v22 = vpop.f32.mrb[57].mxu0 }
0x1483   :  { %v5493_v59 = vadd.f32 %v5489_v45, %v5404_v46 }
0x1485   :  { %v5501_v41 = vadd.f32 %v12048_v63, %v5493_v59 }
0x1487   :  { %10131 = vtanh.f32 %v5501_v41 }
0x1491   :  { %v10132_v37 = vpop.eup %10131 }
0x1492   :  { %v5503_v29 = vmul.f32 %v11895_v20, %v10132_v37 }
0x1494   :  { %5504 = vadd.xlane.f32.xlu1 %v5503_v29 }
0x14a5   :  { %4595 = vrot.lane.b32.xlu1 %v4591_v11, %s10262_s25 }
0x14a9   :  { %4900 = vrot.lane.b32.xlu1 %v4896_v60, %s10287_s12 }
0x14ad   :  { %5205 = vrot.lane.b32.xlu1 %v5201_v14, %s10288_s13 }
0x1521   :  { %v5505_v20 = vpop.xlane.xlu1 %5504 }
0x1522   :  { %v5506_v24 = vadd.f32 %v11867_v23, %v5505_v20 }
0x1524   :  { %vm5507_vm15 = vcmp.eq.f32.partialorder %v5506_v24, -10002.0 }
0x1525   :  { %v4596_v13 = vpop.permute.xlu1 %4595  ;;  %vm5508_vm1 = vmor %vm5203_vm14, %vm5507_vm15 }
0x1526   :  { %4599 = vst.msk [vmem:[%s12160_s20] sm:$0xff] %vm4598_vm13, %v4596_v13  ;;  %v5510_v48 = vsel %vm5508_vm1, %v5506_v24, -10002.0 }
0x1527   :  { %5512 = vrot.lane.b32.xlu0 %v5510_v48, %s10289_s29 }
0x1529   :  { %v4901_v19 = vpop.permute.xlu1 %4900 }
0x152a   :  { %4904 = vst.msk [vmem:[%s12160_s20] sm:$0xff] %vm4903_vm3, %v4901_v19 }
0x152d   :  { %v5206_v23 = vpop.permute.xlu1 %5205 }
0x152e   :  { %5209 = vst.msk [vmem:[%s12160_s20] sm:$0xff] %vm5208_vm4, %v5206_v23 }
0x152f   :  { %5509 = vst.msk [vmem:[%s12160_s20] sm:$0xff] %vm2127_vm2, %v10290_v57 }
0x1599   :  { %v5513_v58 = vpop.permute.xlu0 %5512 }
0x159a   :  { %5516 = vst.msk [vmem:[%s12160_s20] sm:$0xff] %vm5515_vm5, %v5513_v58 }
0x159b   :  { %5525 = vsyncpa [#allocation5], 1 }
0x159c   :  { %5526 = vsyncpa [#allocation7], 1 }
0x159d   :  { %5527 = vsyncpa [#allocation10], 1 }

</bundles_post_ra>
